<compile_context>
chip_gen: v5e
topology: v5e:2x2
jax: 0.10.0
libtpu: 0.0.40
codegen_flags: <defaults>
</compile_context>

<pallas_src>
from functools import partial

import jax
import jax.numpy as jnp
from jax.experimental import pallas as pl
from jax.experimental.pallas import tpu as pltpu


def _round_up(x, m):
    return -(-x // m) * m


# ----------------------------------------------------------------------------
# fused kernel
# ----------------------------------------------------------------------------
def _inverted_residual_kernel(
        xp_ref, w1_ref, b1_ref, wdw_ref, b2_ref, w3_ref, b3_ref, o_ref, *,
        stride, dilation, th, wo, h_in, w_in, use_res):
    """Whole InvertedResidual block for one (batch, row-tile) grid step.

    xp_ref : (1, Hp, Wp8, Cin) zero-padded input image (Wp8 sublane-aligned,
             resident in VMEM across row tiles)
    w1_ref : (Cin, hidden)     1x1 expand weights  (BN1 scale folded in)
    wdw_ref: (3, 3, hidden)    depthwise weights   (BN2 scale folded in)
    w3_ref : (hidden, oup)     1x1 project weights (BN3 scale folded in)
    b*_ref : folded BN biases
    o_ref  : (1, oup, th*wo)   output row tile, NCHW (flattened spatial), lane dense
    """
    pad = dilation
    t = pl.program_id(1)
    rows_in = (th - 1) * stride + 2 * pad + 1        # padded rows read this tile
    r0 = t * (th * stride)                           # first padded row of the tile

    xw = xp_ref[0, pl.ds(r0, rows_in), :, :]         # (rows_in, Wp8, Cin)
    wp8 = xw.shape[1]
    cin = xw.shape[2]
    hidden = w1_ref.shape[1]

    # ---- 1x1 expand (MXU) + BN bias + ReLU6 ---------------------------------
    x2d = xw.reshape(rows_in * wp8, cin)             # free: wp8 % 8 == 0
    h2d = jnp.dot(x2d, w1_ref[...], preferred_element_type=jnp.float32)
    h2d = jnp.clip(h2d + b1_ref[...], 0.0, 6.0)
    hact = h2d.reshape(rows_in, wp8, hidden)         # free: wp8 % 8 == 0

    # torch zero-pads the *hidden* activation inside the depthwise conv, so the
    # halo positions (which carry clip(b1, 0, 6) here) must be exactly zero.
    # Channel-invariant mask (rows_in, Wp8, 1), broadcast along the lane axis.
    row_ids = jax.lax.broadcasted_iota(jnp.int32, (rows_in, wp8, 1), 0) + r0
    col_ids = jax.lax.broadcasted_iota(jnp.int32, (rows_in, wp8, 1), 1)
    interior = ((row_ids >= pad) & (row_ids < pad + h_in)
                & (col_ids >= pad) & (col_ids < pad + w_in))
    hact = jnp.where(interior, hact, 0.0)

    # ---- 3x3 depthwise conv (groups == channels) + BN bias + ReLU6 ----------
    # TODO(synk): taps stay as 9 unrolled VPU broadcast-mult-adds; a fori_loop
    # formulation would need dynamic slicing for no measured gain at this size.
    wdw = wdw_ref[...].astype(jnp.float32)           # (3, 3, hidden), scale folded
    if stride == 2:
        # De-interleave W once so every tap below is a contiguous slice.
        h_par = (hact[:, 0::2, :], hact[:, 1::2, :])
    acc = None
    for kh in range(3):
        r_off = kh * dilation
        for kw in range(3):
            c_off = kw * dilation
            if stride == 1:
                patch = hact[r_off:r_off + th, c_off:c_off + wo, :]
            else:
                src = h_par[c_off % 2]
                patch = src[r_off:r_off + 2 * (th - 1) + 1:2,
                            c_off // 2:c_off // 2 + wo, :]
            tap = patch * wdw[kh, kw, :]
            acc = tap if acc is None else acc + tap  # init from first tap
    y = jnp.clip(acc + b2_ref[...], 0.0, 6.0)        # (th, wo, hidden)

    # ---- 1x1 projection (MXU) + BN bias (+ residual), lane-dense NCHW store -
    y2d = y.reshape(th * wo, hidden)
    out2d = jnp.dot(y2d, w3_ref[...], preferred_element_type=jnp.float32)
    out2d = out2d + b3_ref[...]
    if use_res:
        # stride == 1 here: output rows [t*th, t*th+th) == window rows [pad, pad+th)
        res = xw[pad:pad + th, pad:pad + wo, :]
        out2d = out2d + res.reshape(th * wo, cin).astype(jnp.float32)
    # (th*wo, oup) -> (oup, th*wo): one small XLU transpose; the store is fully
    # lane dense and already in NCHW HBM layout.
    o_ref[0, :, :] = out2d.T.astype(o_ref.dtype)


# ----------------------------------------------------------------------------
# wrapper
# ----------------------------------------------------------------------------
def _fold_bn(gamma, beta, mean, var, eps=1e-5):
    scale = gamma * jax.lax.rsqrt(var + eps)
    bias = beta - mean * scale
    return scale, bias


def _vmem_limit_bytes():
    cap = 64 << 20                                   # conservative default (v7x)
    try:
        info = pltpu.get_tpu_info()
        cap = int(getattr(info, "vmem_capacity_bytes", cap) or cap)
    except Exception:
        pass
    # ~48 MiB on v7x (64 MiB physical), 96 MiB on v5e/v6e (128 MiB physical).
    return int(min(cap * 3 // 4, 96 << 20))


def _pick_row_tile(ho, wo, wp8, hidden, stride, dilation, budget_bytes, n_batch):
    """Largest output-row tile th that (a) divides Ho, (b) keeps the
    lane/sublane-padded per-step live intermediates under budget and (c) keeps
    the flattened NCHW output block lane-aligned (th == Ho or (th*wo) % 128 == 0).
    When batch == 1, prefer >= 2 row tiles so both v7x TensorCores get a step."""
    hid_pad = _round_up(hidden, 128)
    wo_pad = _round_up(wo, 8)

    def fits(th):
        rows_in = (th - 1) * stride + 2 * dilation + 1
        h_bytes = rows_in * wp8 * hid_pad * 4
        y_bytes = th * wo_pad * hid_pad * 4
        live = (3 if stride == 2 else 2) * h_bytes + 3 * y_bytes
        return live <= budget_bytes

    cands = [th for th in range(1, ho + 1)
             if ho % th == 0 and (th == ho or (th * wo) % 128 == 0) and fits(th)]
    if not cands:
        return ho                                    # single full tile fallback
    if n_batch == 1:
        split = [th for th in cands if th < ho]
        if split:
            return max(split)
    return max(cands)


def inverted_residual_forward(x_nchw, params, *, stride, dilation, inp, oup):
    assert stride in (1, 2)
    use_res = (stride == 1) and (inp == oup)
    pad = dilation

    n, cin, h, w = x_nchw.shape
    hidden = params["w1"].shape[1]

    # Fold BN scales into the conv weights once (host/XLA side); only the bias
    # adds remain inside the kernel.
    s1, b1 = _fold_bn(*params["bn1"])
    s2, b2 = _fold_bn(*params["bn2"])
    s3, b3 = _fold_bn(*params["bn3"])
    w1f = params["w1"] * s1[None, :]
    wdwf = params["wdw"] * s2[None, None, :]
    w3f = params["w3"] * s3[None, :]

    ho = (h - 1) // stride + 1
    wo = (w - 1) // stride + 1
    hp = h + 2 * pad
    wp_conv = w + 2 * pad
    wp8 = _round_up(wp_conv, 8)                      # sublane-align padded width

    # Small XLA prologue: NCHW -> NHWC and zero pad (halo + alignment columns);
    # the in-kernel interior mask guarantees exact zeros after the BN bias.
    x = jnp.transpose(x_nchw, (0, 2, 3, 1))
    xp = jnp.pad(x, ((0, 0), (pad, pad), (pad, pad + (wp8 - wp_conv)), (0, 0)))

    vmem_limit = _vmem_limit_bytes()
    th = _pick_row_tile(ho, wo, wp8, hidden, stride, dilation,
                        budget_bytes=vmem_limit // 3, n_batch=n)
    n_row_tiles = ho // th

    kernel = partial(_inverted_residual_kernel,
                     stride=stride, dilation=dilation, th=th, wo=wo,
                     h_in=h, w_in=w, use_res=use_res)

    out_flat = pl.pallas_call(
        kernel,
        out_shape=jax.ShapeDtypeStruct((n, oup, ho * wo), x.dtype),
        grid=(n, n_row_tiles),
        in_specs=[
            # full padded image per batch element; block index ignores the row
            # tile axis so it stays resident in VMEM across row tiles.
            pl.BlockSpec((1, hp, wp8, cin), lambda nb, tb: (nb, 0, 0, 0)),
            pl.BlockSpec((cin, hidden), lambda nb, tb: (0, 0)),
            pl.BlockSpec((1, hidden), lambda nb, tb: (0, 0)),
            pl.BlockSpec((3, 3, hidden), lambda nb, tb: (0, 0, 0)),
            pl.BlockSpec((1, 1, hidden), lambda nb, tb: (0, 0, 0)),
            pl.BlockSpec((hidden, oup), lambda nb, tb: (0, 0)),
            pl.BlockSpec((1, oup), lambda nb, tb: (0, 0)),
        ],
        out_specs=pl.BlockSpec((1, oup, th * wo), lambda nb, tb: (nb, 0, tb)),
        compiler_params=pltpu.CompilerParams(
            dimension_semantics=("parallel", "parallel"),
            vmem_limit_bytes=vmem_limit,
        ),
    )(xp,
      w1f, b1.reshape(1, hidden),
      wdwf, b2.reshape(1, 1, hidden),
      w3f, b3.reshape(1, oup))

    # NCHW already; only a metadata-only reshape of the flattened spatial axis.
    return out_flat.reshape(n, oup, ho, wo)


# ----------------------------------------------------------------------------
# params, reference & demo
# ----------------------------------------------------------------------------
def init_params(key, inp, oup, expand_ratio):
    hidden = inp * expand_ratio
    ks = jax.random.split(key, 6)

    def bn_params(k, c):
        k1, k2, k3, k4 = jax.random.split(k, 4)
        gamma = 1.0 + 0.1 * jax.random.normal(k1, (c,), jnp.float32)
        beta = 0.1 * jax.random.normal(k2, (c,), jnp.float32)
        mean = 0.1 * jax.random.normal(k3, (c,), jnp.float32)
        var = jax.random.uniform(k4, (c,), jnp.float32, 0.5, 1.5)
        return (gamma, beta, mean, var)

    return dict(
        w1=0.1 * jax.random.normal(ks[0], (inp, hidden), jnp.float32),    # 1x1 expand
        bn1=bn_params(ks[1], hidden),
        wdw=0.1 * jax.random.normal(ks[2], (3, 3, hidden), jnp.float32),  # depthwise
        bn2=bn_params(ks[3], hidden),
        w3=0.1 * jax.random.normal(ks[4], (hidden, oup), jnp.float32),    # 1x1 project
        bn3=bn_params(ks[5], oup),
    )


def _reference_forward(x_nchw, params, *, stride, dilation, inp, oup):
    """Pure-JAX (XLA) reference with the torch module's semantics."""
    use_res = (stride == 1) and (inp == oup)
    x = jnp.transpose(x_nchw, (0, 2, 3, 1))
    n, h, w, _ = x.shape
    s1, b1 = _fold_bn(*params["bn1"])
    s2, b2 = _fold_bn(*params["bn2"])
    s3, b3 = _fold_bn(*params["bn3"])

    hid = jnp.clip(jnp.einsum("nhwc,cd->nhwd", x, params["w1"],
                              precision=jax.lax.Precision.HIGHEST) * s1 + b1, 0.0, 6.0)
    hpad = jnp.pad(hid, ((0, 0), (dilation, dilation), (dilation, dilation), (0, 0)))
    ho = (h - 1) // stride + 1
    wo = (w - 1) // stride + 1
    acc = jnp.zeros((n, ho, wo, hid.shape[-1]), jnp.float32)
    for kh in range(3):
        for kw in range(3):
            r, c = kh * dilation, kw * dilation
            patch = hpad[:, r:r + stride * (ho - 1) + 1:stride,
                            c:c + stride * (wo - 1) + 1:stride, :]
            acc = acc + patch * params["wdw"][kh, kw, :]
    y = jnp.clip(acc * s2 + b2, 0.0, 6.0)
    out = jnp.einsum("nhwc,cd->nhwd", y, params["w3"],
                     precision=jax.lax.Precision.HIGHEST) * s3 + b3
    if use_res:
        out = out + x
    return jnp.transpose(out, (0, 3, 1, 2))


if __name__ == "__main__":
    # InvertedResidual(inp=4, oup=4, stride=1, expand_ratio=6, dalited=1)
    inp, oup, stride, expand_ratio, dalited = 4, 4, 1, 6, 1
    n, h, w = 2, 16, 16

    key = jax.random.PRNGKey(0)
    kx, kp = jax.random.split(key)
    x = jax.random.normal(kx, (n, inp, h, w), jnp.float32)
    params = init_params(kp, inp, oup, expand_ratio)

    out = inverted_residual_forward(
        x, params, stride=stride, dilation=dalited, inp=inp, oup=oup)
    jax.block_until_ready(out)
    assert out.shape == (n, oup, h, w), out.shape

    ref = _reference_forward(
        x, params, stride=stride, dilation=dalited, inp=inp, oup=oup)
    assert bool(jnp.allclose(out, ref, atol=2e-4, rtol=2e-4)), "mismatch vs reference"

    print("KERNEL_OK")
</pallas_src>

<mosaic_0001>
module attributes {stable_mosaic.version = 11 : i64} {
  func.func @_inverted_residual_kernel(%arg0: i32, %arg1: i32, %arg2: memref<1x18x24x4xf32, #tpu.memory_space<vmem>>, %arg3: memref<4x24xf32, #tpu.memory_space<vmem>>, %arg4: memref<1x24xf32, #tpu.memory_space<vmem>>, %arg5: memref<3x3x24xf32, #tpu.memory_space<vmem>>, %arg6: memref<1x1x24xf32, #tpu.memory_space<vmem>>, %arg7: memref<24x4xf32, #tpu.memory_space<vmem>>, %arg8: memref<1x4xf32, #tpu.memory_space<vmem>>, %arg9: memref<1x4x256xf32, #tpu.memory_space<vmem>>) attributes {dimension_semantics = [#tpu.dimension_semantics<parallel>, #tpu.dimension_semantics<parallel>], iteration_bounds = array<i64: 2, 1>, scalar_prefetch = 0 : i64, scratch_operands = 0 : i64, tpu.core_type = #tpu.core_type<tc>, window_params = [{transform_indices = @transform_0, window_bounds = array<i64: 1, 18, 24, 4>}, {pipeline_mode = #tpu.pipeline_mode<synchronous>, transform_indices = @transform_1, window_bounds = array<i64: 4, 24>}, {pipeline_mode = #tpu.pipeline_mode<synchronous>, transform_indices = @transform_2, window_bounds = array<i64: 1, 24>}, {pipeline_mode = #tpu.pipeline_mode<synchronous>, transform_indices = @transform_3, window_bounds = array<i64: 3, 3, 24>}, {pipeline_mode = #tpu.pipeline_mode<synchronous>, transform_indices = @transform_4, window_bounds = array<i64: 1, 1, 24>}, {pipeline_mode = #tpu.pipeline_mode<synchronous>, transform_indices = @transform_5, window_bounds = array<i64: 24, 4>}, {pipeline_mode = #tpu.pipeline_mode<synchronous>, transform_indices = @transform_6, window_bounds = array<i64: 1, 4>}, {transform_indices = @transform_7, window_bounds = array<i64: 1, 4, 256>}]} {
    %c16_i32 = arith.constant 16 : i32
    %0 = arith.muli %arg1, %c16_i32 : i32
    %c0 = arith.constant 0 : index
    %1 = arith.index_cast %0 : i32 to index
    %c0_0 = arith.constant 0 : index
    %c0_1 = arith.constant 0 : index
    %2 = vector.load %arg2[%c0, %1, %c0_0, %c0_1] : memref<1x18x24x4xf32, #tpu.memory_space<vmem>>, vector<1x18x24x4xf32>
    %3 = vector.shape_cast %2 : vector<1x18x24x4xf32> to vector<18x24x4xf32>
    %4 = vector.shape_cast %3 : vector<18x24x4xf32> to vector<432x4xf32>
    %c0_2 = arith.constant 0 : index
    %c0_3 = arith.constant 0 : index
    %5 = vector.load %arg3[%c0_2, %c0_3] : memref<4x24xf32, #tpu.memory_space<vmem>>, vector<4x24xf32>
    %cst = arith.constant dense<0.000000e+00> : vector<432x24xf32>
    %6 = tpu.matmul %4, %5, %cst {dimension_numbers = #tpu.dot_dimension_numbers<[1], [0], [0], [1], [0, 0, 1, 1], [], []>} : vector<432x4xf32>, vector<4x24xf32>, vector<432x24xf32> -> vector<432x24xf32>
    %c0_4 = arith.constant 0 : index
    %c0_5 = arith.constant 0 : index
    %7 = vector.load %arg4[%c0_4, %c0_5] : memref<1x24xf32, #tpu.memory_space<vmem>>, vector<1x24xf32>
    %8 = vector.broadcast %7 : vector<1x24xf32> to vector<432x24xf32>
    %9 = arith.addf %6, %8 : vector<432x24xf32>
    %cst_6 = arith.constant 0.000000e+00 : f32
    %cst_7 = arith.constant 6.000000e+00 : f32
    %10 = vector.broadcast %cst_6 : f32 to vector<432x24xf32>
    %11 = arith.maximumf %10, %9 : vector<432x24xf32>
    %12 = vector.broadcast %cst_7 : f32 to vector<432x24xf32>
    %13 = arith.minimumf %12, %11 : vector<432x24xf32>
    %14 = vector.shape_cast %13 : vector<432x24xf32> to vector<18x24x24xf32>
    %15 = tpu.iota {dimensions = array<i32: 0>} : vector<18x24x1xi32>
    %16 = vector.broadcast %0 : i32 to vector<18x24x1xi32>
    %17 = arith.addi %15, %16 : vector<18x24x1xi32>
    %18 = tpu.iota {dimensions = array<i32: 1>} : vector<18x24x1xi32>
    %c1_i32 = arith.constant 1 : i32
    %19 = vector.broadcast %c1_i32 : i32 to vector<18x24x1xi32>
    %20 = arith.cmpi sge, %17, %19 : vector<18x24x1xi32>
    %c17_i32 = arith.constant 17 : i32
    %21 = vector.broadcast %c17_i32 : i32 to vector<18x24x1xi32>
    %22 = arith.cmpi slt, %17, %21 : vector<18x24x1xi32>
    %23 = arith.andi %20, %22 : vector<18x24x1xi1>
    %c1_i32_8 = arith.constant 1 : i32
    %24 = vector.broadcast %c1_i32_8 : i32 to vector<18x24x1xi32>
    %25 = arith.cmpi sge, %18, %24 : vector<18x24x1xi32>
    %26 = arith.andi %23, %25 : vector<18x24x1xi1>
    %c17_i32_9 = arith.constant 17 : i32
    %27 = vector.broadcast %c17_i32_9 : i32 to vector<18x24x1xi32>
    %28 = arith.cmpi slt, %18, %27 : vector<18x24x1xi32>
    %29 = arith.andi %26, %28 : vector<18x24x1xi1>
    %cst_10 = arith.constant 0.000000e+00 : f32
    %30 = vector.shape_cast %29 : vector<18x24x1xi1> to vector<18x24x1xi1>
    %31 = vector.broadcast %30 : vector<18x24x1xi1> to vector<18x24x24xi1>
    %32 = vector.broadcast %cst_10 : f32 to vector<18x24x24xf32>
    %33 = arith.select %31, %14, %32 : vector<18x24x24xi1>, vector<18x24x24xf32>
    %c0_11 = arith.constant 0 : index
    %c0_12 = arith.constant 0 : index
    %c0_13 = arith.constant 0 : index
    %34 = vector.load %arg5[%c0_11, %c0_12, %c0_13] : memref<3x3x24xf32, #tpu.memory_space<vmem>>, vector<3x3x24xf32>
    %35 = vector.extract_strided_slice %33 {offsets = [0, 0, 0], sizes = [16, 16, 24], strides = [1, 1, 1]} : vector<18x24x24xf32> to vector<16x16x24xf32>
    %36 = vector.extract_strided_slice %34 {offsets = [0, 0, 0], sizes = [1, 1, 24], strides = [1, 1, 1]} : vector<3x3x24xf32> to vector<1x1x24xf32>
    %37 = vector.shape_cast %36 : vector<1x1x24xf32> to vector<24xf32>
    %38 = vector.shape_cast %37 : vector<24xf32> to vector<1x1x24xf32>
    %39 = vector.broadcast %38 : vector<1x1x24xf32> to vector<16x16x24xf32>
    %40 = arith.mulf %35, %39 : vector<16x16x24xf32>
    %41 = vector.extract_strided_slice %33 {offsets = [0, 1, 0], sizes = [16, 16, 24], strides = [1, 1, 1]} : vector<18x24x24xf32> to vector<16x16x24xf32>
    %42 = vector.extract_strided_slice %34 {offsets = [0, 1, 0], sizes = [1, 1, 24], strides = [1, 1, 1]} : vector<3x3x24xf32> to vector<1x1x24xf32>
    %43 = vector.shape_cast %42 : vector<1x1x24xf32> to vector<24xf32>
    %44 = vector.shape_cast %43 : vector<24xf32> to vector<1x1x24xf32>
    %45 = vector.broadcast %44 : vector<1x1x24xf32> to vector<16x16x24xf32>
    %46 = arith.mulf %41, %45 : vector<16x16x24xf32>
    %47 = arith.addf %40, %46 : vector<16x16x24xf32>
    %48 = vector.extract_strided_slice %33 {offsets = [0, 2, 0], sizes = [16, 16, 24], strides = [1, 1, 1]} : vector<18x24x24xf32> to vector<16x16x24xf32>
    %49 = vector.extract_strided_slice %34 {offsets = [0, 2, 0], sizes = [1, 1, 24], strides = [1, 1, 1]} : vector<3x3x24xf32> to vector<1x1x24xf32>
    %50 = vector.shape_cast %49 : vector<1x1x24xf32> to vector<24xf32>
    %51 = vector.shape_cast %50 : vector<24xf32> to vector<1x1x24xf32>
    %52 = vector.broadcast %51 : vector<1x1x24xf32> to vector<16x16x24xf32>
    %53 = arith.mulf %48, %52 : vector<16x16x24xf32>
    %54 = arith.addf %47, %53 : vector<16x16x24xf32>
    %55 = vector.extract_strided_slice %33 {offsets = [1, 0, 0], sizes = [16, 16, 24], strides = [1, 1, 1]} : vector<18x24x24xf32> to vector<16x16x24xf32>
    %56 = vector.extract_strided_slice %34 {offsets = [1, 0, 0], sizes = [1, 1, 24], strides = [1, 1, 1]} : vector<3x3x24xf32> to vector<1x1x24xf32>
    %57 = vector.shape_cast %56 : vector<1x1x24xf32> to vector<24xf32>
    %58 = vector.shape_cast %57 : vector<24xf32> to vector<1x1x24xf32>
    %59 = vector.broadcast %58 : vector<1x1x24xf32> to vector<16x16x24xf32>
    %60 = arith.mulf %55, %59 : vector<16x16x24xf32>
    %61 = arith.addf %54, %60 : vector<16x16x24xf32>
    %62 = vector.extract_strided_slice %33 {offsets = [1, 1, 0], sizes = [16, 16, 24], strides = [1, 1, 1]} : vector<18x24x24xf32> to vector<16x16x24xf32>
    %63 = vector.extract_strided_slice %34 {offsets = [1, 1, 0], sizes = [1, 1, 24], strides = [1, 1, 1]} : vector<3x3x24xf32> to vector<1x1x24xf32>
    %64 = vector.shape_cast %63 : vector<1x1x24xf32> to vector<24xf32>
    %65 = vector.shape_cast %64 : vector<24xf32> to vector<1x1x24xf32>
    %66 = vector.broadcast %65 : vector<1x1x24xf32> to vector<16x16x24xf32>
    %67 = arith.mulf %62, %66 : vector<16x16x24xf32>
    %68 = arith.addf %61, %67 : vector<16x16x24xf32>
    %69 = vector.extract_strided_slice %33 {offsets = [1, 2, 0], sizes = [16, 16, 24], strides = [1, 1, 1]} : vector<18x24x24xf32> to vector<16x16x24xf32>
    %70 = vector.extract_strided_slice %34 {offsets = [1, 2, 0], sizes = [1, 1, 24], strides = [1, 1, 1]} : vector<3x3x24xf32> to vector<1x1x24xf32>
    %71 = vector.shape_cast %70 : vector<1x1x24xf32> to vector<24xf32>
    %72 = vector.shape_cast %71 : vector<24xf32> to vector<1x1x24xf32>
    %73 = vector.broadcast %72 : vector<1x1x24xf32> to vector<16x16x24xf32>
    %74 = arith.mulf %69, %73 : vector<16x16x24xf32>
    %75 = arith.addf %68, %74 : vector<16x16x24xf32>
    %76 = vector.extract_strided_slice %33 {offsets = [2, 0, 0], sizes = [16, 16, 24], strides = [1, 1, 1]} : vector<18x24x24xf32> to vector<16x16x24xf32>
    %77 = vector.extract_strided_slice %34 {offsets = [2, 0, 0], sizes = [1, 1, 24], strides = [1, 1, 1]} : vector<3x3x24xf32> to vector<1x1x24xf32>
    %78 = vector.shape_cast %77 : vector<1x1x24xf32> to vector<24xf32>
    %79 = vector.shape_cast %78 : vector<24xf32> to vector<1x1x24xf32>
    %80 = vector.broadcast %79 : vector<1x1x24xf32> to vector<16x16x24xf32>
    %81 = arith.mulf %76, %80 : vector<16x16x24xf32>
    %82 = arith.addf %75, %81 : vector<16x16x24xf32>
    %83 = vector.extract_strided_slice %33 {offsets = [2, 1, 0], sizes = [16, 16, 24], strides = [1, 1, 1]} : vector<18x24x24xf32> to vector<16x16x24xf32>
    %84 = vector.extract_strided_slice %34 {offsets = [2, 1, 0], sizes = [1, 1, 24], strides = [1, 1, 1]} : vector<3x3x24xf32> to vector<1x1x24xf32>
    %85 = vector.shape_cast %84 : vector<1x1x24xf32> to vector<24xf32>
    %86 = vector.shape_cast %85 : vector<24xf32> to vector<1x1x24xf32>
    %87 = vector.broadcast %86 : vector<1x1x24xf32> to vector<16x16x24xf32>
    %88 = arith.mulf %83, %87 : vector<16x16x24xf32>
    %89 = arith.addf %82, %88 : vector<16x16x24xf32>
    %90 = vector.extract_strided_slice %33 {offsets = [2, 2, 0], sizes = [16, 16, 24], strides = [1, 1, 1]} : vector<18x24x24xf32> to vector<16x16x24xf32>
    %91 = vector.extract_strided_slice %34 {offsets = [2, 2, 0], sizes = [1, 1, 24], strides = [1, 1, 1]} : vector<3x3x24xf32> to vector<1x1x24xf32>
    %92 = vector.shape_cast %91 : vector<1x1x24xf32> to vector<24xf32>
    %93 = vector.shape_cast %92 : vector<24xf32> to vector<1x1x24xf32>
    %94 = vector.broadcast %93 : vector<1x1x24xf32> to vector<16x16x24xf32>
    %95 = arith.mulf %90, %94 : vector<16x16x24xf32>
    %96 = arith.addf %89, %95 : vector<16x16x24xf32>
    %c0_14 = arith.constant 0 : index
    %c0_15 = arith.constant 0 : index
    %c0_16 = arith.constant 0 : index
    %97 = vector.load %arg6[%c0_14, %c0_15, %c0_16] : memref<1x1x24xf32, #tpu.memory_space<vmem>>, vector<1x1x24xf32>
    %98 = vector.broadcast %97 : vector<1x1x24xf32> to vector<16x16x24xf32>
    %99 = arith.addf %96, %98 : vector<16x16x24xf32>
    %cst_17 = arith.constant 0.000000e+00 : f32
    %cst_18 = arith.constant 6.000000e+00 : f32
    %100 = vector.broadcast %cst_17 : f32 to vector<16x16x24xf32>
    %101 = arith.maximumf %100, %99 : vector<16x16x24xf32>
    %102 = vector.broadcast %cst_18 : f32 to vector<16x16x24xf32>
    %103 = arith.minimumf %102, %101 : vector<16x16x24xf32>
    %104 = vector.shape_cast %103 : vector<16x16x24xf32> to vector<256x24xf32>
    %c0_19 = arith.constant 0 : index
    %c0_20 = arith.constant 0 : index
    %105 = vector.load %arg7[%c0_19, %c0_20] : memref<24x4xf32, #tpu.memory_space<vmem>>, vector<24x4xf32>
    %cst_21 = arith.constant dense<0.000000e+00> : vector<256x4xf32>
    %106 = tpu.matmul %104, %105, %cst_21 {dimension_numbers = #tpu.dot_dimension_numbers<[1], [0], [0], [1], [0, 0, 1, 1], [], []>} : vector<256x24xf32>, vector<24x4xf32>, vector<256x4xf32> -> vector<256x4xf32>
    %c0_22 = arith.constant 0 : index
    %c0_23 = arith.constant 0 : index
    %107 = vector.load %arg8[%c0_22, %c0_23] : memref<1x4xf32, #tpu.memory_space<vmem>>, vector<1x4xf32>
    %108 = vector.broadcast %107 : vector<1x4xf32> to vector<256x4xf32>
    %109 = arith.addf %106, %108 : vector<256x4xf32>
    %110 = vector.extract_strided_slice %3 {offsets = [1, 1, 0], sizes = [16, 16, 4], strides = [1, 1, 1]} : vector<18x24x4xf32> to vector<16x16x4xf32>
    %111 = vector.shape_cast %110 : vector<16x16x4xf32> to vector<256x4xf32>
    %112 = arith.addf %109, %111 : vector<256x4xf32>
    %113 = tpu.transpose %112, [1, 0] : vector<256x4xf32> -> vector<4x256xf32>
    %c0_24 = arith.constant 0 : index
    %c0_25 = arith.constant 0 : index
    %c0_26 = arith.constant 0 : index
    %114 = vector.load %arg9[%c0_24, %c0_25, %c0_26] : memref<1x4x256xf32, #tpu.memory_space<vmem>>, vector<1x4x256xf32>
    %115 = vector.shape_cast %114 : vector<1x4x256xf32> to vector<4x256xf32>
    %116 = vector.shape_cast %113 : vector<4x256xf32> to vector<1x4x256xf32>
    tpu.vector_store %arg9[%c0_24, %c0_25, %c0_26], %116 {strides = array<i32>} : memref<1x4x256xf32, #tpu.memory_space<vmem>>, vector<1x4x256xf32>,
    return
  }
  func.func @transform_0(%arg0: i32, %arg1: i32) -> (i32, i32, i32, i32) {
    %c0_i32 = arith.constant 0 : i32
    %c0_i32_0 = arith.constant 0 : i32
    %c0_i32_1 = arith.constant 0 : i32
    %c0_i32_2 = arith.constant 0 : i32
    return %arg0, %c0_i32, %c0_i32_0, %c0_i32_1 : i32, i32, i32, i32
  }
  func.func @transform_1(%arg0: i32, %arg1: i32) -> (i32, i32) {
    %c0_i32 = arith.constant 0 : i32
    %c0_i32_0 = arith.constant 0 : i32
    %c0_i32_1 = arith.constant 0 : i32
    return %c0_i32, %c0_i32_0 : i32, i32
  }
  func.func @transform_2(%arg0: i32, %arg1: i32) -> (i32, i32) {
    %c0_i32 = arith.constant 0 : i32
    %c0_i32_0 = arith.constant 0 : i32
    %c0_i32_1 = arith.constant 0 : i32
    return %c0_i32, %c0_i32_0 : i32, i32
  }
  func.func @transform_3(%arg0: i32, %arg1: i32) -> (i32, i32, i32) {
    %c0_i32 = arith.constant 0 : i32
    %c0_i32_0 = arith.constant 0 : i32
    %c0_i32_1 = arith.constant 0 : i32
    %c0_i32_2 = arith.constant 0 : i32
    return %c0_i32, %c0_i32_0, %c0_i32_1 : i32, i32, i32
  }
  func.func @transform_4(%arg0: i32, %arg1: i32) -> (i32, i32, i32) {
    %c0_i32 = arith.constant 0 : i32
    %c0_i32_0 = arith.constant 0 : i32
    %c0_i32_1 = arith.constant 0 : i32
    %c0_i32_2 = arith.constant 0 : i32
    return %c0_i32, %c0_i32_0, %c0_i32_1 : i32, i32, i32
  }
  func.func @transform_5(%arg0: i32, %arg1: i32) -> (i32, i32) {
    %c0_i32 = arith.constant 0 : i32
    %c0_i32_0 = arith.constant 0 : i32
    %c0_i32_1 = arith.constant 0 : i32
    return %c0_i32, %c0_i32_0 : i32, i32
  }
  func.func @transform_6(%arg0: i32, %arg1: i32) -> (i32, i32) {
    %c0_i32 = arith.constant 0 : i32
    %c0_i32_0 = arith.constant 0 : i32
    %c0_i32_1 = arith.constant 0 : i32
    return %c0_i32, %c0_i32_0 : i32, i32
  }
  func.func @transform_7(%arg0: i32, %arg1: i32) -> (i32, i32, i32) {
    %c0_i32 = arith.constant 0 : i32
    %c0_i32_0 = arith.constant 0 : i32
    return %arg0, %c0_i32, %arg1 : i32, i32, i32
  }
}

</mosaic_0001>

<bundles_post_ra>
// kernel: tpu_custom_call.1
= control target key start
LH: loop header
LB: loop body
LE: loop exit
PB: predicated region body
PF: predicated region fallthrough
CT: control target
= control target key end

     0   :  { %12 = vsyncpa [#allocation3], 0  ;;  %s6201_s0 = inlined_call_operand.vmem [shape: f32[2,18,24,4], index: 0, kind: input, shape index: {}]   ;;  %s6202_s1 = inlined_call_operand.vmem [shape: f32[4,24], index: 1, kind: input, shape index: {}]   ;;  %s6203_s2 = inlined_call_operand.vmem [shape: f32[1,24], index: 2, kind: input, shape index: {}]   ;;  %s6204_s3 = inlined_call_operand.vmem [shape: f32[3,3,24], index: 3, kind: input, shape index: {}]   ;;  %s6205_s4 = inlined_call_operand.vmem [shape: f32[1,1,24], index: 4, kind: input, shape index: {}]   ;;  %s6206_s5 = inlined_call_operand.vmem [shape: f32[24,4], index: 5, kind: input, shape index: {}]   ;;  %s6207_s6 = inlined_call_operand.vmem [shape: f32[1,4], index: 6, kind: input, shape index: {}]   ;;  %s6208_s7 = inlined_call_operand.hbm [shape: f32[2,4,256], index: 7, kind: output, shape index: {}]  }
   0x1   :  { %14 = vsyncpa [#allocation3 + $0x1], 0  ;;  %s3712_s24 = smov 0   ;;  %s3714_s25 = smov 0  }
   0x2   :  { %s3716_s26 = smov 0   ;;  %s3718_s27 = smov 0  }
   0x3   :  { %s3720_s28 = smov 0   ;;  %s3722_s29 = smov 0  }
   0x4 LB: > { %s3396_s30 = sadd.s32 4294967295, %s3670_s29   ;;  %s3397_s8 = sadd.s32 4294967294, %s3670_s29   ;;  %s3670_s29 = sphi %s3722_s29, %s20_s29   ;;  %s3666_s28 = sphi %s3720_s28, %s6677_s28   ;;  %s3662_s27 = sphi %s3718_s27, %s6676_s27   ;;  %s3658_s26 = sphi %s3716_s26, %s6675_s26   ;;  %s3654_s25 = sphi %s3714_s25, %s6674_s25   ;;  %s3650_s24 = sphi %s3712_s24, %s6673_s24  }
   0x5   : > { %s32_s9 = sadd.s32 1, %s3666_s28  ;;  %s193_s10 = sadd.s32 1, %s3658_s26 }
   0x6   : > { %p34_p0 = scmp.ge.s32.totalorder %s32_s9, 2  ;;  %p203_p1 = scmp.ne.s32.totalorder %s3658_s26, %s3654_s25 }
   0x7   : > { %p204_p2 = scmp.eq.s32.totalorder %s3396_s30, 1  ;;  %p209_p3 = scmp.ne.s32.totalorder %s3654_s25, %s3650_s24 }
   0x8   : > { %s6679_s9 = smov (%p34_p0, %s32_s9), 0  ;;  %p210_p5 = scmp.eq.s32.totalorder %s3397_s8, 1 }
   0x9   : > { %p3752_p4 = por %p204_p2, %p203_p1  ;;  %s188_s12 = ssub.s32 %s3666_s28, %s6679_s9 }
   0xa   : > { %p3400_p6 = scmp.ge.s32.totalorder %s3670_s29, 1  ;;  %p191_p7 = scmp.eq.s32.totalorder %s188_s12, 0 }
   0xb   : > { %p3759_p8 = por %p210_p5, %p209_p3  ;;  %p254_p9 = scmp.lt.s32.totalorder %s3670_s29, 3 }
   0xc   : > { %s3765_s14 = scalar_select %p191_p7, %s3658_s26, %s193_s10  }
   0xd   : > { %p255_p10 = pnand %p3400_p6, %p254_p9 }
   0xf   : > { %258 = sbr.rel (%p255_p10) target bundleno = 798 (0x31e), region = 48 }
  0x14   : > { %v349_v0 = vld [vmem:[%s6202_s1] sm:$0xf]  ;;  %vm517_vm0 = vcmask 1043456   ;;  %p286_p11 = scmp.lt.s32.totalorder %s3662_s27, 1  ;;  %vm354_vm1 = vcmask 31744   ;;  %v826_v46 = vlaneseq  ;;  %vm1293_vm3 = vcmask 1046528  }
  0x15   : > { %3403 = vmatpush.msk.msra.mxu0 %vm517_vm0, %v349_v0  ;;  %3496 = vmatpush.msk.msra.mxu2 %vm517_vm0, %v349_v0  ;;  %v3907_v39 = vld [vmem:[%s6203_s2] ss:$0 sm:$0xff]  ;;  %vm1535_vm5 = vcmask 1045504   ;;  %vm2881_vm6 = vcmask 195584   ;;  %s3495_s12 = sshll.u32 %s3662_s27, 3 }
  0x16   : > { %s287_s17 = scalar_select %p286_p11, %s3662_s27, 1  ;;  %3497 = vmatpush.msk.msra.mxu3 %vm517_vm0, %v349_v0  ;;  %v1160_v40 = vld [vmem:[%s6204_s3] sm:$0x7]  ;;  %v3927_v51 = vshrl.u32 %v826_v46, 7 }
  0x17   : > { %v3916_v44 = vperm.slane %v1160_v40, 1  ;;  %v3922_v47 = vperm.slane %v1160_v40, 0  ;;  %v3925_v49 = vperm.slane %v1160_v40, 2 }
  0x18   : > { %s3501_s18 = smul.u32 432, %s287_s17  ;;  %vm884_vm2 = vcmp.ge.s32.totalorder %v3927_v51, 1  ;;  %s3319_s17 = scalar_lea.hbm %s6208_s7, %s3495_s12 }
  0x19   : > { %6348 = vst [vmem:[#allocation24_spill] sm:$0xff] %v3916_v44  ;;  %v1197_v48 = vmul.f32 0.0, %v3916_v44  ;;  %v1164_v58 = vmul.f32 0.0, %v3922_v47  ;;  %v1439_v60 = vmul.f32 0.0, %v3925_v49  ;;  %s3323_s20 = sshll.u32 %s3319_s17, 4  ;;  %s3324_s20 = int_to_ptr.hbm [resolvable:$true] %s3323_s20 }
  0x1a   : > { %s3778_s21 = scalar_lea.vmem %s6201_s0, %s3501_s18  ;;  %s3606_s23 = sshra.s32 %s3324_s20, 4  ;;  %s3607_s23 = int_to_ptr.hbm [resolvable:$true] %s3606_s23 }
  0x1b   : > { %v295_v1 = vld [vmem:[%s3778_s21] sm:$0xff]  ;;  %v296_v2 = vld [vmem:[%s3778_s21 + $0x8] sm:$0xff]  ;;  %v297_v3 = vld [vmem:[%s3778_s21 + $0x10] sm:$0xff]  ;;  %v1294_v59 = vrot.slane %v1197_v48, 1  ;;  %v3971_v48 = vadd.s32 16, %v3927_v51  ;;  %s3608_s27 = scalar_lea.hbm %s3607_s23, 8  ;;  %p3613_p1 = scmp.lt.s32.totalorder %s3607_s23, %s6208_s7 }
  0x1c   : > { %3404 = vmatmul.msk.f32.vlgmr.msra.gmra.mxu0 %vm354_vm1, %v295_v1  ;;  %v3787_v4 = vld [vmem:[%s3778_s21 + $0xb0] sm:$0xff]  ;;  %v3792_v5 = vld [vmem:[%s3778_s21 + $0x18] sm:$0xff]  ;;  %v3802_v7 = vld [vmem:[%s3778_s21 + $0x20] sm:$0xff]  ;;  %p3609_p12 = scmp.ne.s32.totalorder %s3607_s23, %s3608_s27 }
  0x1d   : > { %6329 = vst [vmem:[#allocation5_spill] sm:$0xff] %v3787_v4  ;;  %3426 = vmatmul.msk.f32.vlgmr.msra.gmra.mxu2 %vm354_vm1, %v3787_v4  ;;  %v3797_v6 = vld [vmem:[%s3778_s21 + $0xb8] sm:$0xff]  ;;  %v319_v8 = vld [vmem:[%s3778_s21 + $0xc0] sm:$0xff]  ;;  %v3809_v9 = vld [vmem:[%s3778_s21 + $0x28] sm:$0xff]  ;;  %vm943_vm4 = vcmp.lt.s32.totalorder %v3971_v48, 17 }
  0x1e   : > { %6330 = vst [vmem:[#allocation6_spill] sm:$0xff] %v3792_v5  ;;  %v320_v10 = vld [vmem:[%s3778_s21 + $0xc8] sm:$0xff]  ;;  %v3816_v11 = vld [vmem:[%s3778_s21 + $0x30] sm:$0xff]  ;;  %v3823_v13 = vld [vmem:[%s3778_s21 + $0x38] sm:$0xff]  ;;  %p3610_p13 = pnand %p3609_p12, %p3752_p4 }
  0x1f   : > { %6331 = vst [vmem:[#allocation7_spill] sm:$0xff] %v3797_v6  ;;  %v321_v12 = vld [vmem:[%s3778_s21 + $0xd0] sm:$0xff]  ;;  %v322_v14 = vld [vmem:[%s3778_s21 + $0xd8] sm:$0xff]  ;;  %v3830_v15 = vld [vmem:[%s3778_s21 + $0x40] sm:$0xff] }
  0x20   : > { %6332 = vst [vmem:[#allocation8_spill] sm:$0xff] %v3802_v7  ;;  %v323_v16 = vld [vmem:[%s3778_s21 + $0xe0] sm:$0xff]  ;;  %v3837_v17 = vld [vmem:[%s3778_s21 + $0x48] sm:$0xff]  ;;  %v3844_v19 = vld [vmem:[%s3778_s21 + $0x50] sm:$0xff]  ;;  %p3611_p0 = pneg %p3610_p13 }
  0x21   : > { %6333 = vst [vmem:[#allocation9_spill] sm:$0xff] %v3809_v9  ;;  %v324_v18 = vld [vmem:[%s3778_s21 + $0xe8] sm:$0xff]  ;;  %v325_v20 = vld [vmem:[%s3778_s21 + $0xf0] sm:$0xff]  ;;  %v3851_v21 = vld [vmem:[%s3778_s21 + $0x58] sm:$0xff] }
  0x22   : > { %6334 = vst [vmem:[#allocation10_spill] sm:$0xff] %v3816_v11  ;;  %v326_v22 = vld [vmem:[%s3778_s21 + $0xf8] sm:$0xff]  ;;  %v3857_v23 = vld [vmem:[%s3778_s21 + $0x60] sm:$0xff]  ;;  %v3864_v25 = vld [vmem:[%s3778_s21 + $0x68] sm:$0xff] }
  0x23   : > { %6335 = vst [vmem:[#allocation11_spill] sm:$0xff] %v3823_v13  ;;  %v327_v24 = vld [vmem:[%s3778_s21 + $0x100] sm:$0xff]  ;;  %v328_v26 = vld [vmem:[%s3778_s21 + $0x108] sm:$0xff]  ;;  %v3871_v27 = vld [vmem:[%s3778_s21 + $0x70] sm:$0xff] }
  0x24   : > { %3405 = vmatmul.msk.f32.gmra.mxu0 %vm354_vm1, %v296_v2  ;;  %6336 = vst [vmem:[#allocation12_spill] sm:$0xff] %v3830_v15  ;;  %v3877_v28 = vld [vmem:[%s3778_s21 + $0x78] sm:$0xff]  ;;  %v329_v29 = vld [vmem:[%s3778_s21 + $0x110] sm:$0xff]  ;;  %v3884_v31 = vld [vmem:[%s3778_s21 + $0x80] sm:$0xff] }
  0x25   : > { %3427 = vmatmul.msk.f32.gmra.mxu2 %vm354_vm1, %v3797_v6  ;;  %6337 = vst [vmem:[#allocation13_spill] sm:$0xff] %v3837_v17  ;;  %v330_v32 = vld [vmem:[%s3778_s21 + $0x118] sm:$0xff]  ;;  %v3891_v34 = vld [vmem:[%s3778_s21 + $0x88] sm:$0xff]  ;;  %v331_v35 = vld [vmem:[%s3778_s21 + $0x120] sm:$0xff] }
  0x26   : > { %6338 = vst [vmem:[#allocation14_spill] sm:$0xff] %v3844_v19  ;;  %v3898_v37 = vld [vmem:[%s3778_s21 + $0x90] sm:$0xff]  ;;  %v332_v38 = vld [vmem:[%s3778_s21 + $0x128] sm:$0xff]  ;;  %v3913_v42 = vld [vmem:[%s3778_s21 + $0x98] sm:$0xff] }
  0x27   : > { %6339 = vst [vmem:[#allocation15_spill] sm:$0xff] %v3851_v21  ;;  %v333_v43 = vld [vmem:[%s3778_s21 + $0x130] sm:$0xff]  ;;  %v3932_v56 = vld [vmem:[%s3778_s21 + $0xa0] sm:$0xff]  ;;  %v334_v57 = vld [vmem:[%s3778_s21 + $0x138] sm:$0xff] }
  0x28   : > { %6340 = vst [vmem:[#allocation16_spill] sm:$0xff] %v3857_v23 }
  0x29   : > { %6341 = vst [vmem:[#allocation17_spill] sm:$0xff] %v3864_v25 }
  0x2a   : > { %6342 = vst [vmem:[#allocation18_spill] sm:$0xff] %v3871_v27 }
  0x2b   : > { %6343 = vst [vmem:[#allocation19_spill] sm:$0xff] %v3877_v28 }
  0x2c   : > { %3406 = vmatmul.msk.f32.gmra.mxu0 %vm354_vm1, %v297_v3  ;;  %6344 = vst [vmem:[#allocation20_spill] sm:$0xff] %v3884_v31  ;;  %v2875_v3 = vld [vmem:[%s6206_s5 + $0x8] sm:$0xff] }
  0x2d   : > { %3428 = vmatmul.msk.f32.gmra.mxu2 %vm354_vm1, %v319_v8  ;;  %6345 = vst [vmem:[#allocation21_spill] sm:$0xff] %v3891_v34 }
  0x2e   : > { %6346 = vst [vmem:[#allocation22_spill] sm:$0xff] %v3898_v37 }
  0x2f   : > { %6347 = vst [vmem:[#allocation23_spill] sm:$0xff] %v3913_v42 }
  0x30   : > { %6349 = vst [vmem:[#allocation25_spill] sm:$0xff] %v3932_v56 }
  0x31   : > { %6350 = vst [vmem:[#allocation26_spill] sm:$0xff] %v3971_v48 }
  0x34   : > { %3407 = vmatmul.msk.f32.gmra.mxu0 %vm354_vm1, %v3792_v5 }
  0x35   : > { %3429 = vmatmul.msk.f32.gmra.mxu2 %vm354_vm1, %v320_v10  ;;  %v1161_v10 = vld [vmem:[%s6204_s3 + $0x4] sm:$0x7] }
  0x36   : > { %v3966_v40 = vperm.slane %v1161_v10, 2 }
  0x3c   : > { %3408 = vmatmul.msk.f32.gmra.mxu0 %vm354_vm1, %v3802_v7 }
  0x3d   : > { %3430 = vmatmul.msk.f32.gmra.mxu2 %vm354_vm1, %v321_v12 }
  0x44   : > { %3409 = vmatmul.msk.f32.gmra.mxu0 %vm354_vm1, %v3809_v9 }
  0x45   : > { %3431 = vmatmul.msk.f32.gmra.mxu2 %vm354_vm1, %v322_v14 }
  0x4c   : > { %3410 = vmatmul.msk.f32.gmra.mxu0 %vm354_vm1, %v3816_v11 }
  0x4d   : > { %3432 = vmatmul.msk.f32.gmra.mxu2 %vm354_vm1, %v323_v16 }
  0x54   : > { %3411 = vmatmul.msk.f32.gmra.mxu0 %vm354_vm1, %v3823_v13 }
  0x55   : > { %3433 = vmatmul.msk.f32.gmra.mxu2 %vm354_vm1, %v324_v18 }
  0x5c   : > { %3412 = vmatmul.msk.f32.gmra.mxu0 %vm354_vm1, %v3830_v15 }
  0x5d   : > { %3434 = vmatmul.msk.f32.gmra.mxu2 %vm354_vm1, %v325_v20 }
  0x64   : > { %3413 = vmatmul.msk.f32.gmra.mxu0 %vm354_vm1, %v3837_v17 }
  0x65   : > { %3435 = vmatmul.msk.f32.gmra.mxu2 %vm354_vm1, %v326_v22  ;;  %v1406_v22 = vadd.f32 %v1294_v59, %v1164_v58 }
  0x6c   : > { %3414 = vmatmul.msk.f32.gmra.mxu0 %vm354_vm1, %v3844_v19 }
  0x6d   : > { %3436 = vmatmul.msk.f32.gmra.mxu2 %vm354_vm1, %v327_v24  ;;  %v1536_v24 = vrot.slane %v1439_v60, 2  ;;  %v1162_v60 = vld [vmem:[%s6204_s3 + $0x8] sm:$0x7] }
  0x6e   : > { %v4040_v14 = vperm.slane %v1162_v60, 0 }
  0x74   : > { %3415 = vmatmul.msk.f32.gmra.mxu0 %vm354_vm1, %v3851_v21 }
  0x75   : > { %3437 = vmatmul.msk.f32.gmra.mxu2 %vm354_vm1, %v328_v26 }
  0x7c   : > { %3416 = vmatmul.msk.f32.gmra.mxu0 %vm354_vm1, %v3857_v23 }
  0x7d   : > { %3438 = vmatmul.msk.f32.gmra.mxu2 %vm354_vm1, %v329_v29 }
  0x84   : > { %3417 = vmatmul.msk.f32.gmra.mxu0 %vm354_vm1, %v3864_v25 }
  0x85   : > { %3439 = vmatmul.msk.f32.gmra.mxu2 %vm354_vm1, %v330_v32  ;;  %v3959_v32 = vperm.slane %v1161_v10, 0 }
  0x8c   : > { %3418 = vmatmul.msk.f32.gmra.mxu0 %vm354_vm1, %v3871_v27 }
  0x8d   : > { %3440 = vmatmul.msk.f32.gmra.mxu2 %vm354_vm1, %v331_v35 }
  0x94   : > { %3419 = vmatmul.msk.f32.gmra.mxu0 %vm354_vm1, %v3877_v28 }
  0x95   : > { %3441 = vmatmul.msk.f32.gmra.mxu2 %vm354_vm1, %v332_v38 }
  0x99   : > { %v538_v30 = vpop.f32.mrf.mxu0 }
  0x9c   : > { %3420 = vmatmul.msk.f32.gmra.mxu0 %vm354_vm1, %v3884_v31 }
  0x9d   : > { %3442 = vmatmul.msk.f32.gmra.mxu2 %vm354_vm1, %v333_v43  ;;  %v4006_v43 = vperm.slane %v1162_v60, 1 }
  0xa0   : > { %v604_v52 = vpop.f32.mrf.mxu2 }
  0xa1   : > { %v541_v33 = vpop.f32.mrf.mxu0  ;;  %v605_v26 = vadd.f32 %v3907_v39, %v604_v52  ;;  %v335_v52 = vld [vmem:[%s3778_s21 + $0x140] sm:$0xff] }
  0xa2   : > { %v3961_v33 = vperm.slane %v1161_v10, 1 }
  0xa3   : > { %v722_v59 = vmax.f32 %v605_v26, 0.0 }
  0xa4   : > { %3421 = vmatmul.msk.f32.gmra.mxu0 %vm354_vm1, %v3891_v34 }
  0xa5   : > { %3443 = vmatmul.msk.f32.gmra.mxu2 %vm354_vm1, %v334_v57  ;;  %v1648_v57 = vadd.f32 %v1536_v24, %v1406_v22  ;;  %v4009_v24 = vmin.f32 %v722_v59, 6.0 }
  0xa9   : > { %v544_v36 = vpop.f32.mrf.mxu0 }
  0xaa   : > { %v2874_v36 = vld [vmem:[%s6206_s5] sm:$0xff] }
  0xac   : > { %3422 = vmatmul.msk.f32.gmra.mxu0 %vm354_vm1, %v3898_v37 }
  0xad   : > { %3444 = vmatmul.msk.f32.gmra.mxu2 %vm354_vm1, %v335_v52 }
  0xb1   : > { %v547_v41 = vpop.f32.mrf.mxu0 }
  0xb2   : > { %v548_v45 = vadd.f32 %v3907_v39, %v547_v41  ;;  %v4011_v41 = vperm.slane %v1162_v60, 2  ;;  %v336_v60 = vld [vmem:[%s3778_s21 + $0x148] sm:$0xff] }
  0xb4   : > { %3423 = vmatmul.msk.f32.gmra.mxu0 %vm354_vm1, %v3913_v42  ;;  %v703_v50 = vmax.f32 %v548_v45, 0.0 }
  0xb5   : > { %3445 = vmatmul.msk.f32.gmra.mxu2 %vm354_vm1, %v336_v60 }
  0xb6   : > { %v757_v1 = vmin.f32 %v703_v50, 6.0  ;;  %v3974_v50 = vld [vmem:[%s3778_s21 + $0xa8] sm:$0xff] }
  0xb7   : > { %6351 = vst [vmem:[#allocation27_spill] sm:$0xff] %v3974_v50 }
  0xb8   : > { %v1109_v30 = vsel %vm884_vm2, %v757_v1, 0.0  ;;  %v2876_v1 = vld [vmem:[%s6206_s5 + $0x10] sm:$0xff] }
  0xb9   : > { %v550_v55 = vpop.f32.mrf.mxu0  ;;  %v3987_v10 = vmul.f32 %v3925_v49, %v1109_v30  ;;  %v3991_v22 = vmul.f32 %v3961_v33, %v1109_v30  ;;  %2991 = vmatpush.msra.mxu1 %v2876_v1  ;;  %3498 = vmatpush.msrb.mxu3 %v2876_v1  ;;  %v3995_v26 = vmul.f32 %v3966_v40, %v1109_v30 }
  0xba   : > { %v551_v61 = vadd.f32 %v3907_v39, %v550_v55  ;;  %v1200_v55 = vmul.f32 %v3916_v44, %v1109_v30 }
  0xbb   : > { %2992 = vmatpush.msra.mxu1 %v2875_v3  ;;  %3499 = vmatpush.msrb.mxu3 %v2875_v3  ;;  %v1541_v35 = vrot.slane %v3987_v10, 2  ;;  %v1842_v1 = vrot.slane %v3991_v22, 1  ;;  %v2083_v3 = vrot.slane %v3995_v26, 2 }
  0xbc   : > { %3424 = vmatmul.msk.f32.gmra.mxu0 %vm354_vm1, %v3932_v56  ;;  %v704_v18 = vmax.f32 %v551_v61, 0.0  ;;  %v607_v61 = vpop.f32.mrf.mxu2  ;;  %v1299_v38 = vrot.slane %v1200_v55, 1 }
  0xbd   : > { %2993 = vmatpush.msra.mxu1 %v2874_v36  ;;  %3500 = vmatpush.msrb.mxu3 %v2874_v36 }
  0xbe   : > { %v758_v45 = vmin.f32 %v704_v18, 6.0  ;;  %v1681_v18 = vmul.f32 %v3959_v32, %v1109_v30 }
  0xc0   : > { %v1201_v0 = vmul.f32 %v3916_v44, %v758_v45  ;;  %v4017_v20 = vadd.f32 %v1681_v18, %v1648_v57  ;;  %v1443_v59 = vmul.f32 %v3925_v49, %v758_v45  ;;  %v1682_v10 = vmul.f32 %v3959_v32, %v758_v45 }
  0xc1   : > { %v553_v46 = vpop.f32.mrf.mxu0  ;;  %v1747_v18 = vmul.f32 %v3961_v33, %v758_v45  ;;  %v1988_v36 = vmul.f32 %v3966_v40, %v758_v45 }
  0xc2   : > { %v554_v58 = vadd.f32 %v3907_v39, %v553_v46  ;;  %v1300_v29 = vrot.slane %v1201_v0, 1  ;;  %v4038_v0 = vmul.f32 %v3925_v49, %v4009_v24  ;;  %v1542_v63 = vrot.slane %v1443_v59, 2 }
  0xc3   : > { %v1843_v6 = vrot.slane %v1747_v18, 1  ;;  %v2084_v4 = vrot.slane %v1988_v36, 2 }
  0xc4   : > { %v705_v52 = vmax.f32 %v554_v58, 0.0  ;;  %3425 = vmatmul.msk.f32.gmra.mxu0 %vm354_vm1, %v3974_v50  ;;  %v1166_v58 = vmul.f32 %v3922_v47, %v1109_v30  ;;  %6353 = vst [vmem:[#allocation29_spill] sm:$0xff] %v4038_v0  ;;  %v610_v53 = vpop.f32.mrf.mxu2  ;;  %v1543_v60 = vsel %vm1535_vm5, %v1541_v35, %v1542_v63 }
  0xc5   : > { %v1844_v42 = vsel %vm1293_vm3, %v1842_v1, %v1843_v6 }
  0xc6   : > { %v759_v46 = vmin.f32 %v705_v52, 6.0  ;;  %v608_v52 = vadd.f32 %v3907_v39, %v607_v61  ;;  %v4034_v61 = vmul.f32 %v3916_v44, %v4009_v24 }
  0xc8   : > { %v1111_v30 = vsel %vm943_vm4, %v759_v46, 0.0  ;;  %v723_v12 = vmax.f32 %v608_v52, 0.0  ;;  %v1167_v46 = vmul.f32 %v3922_v47, %v758_v45  ;;  %6352 = vst [vmem:[#allocation28_spill] sm:$0xff] %v4034_v61  ;;  %v1301_v52 = vsel %vm1293_vm3, %v1299_v38, %v1300_v29 }
  0xc9   : > { %v1202_v55 = vmul.f32 %v3916_v44, %v1111_v30  ;;  %v556_v22 = vpop.f32.mrf.mxu0  ;;  %v1748_v16 = vmul.f32 %v3961_v33, %v1111_v30  ;;  %v1444_v45 = vmul.f32 %v3925_v49, %v1111_v30  ;;  %v1989_v54 = vmul.f32 %v3966_v40, %v1111_v30 }
  0xca   : > { %v557_v26 = vadd.f32 %v3907_v39, %v556_v22  ;;  %v777_v62 = vmin.f32 %v723_v12, 6.0  ;;  %v1714_v22 = vadd.f32 %v1682_v10, %v1648_v57  ;;  %v1408_v10 = vadd.f32 %v1301_v52, %v1166_v58 }
  0xcb   : > { %v1302_v8 = vrot.slane %v1202_v55, 1  ;;  %v1845_v50 = vrot.slane %v1748_v16, 1  ;;  %v1179_v16 = vmul.f32 %v3922_v47, %v4009_v24  ;;  %v1544_v18 = vrot.slane %v1444_v45, 2 }
  0xcc   : > { %v706_v2 = vmax.f32 %v557_v26, 0.0  ;;  %v1129_v56 = vsel %vm943_vm4, %v777_v62, 0.0  ;;  %v2086_v62 = vrot.slane %v1989_v54, 2  ;;  %v2085_v38 = vsel %vm1535_vm5, %v2083_v3, %v2084_v4 }
  0xcd   : > { %v1220_v55 = vmul.f32 %v3916_v44, %v1129_v56  ;;  %v1462_v12 = vmul.f32 %v3925_v49, %v1129_v56  ;;  %v1303_v57 = vsel %vm1293_vm3, %v1300_v29, %v1302_v8  ;;  %v6354_v8 = vrot.slane %v4034_v61, 1 }
  0xce   : > { %v760_v30 = vmin.f32 %v706_v2, 6.0  ;;  %v1409_v34 = vadd.f32 %v1303_v57, %v1167_v46  ;;  %v1846_v2 = vsel %vm1293_vm3, %v1843_v6, %v1845_v50  ;;  %v6355_v54 = vrot.slane %v4038_v0, 2 }
  0xcf   : > { %v1332_v26 = vrot.slane %v1220_v55, 1  ;;  %v1574_v37 = vrot.slane %v1462_v12, 2  ;;  %v611_v3 = vadd.f32 %v3907_v39, %v610_v53  ;;  %v1545_v35 = vsel %vm1535_vm5, %v1542_v63, %v1544_v18 }
  0xd0   : > { %v4069_v52 = vsel %vm884_vm2, %v760_v30, 0.0  ;;  %v2087_v6 = vsel %vm1535_vm5, %v2084_v4, %v2086_v62  ;;  %v1954_v50 = vadd.f32 %v1844_v42, %v4017_v20  ;;  %v4075_v46 = vadd.f32 %v1543_v60, %v1408_v10 }
  0xd1   : > { %v559_v36 = vpop.f32.mrf.mxu0  ;;  %v1333_v29 = vsel %vm1293_vm3, %v6354_v8, %v1332_v26  ;;  %v1575_v58 = vsel %vm1535_vm5, %v6355_v54, %v1574_v37  ;;  %v4082_v37 = vmul.f32 %v3961_v33, %v1129_v56  ;;  %v724_v57 = vmax.f32 %v611_v3, 0.0  ;;  %v339_v3 = vld [vmem:[%s3778_s21 + $0x160] sm:$0xff] }
  0xd2   : > { %v560_v59 = vadd.f32 %v3907_v39, %v559_v36  ;;  %v1421_v45 = vadd.f32 %v1333_v29, %v1179_v16  ;;  %v4084_v30 = vadd.f32 %v1545_v35, %v1409_v34  ;;  %v1955_v53 = vadd.f32 %v1846_v2, %v1714_v22  ;;  %3448 = vmatmul.msk.f32.vlgmr.msra.gmra.mxu3 %vm354_vm1, %v339_v3 }
  0xd3   : > { %6357 = vst [vmem:[#allocation31_spill] sm:$0xff] %v4082_v37  ;;  %v4087_v63 = vmul.f32 %v3966_v40, %v1129_v56  ;;  %v2293_v4 = vmul.f32 %v4006_v43, %v4069_v52  ;;  %v4093_v42 = vmul.f32 %v3916_v44, %v4069_v52  ;;  %v4096_v20 = vmul.f32 %v4006_v43, %v1129_v56 }
  0xd4   : > { %v707_v1 = vmax.f32 %v560_v59, 0.0  ;;  %v4079_v12 = vadd.f32 %v1575_v58, %v1421_v45  ;;  %v613_v59 = vpop.f32.mrf.mxu2  ;;  %v778_v16 = vmin.f32 %v724_v57, 6.0  ;;  %v2228_v10 = vmul.f32 %v4040_v14, %v4069_v52 }
  0xd5   : > { %6358 = vst [vmem:[#allocation32_spill] sm:$0xff] %v4087_v63  ;;  %v4102_v34 = vmul.f32 %v3925_v49, %v4069_v52  ;;  %v2534_v62 = vmul.f32 %v4011_v41, %v4069_v52  ;;  %v4117_v2 = vmul.f32 %v4011_v41, %v1129_v56  ;;  %v2195_v8 = vadd.f32 %v2085_v38, %v1954_v50 }
  0xd6   : > { %v4077_v55 = vmin.f32 %v707_v1, 6.0  ;;  %6356 = vst [vmem:[#allocation30_spill] sm:$0xff] %v4079_v12  ;;  %v2389_v54 = vrot.slane %v2293_v4, 1  ;;  %v4125_v35 = vsel %vm884_vm2, %v778_v16, 0.0  ;;  %v4137_v16 = vld [vmem:[%s6205_s4] ss:$0 sm:$0xff]  ;;  %v2196_v29 = vadd.f32 %v2087_v6, %v1955_v53 }
  0xd7   : > { %6359 = vst [vmem:[#allocation33_spill] sm:$0xff] %v4117_v2  ;;  %v2260_v57 = vadd.f32 %v2228_v10, %v2195_v8  ;;  %v2630_v4 = vrot.slane %v2534_v62, 2  ;;  %v4145_v62 = vmul.f32 %v3916_v44, %v4125_v35  ;;  %v614_v8 = vadd.f32 %v3907_v39, %v613_v59 }
  0xd8   : > { %v4106_v18 = vmul.f32 %v4006_v43, %v4077_v55  ;;  %v4112_v36 = vmul.f32 %v4011_v41, %v4077_v55  ;;  %6360 = vst [vmem:[#allocation34_spill] sm:$0xff] %v4125_v35  ;;  %v4141_v10 = vmul.f32 %v3925_v49, %v4077_v55  ;;  %v2229_v59 = vmul.f32 %v4040_v14, %v4077_v55 }
  0xd9   : > { %v562_v22 = vpop.f32.mrf.mxu0  ;;  %6361 = vst [vmem:[#allocation35_spill] sm:$0xff] %v4145_v62  ;;  %v725_v27 = vmax.f32 %v614_v8, 0.0 }
  0xda   : > { %v563_v26 = vadd.f32 %v3907_v39, %v562_v22  ;;  %v2390_v58 = vrot.slane %v4106_v18, 1  ;;  %v2631_v1 = vrot.slane %v4112_v36, 2  ;;  %v4132_v18 = vmul.f32 %v3916_v44, %v4077_v55 }
  0xdb   : > { %v2261_v15 = vadd.f32 %v2229_v59, %v2196_v29  ;;  %v6367_v19 = vrot.slane %v4141_v10, 2 }
  0xdc   : > { %v708_v45 = vmax.f32 %v563_v26, 0.0  ;;  %v2391_v50 = vsel %vm1293_vm3, %v2389_v54, %v2390_v58  ;;  %v2632_v26 = vsel %vm1535_vm5, %v2630_v4, %v2631_v1  ;;  %v337_v54 = vld [vmem:[%s3778_s21 + $0x150] sm:$0xff]  ;;  %v616_v60 = vpop.f32.mrf.mxu2  ;;  %v4159_v4 = vmul.f32 %v3925_v49, %v4125_v35 }
  0xdd   : > { %v2501_v36 = vadd.f32 %v2391_v50, %v2260_v57  ;;  %v1169_v57 = vmul.f32 %v3922_v47, %v4077_v55  ;;  %3446 = vmatmul.msk.f32.gmra.mxu2 %vm354_vm1, %v337_v54  ;;  %v617_v11 = vadd.f32 %v3907_v39, %v616_v60  ;;  %v4186_v60 = vmin.f32 %v725_v27, 6.0 }
  0xde   : > { %v762_v22 = vmin.f32 %v708_v45, 6.0  ;;  %6362 = vst [vmem:[#allocation36_spill] sm:$0xff] %v4159_v4 }
  0xdf   : > { %v2742_v50 = vadd.f32 %v2632_v26, %v2501_v36  ;;  %6363 = vst [vmem:[#allocation37_spill] sm:$0xff] %v4186_v60 }
  0xe0   : > { %v1114_v45 = vsel %vm943_vm4, %v762_v22, 0.0  ;;  %v1683_v22 = vmul.f32 %v3959_v32, %v4069_v52 }
  0xe1   : > { %v1205_v38 = vmul.f32 %v3916_v44, %v1114_v45  ;;  %v565_v56 = vpop.f32.mrf.mxu0  ;;  %v2295_v6 = vmul.f32 %v4006_v43, %v1114_v45  ;;  %v2536_v53 = vmul.f32 %v4011_v41, %v1114_v45  ;;  %v2778_v26 = vadd.f32 %v4137_v16, %v2742_v50 }
  0xe2   : > { %v566_v36 = vadd.f32 %v3907_v39, %v565_v56  ;;  %v338_v56 = vld [vmem:[%s3778_s21 + $0x158] sm:$0xff]  ;;  %v4178_v28 = vadd.f32 %v1683_v22, %v4075_v46  ;;  %v1447_v8 = vmul.f32 %v3925_v49, %v1114_v45  ;;  %v6364_v46 = vrot.slane %v4132_v18, 1 }
  0xe3   : > { %v2392_v3 = vrot.slane %v2295_v6, 1  ;;  %v2810_v25 = vmax.f32 %v2778_v26, 0.0  ;;  %v2633_v21 = vrot.slane %v2536_v53, 2  ;;  %v1307_v17 = vrot.slane %v1205_v38, 1 }
  0xe4   : > { %v709_v23 = vmax.f32 %v566_v36, 0.0  ;;  %v726_v36 = vmax.f32 %v617_v11, 0.0  ;;  %v4183_v38 = vmul.f32 %v3961_v33, %v4069_v52  ;;  %v340_v11 = vld [vmem:[%s3778_s21 + $0x168] sm:$0xff]  ;;  %v4207_v59 = vmul.f32 %v3966_v40, %v1114_v45 }
  0xe5   : > { %v2842_v13 = vmin.f32 %v2810_v25, 6.0  ;;  %v2393_v54 = vsel %vm1293_vm3, %v2390_v58, %v2392_v3  ;;  %3447 = vmatmul.msk.f32.gmra.mxu2 %vm354_vm1, %v338_v56  ;;  %v4192_v25 = vmul.f32 %v3961_v33, %v4077_v55  ;;  %v1308_v29 = vsel %vm1293_vm3, %v6364_v46, %v1307_v17  ;;  %3449 = vmatmul.msk.f32.gmra.mxu3 %vm354_vm1, %v340_v11 }
  0xe6   : > { %v763_v50 = vmin.f32 %v709_v23, 6.0  ;;  %v2502_v6 = vadd.f32 %v2393_v54, %v2261_v15  ;;  %v2634_v23 = vsel %vm1535_vm5, %v2631_v1, %v2633_v21  ;;  %v4196_v15 = vmul.f32 %v3966_v40, %v4069_v52  ;;  %v619_v1 = vpop.f32.mrf.mxu2 }
  0xe7   : > { %3458 = vmatmul.msk.f32.vlgmr.msra.gmra.mxu1 %vm2881_vm6, %v2842_v13  ;;  %v4203_v13 = vmul.f32 %v3961_v33, %v1114_v45  ;;  %v780_v58 = vmin.f32 %v726_v36, 6.0  ;;  %v4216_v17 = vmul.f32 %v3916_v44, %v4186_v60  ;;  %v1549_v26 = vrot.slane %v1447_v8, 2 }
  0xe8   : > { %v2743_v21 = vadd.f32 %v2634_v23, %v2502_v6  ;;  %v4211_v22 = vsel %vm884_vm2, %v763_v50, 0.0  ;;  %v4223_v45 = vmul.f32 %v3925_v49, %v4186_v60  ;;  %v1411_v56 = vadd.f32 %v1308_v29, %v1169_v57 }
  0xe9   : > { %v568_v27 = vpop.f32.mrf.mxu0  ;;  %6365 = vst [vmem:[#allocation38_spill] sm:$0xff] %v4216_v17  ;;  %v1132_v3 = vsel %vm943_vm4, %v780_v58, 0.0  ;;  %v620_v36 = vadd.f32 %v3907_v39, %v619_v1  ;;  %v4231_v8 = vmul.f32 %v3916_v44, %v4211_v22  ;;  %v1181_v46 = vmul.f32 %v3922_v47, %v4186_v60  ;;  %v341_v58 = vld [vmem:[%s3778_s21 + $0x170] sm:$0xff] }
  0xea   : > { %v569_v53 = vadd.f32 %v3907_v39, %v568_v27  ;;  %v2779_v54 = vadd.f32 %v4137_v16, %v2743_v21  ;;  %6366 = vst [vmem:[#allocation39_spill] sm:$0xff] %v4223_v45  ;;  %v1223_v50 = vmul.f32 %v3916_v44, %v1132_v3  ;;  %v1465_v6 = vmul.f32 %v3925_v49, %v1132_v3 }
  0xeb   : > { %v6235_v21 = vrot.slane %v4216_v17, 1  ;;  %v1550_v1 = vsel %vm1535_vm5, %v6367_v19, %v1549_v26  ;;  %v4242_v31 = vmul.f32 %v3925_v49, %v4211_v22 }
  0xec   : > { %v2811_v11 = vmax.f32 %v2779_v54, 0.0  ;;  %v710_v27 = vmax.f32 %v569_v53, 0.0  ;;  %v1337_v57 = vrot.slane %v1223_v50, 1  ;;  %v1579_v29 = vrot.slane %v1465_v6, 2 }
  0xed   : > { %v6236_v54 = vrot.slane %v4223_v45, 2  ;;  %v4245_v4 = vadd.f32 %v1550_v1, %v1411_v56  ;;  %v727_v6 = vmax.f32 %v620_v36, 0.0  ;;  %v4257_v56 = vmul.f32 %v3961_v33, %v1132_v3  ;;  %3450 = vmatmul.msk.f32.gmra.mxu3 %vm354_vm1, %v341_v58  ;;  %v342_v45 = vld [vmem:[%s3778_s21 + $0x178] sm:$0xff] }
  0xee   : > { %v2843_v23 = vmin.f32 %v2811_v11, 6.0  ;;  %v1338_v50 = vsel %vm1293_vm3, %v6235_v21, %v1337_v57  ;;  %v4260_v1 = vmin.f32 %v710_v27, 6.0  ;;  %v1847_v36 = vrot.slane %v4183_v38, 1  ;;  %v622_v58 = vpop.f32.mrf.mxu2 }
  0xef   : > { %v1423_v26 = vadd.f32 %v1338_v50, %v1181_v46  ;;  %v1580_v11 = vsel %vm1535_vm5, %v6236_v54, %v1579_v29  ;;  %6368 = vst [vmem:[#allocation40_spill] sm:$0xff] %v4257_v56  ;;  %v1848_v21 = vrot.slane %v4192_v25, 1  ;;  %v4269_v50 = vmul.f32 %v3966_v40, %v1132_v3 }
  0xf0   : > { %3459 = vmatmul.msk.f32.gmra.mxu1 %vm2881_vm6, %v2843_v23  ;;  %v4273_v29 = vmul.f32 %v3966_v40, %v4077_v55  ;;  %v4276_v54 = vmul.f32 %v4006_v43, %v1132_v3  ;;  %v2088_v53 = vrot.slane %v4196_v15, 2  ;;  %v2230_v15 = vmul.f32 %v4040_v14, %v4211_v22 }
  0xf1   : > { %v571_v19 = vpop.f32.mrf.mxu0  ;;  %v4266_v46 = vadd.f32 %v1580_v11, %v1423_v26  ;;  %6370 = vst [vmem:[#allocation42_spill] sm:$0xff] %v4269_v50  ;;  %v1849_v38 = vsel %vm1293_vm3, %v1847_v36, %v1848_v21  ;;  %v4281_v26 = vmul.f32 %v4011_v41, %v1132_v3  ;;  %v4294_v36 = vmul.f32 %v3916_v44, %v4260_v1 }
  0xf2   : > { %v572_v57 = vadd.f32 %v3907_v39, %v571_v19  ;;  %6371 = vst [vmem:[#allocation43_spill] sm:$0xff] %v4276_v54  ;;  %v781_v19 = vmin.f32 %v727_v6, 6.0  ;;  %v1956_v11 = vadd.f32 %v1849_v38, %v4178_v28  ;;  %v6240_v23 = vrot.slane %v4273_v29, 2 }
  0xf3   : > { %6369 = vst [vmem:[#allocation41_spill] sm:$0xff] %v4266_v46  ;;  %v4290_v6 = vmul.f32 %v4006_v43, %v4260_v1  ;;  %v4298_v3 = vmul.f32 %v3925_v49, %v4260_v1  ;;  %v2537_v50 = vmul.f32 %v4011_v41, %v4211_v22 }
  0xf4   : > { %v711_v27 = vmax.f32 %v572_v57, 0.0  ;;  %6372 = vst [vmem:[#allocation44_spill] sm:$0xff] %v4281_v26  ;;  %v2296_v57 = vmul.f32 %v4006_v43, %v4211_v22  ;;  %v4307_v38 = vsel %vm884_vm2, %v781_v19, 0.0  ;;  %v2090_v25 = vsel %vm1535_vm5, %v2088_v53, %v6240_v23 }
  0xf5   : > { %6373 = vst [vmem:[#allocation45_spill] sm:$0xff] %v4307_v38  ;;  %v2395_v46 = vrot.slane %v4290_v6, 1  ;;  %v2197_v12 = vadd.f32 %v2090_v25, %v1956_v11  ;;  %3451 = vmatmul.msk.f32.gmra.mxu3 %vm354_vm1, %v342_v45  ;;  %v4326_v6 = vmul.f32 %v3916_v44, %v4307_v38  ;;  %v1171_v25 = vmul.f32 %v3922_v47, %v4260_v1 }
  0xf6   : > { %v765_v62 = vmin.f32 %v711_v27, 6.0  ;;  %v2394_v23 = vrot.slane %v2296_v57, 1  ;;  %v4333_v56 = vmul.f32 %v3925_v49, %v4307_v38  ;;  %v2635_v57 = vrot.slane %v2537_v50, 2  ;;  %v625_v63 = vpop.f32.mrf.mxu2 }
  0xf7   : > { %6374 = vst [vmem:[#allocation46_spill] sm:$0xff] %v4326_v6  ;;  %v2262_v0 = vadd.f32 %v2230_v15, %v2197_v12  ;;  %v623_v12 = vadd.f32 %v3907_v39, %v622_v58  ;;  %v6376_v50 = vrot.slane %v4294_v36, 1  ;;  %v6377_v58 = vrot.slane %v4203_v13, 1 }
  0xf8   : > { %v1117_v27 = vsel %vm943_vm4, %v765_v62, 0.0  ;;  %v4319_v62 = vmul.f32 %v4011_v41, %v4260_v1  ;;  %6375 = vst [vmem:[#allocation47_spill] sm:$0xff] %v4333_v56 }
  0xf9   : > { %v1208_v17 = vmul.f32 %v3916_v44, %v1117_v27  ;;  %v574_v28 = vpop.f32.mrf.mxu0  ;;  %v1450_v26 = vmul.f32 %v3925_v49, %v1117_v27  ;;  %v2298_v11 = vmul.f32 %v4006_v43, %v1117_v27  ;;  %v2539_v15 = vmul.f32 %v4011_v41, %v1117_v27 }
  0xfa   : > { %v575_v53 = vadd.f32 %v3907_v39, %v574_v28  ;;  %v2396_v28 = vsel %vm1293_vm3, %v2394_v23, %v2395_v46  ;;  %v2636_v54 = vrot.slane %v4319_v62, 2 }
  0xfb   : > { %v1312_v45 = vrot.slane %v1208_v17, 1  ;;  %v2503_v9 = vadd.f32 %v2396_v28, %v2262_v0  ;;  %v4343_v17 = vmul.f32 %v3961_v33, %v1117_v27  ;;  %v1684_v0 = vmul.f32 %v3959_v32, %v4077_v55 }
  0xfc   : > { %v712_v61 = vmax.f32 %v575_v53, 0.0  ;;  %v2637_v23 = vsel %vm1535_vm5, %v2635_v57, %v2636_v54  ;;  %v1851_v28 = vsel %vm1293_vm3, %v1848_v21, %v6377_v58  ;;  %v1554_v38 = vrot.slane %v1450_v26, 2 }
  0xfd   : > { %v1313_v62 = vsel %vm1293_vm3, %v6376_v50, %v1312_v45  ;;  %v2744_v53 = vadd.f32 %v2637_v23, %v2503_v9  ;;  %v728_v57 = vmax.f32 %v623_v12, 0.0  ;;  %v1716_v56 = vadd.f32 %v1684_v0, %v4084_v30 }
  0xfe   : > { %v766_v37 = vmin.f32 %v712_v61, 6.0  ;;  %v4353_v61 = vmul.f32 %v3966_v40, %v1117_v27  ;;  %v2397_v55 = vrot.slane %v2298_v11, 1  ;;  %v1413_v23 = vadd.f32 %v1313_v62, %v1171_v25 }
  0xff   : > { %v2780_v45 = vadd.f32 %v4137_v16, %v2744_v53  ;;  %v1957_v21 = vadd.f32 %v1851_v28, %v1716_v56  ;;  %v2231_v26 = vmul.f32 %v4040_v14, %v4260_v1  ;;  %v6378_v30 = vrot.slane %v4207_v59, 2 }
 0x100   : > { %v4362_v6 = vsel %vm884_vm2, %v766_v37, 0.0  ;;  %v6379_v11 = vrot.slane %v4273_v29, 2  ;;  %v626_v0 = vadd.f32 %v3907_v39, %v625_v63  ;;  %v4383_v25 = vmin.f32 %v728_v57, 6.0 }
 0x101   : > { %v577_v19 = vpop.f32.mrf.mxu0  ;;  %v2812_v27 = vmax.f32 %v2780_v45, 0.0  ;;  %v4381_v56 = vmul.f32 %v3925_v49, %v4362_v6  ;;  %v2398_v59 = vsel %vm1293_vm3, %v2395_v46, %v2397_v55  ;;  %v2638_v53 = vrot.slane %v2539_v15, 2 }
 0x102   : > { %v578_v9 = vadd.f32 %v3907_v39, %v577_v19  ;;  %v2092_v37 = vsel %vm1535_vm5, %v6379_v11, %v6378_v30  ;;  %v4377_v19 = vmul.f32 %v3916_v44, %v4362_v6  ;;  %6380 = vst [vmem:[#allocation48_spill] sm:$0xff] %v4383_v25  ;;  %v729_v29 = vmax.f32 %v626_v0, 0.0  ;;  %v628_v30 = vpop.f32.mrf.mxu2 }
 0x103   : > { %v2198_v50 = vadd.f32 %v2092_v37, %v1957_v21  ;;  %v2844_v62 = vmin.f32 %v2812_v27, 6.0  ;;  %v6381_v58 = vrot.slane %v4298_v3, 2  ;;  %v4399_v46 = vmul.f32 %v3925_v49, %v4383_v25 }
 0x104   : > { %v713_v12 = vmax.f32 %v578_v9, 0.0  ;;  %v4392_v9 = vmul.f32 %v3916_v44, %v4383_v25  ;;  %v783_v21 = vmin.f32 %v729_v29, 6.0  ;;  %v629_v15 = vadd.f32 %v3907_v39, %v628_v30 }
 0x105   : > { %v1555_v63 = vsel %vm1535_vm5, %v6381_v58, %v1554_v38  ;;  %v2263_v45 = vadd.f32 %v2231_v26, %v2198_v50  ;;  %3460 = vmatmul.msk.f32.gmra.mxu1 %vm2881_vm6, %v2844_v62  ;;  %6383 = vst [vmem:[#allocation50_spill] sm:$0xff] %v4399_v46  ;;  %v2639_v37 = vsel %vm1535_vm5, %v2636_v54, %v2638_v53  ;;  %v6386_v26 = vrot.slane %v4093_v42, 1 }
 0x106   : > { %6382 = vst [vmem:[#allocation49_spill] sm:$0xff] %v4392_v9  ;;  %v4395_v57 = vmin.f32 %v713_v12, 6.0  ;;  %v4402_v38 = vadd.f32 %v1555_v63, %v1413_v23  ;;  %v1135_v0 = vsel %vm943_vm4, %v783_v21, 0.0  ;;  %v1183_v50 = vmul.f32 %v3922_v47, %v4383_v25 }
 0x107   : > { %v2504_v27 = vadd.f32 %v2398_v59, %v2263_v45  ;;  %v1226_v23 = vmul.f32 %v3916_v44, %v1135_v0  ;;  %v6252_v29 = vrot.slane %v4392_v9, 1  ;;  %v1468_v58 = vmul.f32 %v3925_v49, %v1135_v0  ;;  %v343_v45 = vld [vmem:[%s3778_s21 + $0x180] sm:$0xff]  ;;  %v344_v9 = vld [vmem:[%s3778_s21 + $0x188] sm:$0xff] }
 0x108   : > { %v4417_v59 = vmul.f32 %v3916_v44, %v4395_v57  ;;  %v730_v53 = vmax.f32 %v629_v15, 0.0  ;;  %v4424_v21 = vmul.f32 %v3922_v47, %v4395_v57  ;;  %3452 = vmatmul.msk.f32.gmra.mxu3 %vm354_vm1, %v343_v45  ;;  %v1168_v15 = vmul.f32 %v3922_v47, %v4069_v52 }
 0x109   : > { %v580_v11 = vpop.f32.mrf.mxu0  ;;  %v2745_v62 = vadd.f32 %v2639_v37, %v2504_v27  ;;  %v4428_v27 = vmul.f32 %v3925_v49, %v4395_v57  ;;  %v1584_v45 = vrot.slane %v1468_v58, 2 }
 0x10a   : > { %v581_v12 = vadd.f32 %v3907_v39, %v580_v11  ;;  %v1342_v11 = vrot.slane %v1226_v23, 1  ;;  %v784_v42 = vmin.f32 %v730_v53, 6.0  ;;  %v6390_v53 = vrot.slane %v4399_v46, 2 }
 0x10b   : > { %v2781_v30 = vadd.f32 %v4137_v16, %v2745_v62  ;;  %v6385_v62 = vrot.slane %v4132_v18, 1  ;;  %v4451_v18 = vmul.f32 %v4006_v43, %v1135_v0 }
 0x10c   : > { %v714_v63 = vmax.f32 %v581_v12, 0.0  ;;  %v4432_v12 = vmul.f32 %v3961_v33, %v1135_v0  ;;  %v1343_v23 = vsel %vm1293_vm3, %v6252_v29, %v1342_v11  ;;  %v4456_v11 = vmul.f32 %v4011_v41, %v1135_v0 }
 0x10d   : > { %v1306_v55 = vsel %vm1293_vm3, %v6386_v26, %v6385_v62  ;;  %v2813_v28 = vmax.f32 %v2781_v30, 0.0  ;;  %6388 = vst [vmem:[#allocation53_spill] sm:$0xff] %v4451_v18 }
 0x10e   : > { %v768_v37 = vmin.f32 %v714_v63, 6.0  ;;  %6384 = vst [vmem:[#allocation51_spill] sm:$0xff] %v4432_v12  ;;  %v4445_v63 = vmul.f32 %v3966_v40, %v1135_v0  ;;  %v1585_v0 = vsel %vm1535_vm5, %v6390_v53, %v1584_v45  ;;  %v6392_v45 = vrot.slane %v4141_v10, 2 }
 0x10f   : > { %v2845_v26 = vmin.f32 %v2813_v28, 6.0  ;;  %6389 = vst [vmem:[#allocation54_spill] sm:$0xff] %v4456_v11  ;;  %v6393_v53 = vrot.slane %v4102_v34, 2  ;;  %v1752_v10 = vmul.f32 %v3961_v33, %v4211_v22  ;;  %v1753_v34 = vmul.f32 %v3961_v33, %v4260_v1 }
 0x110   : > { %6387 = vst [vmem:[#allocation52_spill] sm:$0xff] %v4445_v63  ;;  %v1120_v13 = vsel %vm943_vm4, %v768_v37, 0.0  ;;  %v1425_v37 = vadd.f32 %v1343_v23, %v1183_v50  ;;  %v4479_v23 = vsel %vm884_vm2, %v784_v42, 0.0  ;;  %3453 = vmatmul.msk.f32.gmra.mxu3 %vm354_vm1, %v344_v9  ;;  %v1993_v9 = vmul.f32 %v3966_v40, %v4211_v22 }
 0x111   : > { %v1211_v30 = vmul.f32 %v3916_v44, %v1120_v13  ;;  %v583_v58 = vpop.f32.mrf.mxu0  ;;  %v1453_v29 = vmul.f32 %v3925_v49, %v1120_v13  ;;  %v4460_v54 = vmul.f32 %v3961_v33, %v1120_v13  ;;  %3461 = vmatmul.msk.f32.gmra.mxu1 %vm2881_vm6, %v2845_v26  ;;  %v4466_v28 = vmul.f32 %v3966_v40, %v1120_v13 }
 0x112   : > { %v584_v11 = vadd.f32 %v3907_v39, %v583_v58  ;;  %v4474_v25 = vmul.f32 %v4006_v43, %v1120_v13  ;;  %6391 = vst [vmem:[#allocation55_spill] sm:$0xff] %v4479_v23  ;;  %v1410_v26 = vadd.f32 %v1306_v55, %v1168_v15  ;;  %v4482_v12 = vmul.f32 %v4011_v41, %v1120_v13  ;;  %v631_v15 = vpop.f32.mrf.mxu2 }
 0x113   : > { %v1317_v52 = vrot.slane %v1211_v30, 1  ;;  %v1548_v58 = vsel %vm1535_vm5, %v6393_v53, %v6392_v45  ;;  %v1559_v62 = vrot.slane %v1453_v29, 2  ;;  %v4491_v63 = vadd.f32 %v1585_v0, %v1425_v37 }
 0x114   : > { %v715_v46 = vmax.f32 %v584_v11, 0.0  ;;  %v1685_v55 = vmul.f32 %v3959_v32, %v4211_v22  ;;  %v4505_v42 = vmul.f32 %v3916_v44, %v4479_v23  ;;  %v1652_v30 = vadd.f32 %v1548_v58, %v1410_v26  ;;  %v345_v58 = vld [vmem:[%s3778_s21 + $0x190] sm:$0xff] }
 0x115   : > { %6394 = vst [vmem:[#allocation56_spill] sm:$0xff] %v4491_v63  ;;  %v1994_v11 = vmul.f32 %v3966_v40, %v4260_v1  ;;  %v6396_v37 = vrot.slane %v4417_v59, 1  ;;  %v1852_v53 = vrot.slane %v1752_v10, 1  ;;  %v1853_v13 = vrot.slane %v1753_v34, 1 }
 0x116   : > { %6395 = vst [vmem:[#allocation57_spill] sm:$0xff] %v4505_v42  ;;  %v769_v45 = vmin.f32 %v715_v46, 6.0  ;;  %v4514_v63 = vmul.f32 %v3925_v49, %v4479_v23  ;;  %v1717_v29 = vadd.f32 %v1685_v55, %v1652_v30  ;;  %v2299_v26 = vmul.f32 %v4006_v43, %v4362_v6 }
 0x117   : > { %v1318_v0 = vsel %vm1293_vm3, %v6396_v37, %v1317_v52  ;;  %v2094_v18 = vrot.slane %v1994_v11, 2  ;;  %v1854_v5 = vsel %vm1293_vm3, %v1852_v53, %v1853_v13  ;;  %v2093_v7 = vrot.slane %v1993_v9, 2 }
 0x118   : > { %6397 = vst [vmem:[#allocation58_spill] sm:$0xff] %v4514_v63  ;;  %v2300_v52 = vmul.f32 %v4006_v43, %v4395_v57  ;;  %v2541_v46 = vmul.f32 %v4011_v41, %v4395_v57  ;;  %v1415_v10 = vadd.f32 %v1318_v0, %v4424_v21  ;;  %v1958_v34 = vadd.f32 %v1854_v5, %v1717_v29 }
 0x119   : > { %v586_v50 = vpop.f32.mrf.mxu0  ;;  %v2232_v55 = vmul.f32 %v4040_v14, %v4362_v6  ;;  %v2540_v30 = vmul.f32 %v4011_v41, %v4362_v6  ;;  %v4531_v11 = vsel %vm884_vm2, %v769_v45, 0.0  ;;  %v2095_v9 = vsel %vm1535_vm5, %v2093_v7, %v2094_v18  ;;  %3454 = vmatmul.msk.f32.gmra.mxu3 %vm354_vm1, %v345_v58 }
 0x11a   : > { %v2399_v37 = vrot.slane %v2299_v26, 1  ;;  %v2400_v53 = vrot.slane %v2300_v52, 1  ;;  %v2199_v23 = vadd.f32 %v2095_v9, %v1958_v34  ;;  %v2641_v60 = vrot.slane %v2541_v46, 2  ;;  %v634_v34 = vpop.f32.mrf.mxu2 }
 0x11b   : > { %v587_v5 = vadd.f32 %v3907_v39, %v586_v50  ;;  %v632_v21 = vadd.f32 %v3907_v39, %v631_v15  ;;  %v6398_v29 = vrot.slane %v4428_v27, 2  ;;  %v1686_v7 = vmul.f32 %v3959_v32, %v4260_v1 }
 0x11c   : > { %v2401_v45 = vsel %vm1293_vm3, %v2399_v37, %v2400_v53  ;;  %v2264_v26 = vadd.f32 %v2232_v55, %v2199_v23  ;;  %v2640_v52 = vrot.slane %v2540_v30, 2  ;;  %v6399_v46 = vrot.slane %v4343_v17, 1 }
 0x11d   : > { %v1560_v0 = vsel %vm1535_vm5, %v6398_v29, %v1559_v62  ;;  %v716_v58 = vmax.f32 %v587_v5, 0.0  ;;  %v4551_v62 = vmul.f32 %v3916_v44, %v4531_v11  ;;  %v1718_v37 = vadd.f32 %v1686_v7, %v4245_v4 }
 0x11e   : > { %v1856_v50 = vsel %vm1293_vm3, %v1853_v13, %v6399_v46  ;;  %v4547_v15 = vadd.f32 %v1560_v0, %v1415_v10  ;;  %v2505_v1 = vadd.f32 %v2401_v45, %v2264_v26  ;;  %v2642_v23 = vsel %vm1535_vm5, %v2640_v52, %v2641_v60 }
 0x11f   : > { %v4556_v55 = vmin.f32 %v716_v58, 6.0  ;;  %v731_v17 = vmax.f32 %v632_v21, 0.0  ;;  %v1959_v30 = vadd.f32 %v1856_v50, %v1718_v37  ;;  %v2233_v13 = vmul.f32 %v4040_v14, %v4395_v57 }
 0x120   : > { %v635_v5 = vadd.f32 %v3907_v39, %v634_v34  ;;  %v4564_v0 = vmul.f32 %v3925_v49, %v4531_v11  ;;  %v2746_v4 = vadd.f32 %v2642_v23, %v2505_v1  ;;  %v6400_v45 = vrot.slane %v4353_v61, 2 }
 0x121   : > { %v589_v29 = vpop.f32.mrf.mxu0  ;;  %v2643_v26 = vrot.slane %v4482_v12, 2  ;;  %v4572_v58 = vmul.f32 %v3916_v44, %v4556_v55  ;;  %v4576_v34 = vmin.f32 %v731_v17, 6.0  ;;  %v6402_v37 = vrot.slane %v4474_v25, 1 }
 0x122   : > { %v590_v10 = vadd.f32 %v3907_v39, %v589_v29  ;;  %v2097_v7 = vsel %vm1535_vm5, %v2094_v18, %v6400_v45  ;;  %v732_v46 = vmax.f32 %v635_v5, 0.0  ;;  %v2782_v50 = vadd.f32 %v4137_v16, %v2746_v4 }
 0x123   : > { %v2200_v21 = vadd.f32 %v2097_v7, %v1959_v30  ;;  %6401 = vst [vmem:[#allocation59_spill] sm:$0xff] %v4576_v34  ;;  %v2403_v61 = vsel %vm1293_vm3, %v2400_v53, %v6402_v37  ;;  %v4583_v12 = vmul.f32 %v3925_v49, %v4556_v55  ;;  %v1175_v17 = vmul.f32 %v3922_v47, %v4556_v55  ;;  %v637_v37 = vpop.f32.mrf.mxu2 }
 0x124   : > { %v717_v52 = vmax.f32 %v590_v10, 0.0  ;;  %v786_v1 = vmin.f32 %v732_v46, 6.0  ;;  %v2814_v30 = vmax.f32 %v2782_v50, 0.0  ;;  %v2644_v10 = vsel %vm1535_vm5, %v2641_v60, %v2643_v26 }
 0x125   : > { %v2265_v18 = vadd.f32 %v2233_v13, %v2200_v21  ;;  %v6273_v53 = vrot.slane %v4572_v58, 1  ;;  %v4594_v13 = vmul.f32 %v3916_v44, %v4576_v34  ;;  %v1185_v60 = vmul.f32 %v3922_v47, %v4576_v34 }
 0x126   : > { %v771_v29 = vmin.f32 %v717_v52, 6.0  ;;  %v2846_v45 = vmin.f32 %v2814_v30, 6.0  ;;  %v1138_v46 = vsel %vm943_vm4, %v786_v1, 0.0  ;;  %v4605_v50 = vmul.f32 %v3925_v49, %v4576_v34 }
 0x127   : > { %v2506_v5 = vadd.f32 %v2403_v61, %v2265_v18  ;;  %6403 = vst [vmem:[#allocation60_spill] sm:$0xff] %v4594_v13  ;;  %v1229_v30 = vmul.f32 %v3916_v44, %v1138_v46  ;;  %v1471_v9 = vmul.f32 %v3925_v49, %v1138_v46  ;;  %v1170_v39 = vmul.f32 %v3922_v47, %v4211_v22 }
 0x128   : > { %v1123_v25 = vsel %vm943_vm4, %v771_v29, 0.0  ;;  %6404 = vst [vmem:[#allocation61_spill] sm:$0xff] %v4605_v50  ;;  %3462 = vmatmul.msk.f32.gmra.mxu1 %vm2881_vm6, %v2846_v45 }
 0x129   : > { %v592_v4 = vpop.f32.mrf.mxu0  ;;  %v1214_v7 = vmul.f32 %v3916_v44, %v1123_v25  ;;  %v1456_v21 = vmul.f32 %v3925_v49, %v1123_v25  ;;  %v2747_v26 = vadd.f32 %v2644_v10, %v2506_v5  ;;  %v4609_v18 = vmul.f32 %v3961_v33, %v1123_v25 }
 0x12a   : > { %v4612_v29 = vmul.f32 %v3966_v40, %v1123_v25  ;;  %v4617_v1 = vmul.f32 %v4006_v43, %v1123_v25  ;;  %v1347_v45 = vrot.slane %v1229_v30, 1  ;;  %v6275_v5 = vrot.slane %v4605_v50, 2 }
 0x12b   : > { %v1322_v61 = vrot.slane %v1214_v7, 1  ;;  %v2783_v10 = vadd.f32 %v4137_v16, %v2747_v26  ;;  %v1564_v35 = vrot.slane %v1456_v21, 2  ;;  %v4624_v7 = vld [vmem:[%s6203_s2] ss:$0 sm:$0xff]  ;;  %v1589_v63 = vrot.slane %v1471_v9, 2 }
 0x12c   : > { %v638_v23 = vadd.f32 %v4624_v7, %v637_v37  ;;  %v4636_v42 = vmul.f32 %v4011_v41, %v1123_v25  ;;  %v6405_v37 = vrot.slane %v4594_v13, 1  ;;  %v6406_v21 = vrot.slane %v4583_v12, 2 }
 0x12d   : > { %v2815_v26 = vmax.f32 %v2783_v10, 0.0  ;;  %v1323_v52 = vsel %vm1293_vm3, %v6273_v53, %v1322_v61  ;;  %v1590_v61 = vsel %vm1535_vm5, %v6275_v5, %v1589_v63  ;;  %v4649_v25 = vmul.f32 %v3961_v33, %v1138_v46 }
 0x12e   : > { %v1348_v34 = vsel %vm1293_vm3, %v6405_v37, %v1347_v45  ;;  %v1417_v53 = vadd.f32 %v1323_v52, %v1175_v17  ;;  %v1565_v30 = vsel %vm1535_vm5, %v6406_v21, %v1564_v35  ;;  %v593_v13 = vadd.f32 %v4624_v7, %v592_v4  ;;  %v640_v37 = vpop.f32.mrf.mxu2 }
 0x12f   : > { %v2847_v22 = vmin.f32 %v2815_v26, 6.0  ;;  %v1427_v2 = vadd.f32 %v1348_v34, %v1185_v60  ;;  %6407 = vst [vmem:[#allocation62_spill] sm:$0xff] %v4649_v25  ;;  %v4655_v26 = vmul.f32 %v3966_v40, %v1138_v46  ;;  %v733_v34 = vmax.f32 %v638_v23, 0.0 }
 0x130   : > { %v6410_v60 = vrot.slane %v4294_v36, 1  ;;  %v6411_v63 = vrot.slane %v4231_v8, 1  ;;  %v4664_v35 = vmul.f32 %v4006_v43, %v1138_v46  ;;  %v718_v52 = vmax.f32 %v593_v13, 0.0 }
 0x131   : > { %v595_v9 = vpop.f32.mrf.mxu0  ;;  %v4652_v45 = vadd.f32 %v1590_v61, %v1427_v2  ;;  %6409 = vst [vmem:[#allocation64_spill] sm:$0xff] %v4655_v26  ;;  %3463 = vmatmul.msk.f32.gmra.mxu1 %vm2881_vm6, %v2847_v22  ;;  %v1755_v2 = vmul.f32 %v3961_v33, %v4362_v6  ;;  %v787_v4 = vmin.f32 %v733_v34, 6.0  ;;  %v1687_v23 = vmul.f32 %v3959_v32, %v4362_v6 }
 0x132   : > { %v1311_v17 = vsel %vm1293_vm3, %v6411_v63, %v6410_v60  ;;  %6412 = vst [vmem:[#allocation65_spill] sm:$0xff] %v4664_v35  ;;  %v1756_v36 = vmul.f32 %v3961_v33, %v4395_v57  ;;  %v1997_v8 = vmul.f32 %v3966_v40, %v4395_v57  ;;  %v4675_v22 = vmul.f32 %v4011_v41, %v1138_v46 }
 0x133   : > { %6408 = vst [vmem:[#allocation63_spill] sm:$0xff] %v4652_v45  ;;  %v1412_v21 = vadd.f32 %v1311_v17, %v1170_v39  ;;  %v772_v61 = vmin.f32 %v718_v52, 6.0  ;;  %v6414_v39 = vrot.slane %v4298_v3, 2  ;;  %v6415_v13 = vrot.slane %v4242_v31, 2 }
 0x134   : > { %6413 = vst [vmem:[#allocation66_spill] sm:$0xff] %v4675_v22  ;;  %v1996_v60 = vmul.f32 %v3966_v40, %v4362_v6  ;;  %v4684_v63 = vadd.f32 %v1565_v30, %v1417_v53  ;;  %v1857_v5 = vrot.slane %v1755_v2, 1  ;;  %v1858_v10 = vrot.slane %v1756_v36, 1 }
 0x135   : > { %v1553_v34 = vsel %vm1535_vm5, %v6415_v13, %v6414_v39  ;;  %v2099_v50 = vrot.slane %v1997_v8, 2  ;;  %v4691_v31 = vsel %vm884_vm2, %v787_v4, 0.0  ;;  %v2234_v53 = vmul.f32 %v4040_v14, %v4531_v11 }
 0x136   : > { %v1654_v17 = vadd.f32 %v1553_v34, %v1412_v21  ;;  %6416 = vst [vmem:[#allocation67_spill] sm:$0xff] %v4691_v31  ;;  %v1859_v39 = vsel %vm1293_vm3, %v1857_v5, %v1858_v10  ;;  %v4698_v30 = vsel %vm884_vm2, %v772_v61, 0.0  ;;  %v4702_v21 = vmul.f32 %v3922_v47, %v4691_v31 }
 0x137   : > { %v2098_v2 = vrot.slane %v1996_v60, 2  ;;  %v2302_v36 = vmul.f32 %v4006_v43, %v4531_v11  ;;  %v4708_v4 = vmul.f32 %v3916_v44, %v4691_v31  ;;  %v4712_v5 = vmul.f32 %v3925_v49, %v4691_v31 }
 0x138   : > { %v1719_v3 = vadd.f32 %v1687_v23, %v1654_v17  ;;  %6417 = vst [vmem:[#allocation68_spill] sm:$0xff] %v4702_v21  ;;  %v2303_v8 = vmul.f32 %v4006_v43, %v4556_v55  ;;  %v2543_v34 = vmul.f32 %v4011_v41, %v4531_v11  ;;  %v2544_v60 = vmul.f32 %v4011_v41, %v4556_v55 }
 0x139   : > { %6418 = vst [vmem:[#allocation69_spill] sm:$0xff] %v4708_v4  ;;  %v598_v61 = vpop.f32.mrf.mxu0  ;;  %v2100_v13 = vsel %vm1535_vm5, %v2098_v2, %v2099_v50  ;;  %v596_v17 = vadd.f32 %v4624_v7, %v595_v9  ;;  %v2404_v45 = vrot.slane %v2302_v36, 1  ;;  %v641_v25 = vadd.f32 %v4624_v7, %v640_v37 }
 0x13a   : > { %6419 = vst [vmem:[#allocation70_spill] sm:$0xff] %v4712_v5  ;;  %v1960_v23 = vadd.f32 %v1859_v39, %v1719_v3  ;;  %v2405_v52 = vrot.slane %v2303_v8, 1  ;;  %v1688_v3 = vmul.f32 %v3959_v32, %v4395_v57  ;;  %v2646_v39 = vrot.slane %v2544_v60, 2 }
 0x13b   : > { %v719_v26 = vmax.f32 %v596_v17, 0.0  ;;  %v6420_v2 = vrot.slane %v4460_v54, 1  ;;  %v4730_v22 = vmul.f32 %v3916_v44, %v4698_v30  ;;  %v4736_v57 = vmul.f32 %v3925_v49, %v4698_v30 }
 0x13c   : > { %v2201_v46 = vadd.f32 %v2100_v13, %v1960_v23  ;;  %v2406_v9 = vsel %vm1293_vm3, %v2404_v45, %v2405_v52  ;;  %v1720_v36 = vadd.f32 %v1688_v3, %v4402_v38  ;;  %v643_v23 = vpop.f32.mrf.mxu2  ;;  %v2645_v8 = vrot.slane %v2543_v34, 2 }
 0x13d   : > { %v1861_v31 = vsel %vm1293_vm3, %v1858_v10, %v6420_v2  ;;  %v4739_v54 = vmin.f32 %v719_v26, 6.0  ;;  %v734_v38 = vmax.f32 %v641_v25, 0.0  ;;  %v599_v3 = vadd.f32 %v4624_v7, %v598_v61 }
 0x13e   : > { %v2266_v35 = vadd.f32 %v2234_v53, %v2201_v46  ;;  %v1961_v60 = vadd.f32 %v1861_v31, %v1720_v36  ;;  %v2235_v46 = vmul.f32 %v4040_v14, %v4556_v55  ;;  %v2647_v45 = vsel %vm1535_vm5, %v2645_v8, %v2646_v39 }
 0x13f   : > { %v6421_v53 = vrot.slane %v4466_v28, 2  ;;  %v2648_v26 = vrot.slane %v4636_v42, 2  ;;  %v644_v10 = vadd.f32 %v4624_v7, %v643_v23  ;;  %v6422_v31 = vrot.slane %v4617_v1, 1 }
 0x140   : > { %v2507_v13 = vadd.f32 %v2406_v9, %v2266_v35  ;;  %v720_v36 = vmax.f32 %v599_v3, 0.0  ;;  %v4757_v28 = vmul.f32 %v3916_v44, %v4739_v54  ;;  %v1177_v1 = vmul.f32 %v3922_v47, %v4739_v54 }
 0x141   : > { %v2102_v17 = vsel %vm1535_vm5, %v2099_v50, %v6421_v53  ;;  %v2408_v9 = vsel %vm1293_vm3, %v2405_v52, %v6422_v31  ;;  %v735_v8 = vmax.f32 %v644_v10, 0.0  ;;  %v601_v42 = vpop.f32.mrf.mxu0  ;;  %v4767_v52 = vmul.f32 %v3925_v49, %v4739_v54 }
 0x142   : > { %v2748_v2 = vadd.f32 %v2647_v45, %v2507_v13  ;;  %v2202_v34 = vadd.f32 %v2102_v17, %v1961_v60  ;;  %v4761_v13 = vmin.f32 %v734_v38, 6.0  ;;  %v774_v23 = vmin.f32 %v720_v36, 6.0 }
 0x143   : > { %v2649_v53 = vsel %vm1535_vm5, %v2646_v39, %v2648_v26  ;;  %v789_v17 = vmin.f32 %v735_v8, 6.0  ;;  %v6285_v10 = vrot.slane %v4757_v28, 1  ;;  %v602_v3 = vadd.f32 %v4624_v7, %v601_v42 }
 0x144   : > { %v2784_v25 = vadd.f32 %v4137_v16, %v2748_v2  ;;  %v2267_v61 = vadd.f32 %v2235_v46, %v2202_v34  ;;  %6423 = vst [vmem:[#allocation71_spill] sm:$0xff] %v4761_v13  ;;  %v1126_v46 = vsel %vm943_vm4, %v774_v23, 0.0  ;;  %v1187_v38 = vmul.f32 %v3922_v47, %v4761_v13 }
 0x145   : > { %v1217_v31 = vmul.f32 %v3916_v44, %v1126_v46  ;;  %v1459_v36 = vmul.f32 %v3925_v49, %v1126_v46  ;;  %v4780_v26 = vmul.f32 %v3961_v33, %v1126_v46  ;;  %v4793_v23 = vmul.f32 %v3966_v40, %v1126_v46 }
 0x146   : > { %v2816_v60 = vmax.f32 %v2784_v25, 0.0  ;;  %v2508_v45 = vadd.f32 %v2408_v9, %v2267_v61  ;;  %v646_v9 = vpop.f32.mrf.mxu2  ;;  %v4784_v25 = vmul.f32 %v3916_v44, %v4761_v13  ;;  %v4788_v61 = vmul.f32 %v3925_v49, %v4761_v13 }
 0x147   : > { %v1327_v42 = vrot.slane %v1217_v31, 1  ;;  %v647_v50 = vadd.f32 %v4624_v7, %v646_v9  ;;  %v4807_v31 = vmul.f32 %v4011_v41, %v1126_v46 }
 0x148   : > { %v2848_v2 = vmin.f32 %v2816_v60, 6.0  ;;  %v2749_v34 = vadd.f32 %v2649_v53, %v2508_v45  ;;  %6424 = vst [vmem:[#allocation72_spill] sm:$0xff] %v4784_v25  ;;  %v1141_v60 = vsel %vm943_vm4, %v789_v17, 0.0  ;;  %v1569_v45 = vrot.slane %v1459_v36, 2 }
 0x149   : > { %6425 = vst [vmem:[#allocation73_spill] sm:$0xff] %v4788_v61  ;;  %v4798_v53 = vmul.f32 %v4006_v43, %v1126_v46  ;;  %v1232_v37 = vmul.f32 %v3916_v44, %v1141_v60  ;;  %v6286_v17 = vrot.slane %v4784_v25, 1  ;;  %v6287_v39 = vrot.slane %v4788_v61, 2 }
 0x14a   : > { %3464 = vmatmul.msk.f32.gmra.mxu1 %vm2881_vm6, %v2848_v2  ;;  %v2785_v8 = vadd.f32 %v4137_v16, %v2749_v34  ;;  %v1328_v16 = vsel %vm1293_vm3, %v6285_v10, %v1327_v42  ;;  %v1474_v2 = vmul.f32 %v3925_v49, %v1141_v60  ;;  %v721_v34 = vmax.f32 %v602_v3, 0.0 }
 0x14b   : > { %v1352_v36 = vrot.slane %v1232_v37, 1  ;;  %v1419_v21 = vadd.f32 %v1328_v16, %v1177_v1  ;;  %v6426_v42 = vrot.slane %v4767_v52, 2  ;;  %v4821_v37 = vmul.f32 %v3961_v33, %v1141_v60 }
 0x14c   : > { %v2817_v35 = vmax.f32 %v2785_v8, 0.0  ;;  %v1594_v8 = vrot.slane %v1474_v2, 2  ;;  %v4827_v9 = vmul.f32 %v4006_v43, %v1141_v60  ;;  %v775_v1 = vmin.f32 %v721_v34, 6.0 }
 0x14d   : > { %v1570_v10 = vsel %vm1535_vm5, %v6426_v42, %v1569_v45  ;;  %v1353_v46 = vsel %vm1293_vm3, %v6286_v17, %v1352_v36  ;;  %6427 = vst [vmem:[#allocation74_spill] sm:$0xff] %v4821_v37  ;;  %v4830_v16 = vmul.f32 %v4011_v41, %v1141_v60  ;;  %v736_v45 = vmax.f32 %v647_v50, 0.0 }
 0x14e   : > { %v2849_v13 = vmin.f32 %v2817_v35, 6.0  ;;  %v4824_v35 = vmul.f32 %v3966_v40, %v1141_v60  ;;  %6429 = vst [vmem:[#allocation76_spill] sm:$0xff] %v4827_v9  ;;  %v1172_v2 = vmul.f32 %v3922_v47, %v4362_v6  ;;  %v6431_v42 = vrot.slane %v4417_v59, 1  ;;  %v649_v50 = vpop.f32.mrf.mxu2 }
 0x14f   : > { %6430 = vst [vmem:[#allocation77_spill] sm:$0xff] %v4830_v16  ;;  %v6432_v36 = vrot.slane %v4377_v19, 1  ;;  %v1429_v5 = vadd.f32 %v1353_v46, %v1187_v38  ;;  %v1595_v34 = vsel %vm1535_vm5, %v6287_v39, %v1594_v8  ;;  %v4845_v60 = vsel %vm884_vm2, %v775_v1, 0.0 }
 0x150   : > { %6428 = vst [vmem:[#allocation75_spill] sm:$0xff] %v4824_v35  ;;  %v1758_v6 = vmul.f32 %v3961_v33, %v4531_v11  ;;  %v4851_v19 = vmul.f32 %v3916_v44, %v4845_v60  ;;  %v6434_v38 = vrot.slane %v4381_v56, 2  ;;  %v1689_v8 = vmul.f32 %v3959_v32, %v4531_v11 }
 0x151   : > { %v1316_v17 = vsel %vm1293_vm3, %v6432_v36, %v6431_v42  ;;  %v790_v1 = vmin.f32 %v736_v45, 6.0  ;;  %v1759_v42 = vmul.f32 %v3961_v33, %v4556_v55  ;;  %v1999_v36 = vmul.f32 %v3966_v40, %v4531_v11 }
 0x152   : > { %3465 = vmatmul.msk.f32.gmra.mxu1 %vm2881_vm6, %v2849_v13  ;;  %v1414_v59 = vadd.f32 %v1316_v17, %v1172_v2  ;;  %v6433_v13 = vrot.slane %v4428_v27, 2  ;;  %v2000_v39 = vmul.f32 %v3966_v40, %v4556_v55  ;;  %v4866_v17 = vadd.f32 %v1570_v10, %v1419_v21 }
 0x153   : > { %v1863_v3 = vrot.slane %v1759_v42, 1  ;;  %v4875_v16 = vmul.f32 %v3925_v49, %v4845_v60  ;;  %v2103_v4 = vrot.slane %v1999_v36, 2  ;;  %v4880_v10 = vsel %vm884_vm2, %v790_v1, 0.0 }
 0x154   : > { %v1558_v46 = vsel %vm1535_vm5, %v6434_v38, %v6433_v13  ;;  %v4870_v13 = vadd.f32 %v1595_v34, %v1429_v5  ;;  %v1862_v38 = vrot.slane %v1758_v6, 1  ;;  %v2104_v25 = vrot.slane %v2000_v39, 2 }
 0x155   : > { %v1656_v2 = vadd.f32 %v1558_v46, %v1414_v59  ;;  %v2305_v34 = vmul.f32 %v4006_v43, %v4698_v30  ;;  %v2236_v46 = vmul.f32 %v4040_v14, %v4698_v30  ;;  %v2306_v39 = vmul.f32 %v4006_v43, %v4739_v54 }
 0x156   : > { %v1864_v5 = vsel %vm1293_vm3, %v1862_v38, %v1863_v3  ;;  %v2105_v59 = vsel %vm1535_vm5, %v2103_v4, %v2104_v25  ;;  %v2547_v1 = vmul.f32 %v4011_v41, %v4739_v54  ;;  %v650_v42 = vadd.f32 %v4624_v7, %v649_v50  ;;  %v652_v50 = vpop.f32.mrf.mxu2 }
 0x157   : > { %v1721_v61 = vadd.f32 %v1689_v8, %v1656_v2  ;;  %v2546_v8 = vmul.f32 %v4011_v41, %v4698_v30  ;;  %v1690_v36 = vmul.f32 %v3959_v32, %v4556_v55  ;;  %v2409_v2 = vrot.slane %v2305_v34, 1 }
 0x158   : > { %v2410_v4 = vrot.slane %v2306_v39, 1  ;;  %v6435_v38 = vrot.slane %v4609_v18, 1  ;;  %v4903_v27 = vmul.f32 %v3916_v44, %v4880_v10  ;;  %v2651_v45 = vrot.slane %v2547_v1, 2 }
 0x159   : > { %v1962_v6 = vadd.f32 %v1864_v5, %v1721_v61  ;;  %v1722_v21 = vadd.f32 %v1690_v36, %v4547_v15  ;;  %v4908_v55 = vmul.f32 %v3925_v49, %v4880_v10  ;;  %v737_v18 = vmax.f32 %v650_v42, 0.0 }
 0x15a   : > { %v1866_v5 = vsel %vm1293_vm3, %v1863_v3, %v6435_v38  ;;  %6436 = vst [vmem:[#allocation78_spill] sm:$0xff] %v4903_v27  ;;  %v6438_v39 = vrot.slane %v4612_v29, 2  ;;  %v2237_v1 = vmul.f32 %v4040_v14, %v4739_v54  ;;  %v2653_v15 = vrot.slane %v4807_v31, 2 }
 0x15b   : > { %v2203_v61 = vadd.f32 %v2105_v59, %v1962_v6  ;;  %6437 = vst [vmem:[#allocation79_spill] sm:$0xff] %v4908_v55  ;;  %v2411_v6 = vsel %vm1293_vm3, %v2409_v2, %v2410_v4  ;;  %v2650_v59 = vrot.slane %v2546_v8, 2  ;;  %v1963_v3 = vadd.f32 %v1866_v5, %v1722_v21 }
 0x15c   : > { %v2107_v38 = vsel %vm1535_vm5, %v2104_v25, %v6438_v39  ;;  %v653_v36 = vadd.f32 %v4624_v7, %v652_v50  ;;  %v6439_v35 = vrot.slane %v4572_v58, 1  ;;  %v4925_v21 = vmul.f32 %v3961_v33, %v4880_v10 }
 0x15d   : > { %v2268_v34 = vadd.f32 %v2236_v46, %v2203_v61  ;;  %v6440_v46 = vrot.slane %v4551_v62, 1  ;;  %v2652_v29 = vsel %vm1535_vm5, %v2650_v59, %v2651_v45  ;;  %v2204_v25 = vadd.f32 %v2107_v38, %v1963_v3 }
 0x15e   : > { %v1174_v8 = vmul.f32 %v3922_v47, %v4531_v11  ;;  %v4930_v31 = vmin.f32 %v737_v18, 6.0  ;;  %v6441_v2 = vrot.slane %v4798_v53, 1  ;;  %v738_v58 = vmax.f32 %v653_v36, 0.0 }
 0x15f   : > { %v2509_v56 = vadd.f32 %v2411_v6, %v2268_v34  ;;  %v1321_v42 = vsel %vm1293_vm3, %v6440_v46, %v6439_v35  ;;  %v2269_v50 = vadd.f32 %v2237_v1, %v2204_v25  ;;  %v4940_v6 = vld [vmem:[%s6205_s4] ss:$0 sm:$0xff]  ;;  %v6442_v3 = vrot.slane %v4583_v12, 2 }
 0x160   : > { %v2413_v62 = vsel %vm1293_vm3, %v2410_v4, %v6441_v2  ;;  %v1416_v34 = vadd.f32 %v1321_v42, %v1174_v8  ;;  %v792_v53 = vmin.f32 %v738_v58, 6.0  ;;  %v4946_v4 = vmul.f32 %v3916_v44, %v4930_v31  ;;  %v655_v58 = vpop.f32.mrf.mxu2 }
 0x161   : > { %v2750_v61 = vadd.f32 %v2652_v29, %v2509_v56  ;;  %v2654_v56 = vsel %vm1535_vm5, %v2651_v45, %v2653_v15  ;;  %v2510_v18 = vadd.f32 %v2413_v62, %v2269_v50  ;;  %v4950_v59 = vmul.f32 %v3925_v49, %v4930_v31  ;;  %v346_v45 = vld [vmem:[%s3778_s21 + $0x198] sm:$0xff] }
 0x162   : > { %v6443_v39 = vrot.slane %v4564_v0, 2  ;;  %v1691_v1 = vmul.f32 %v3959_v32, %v4698_v30  ;;  %v1144_v36 = vsel %vm943_vm4, %v792_v53, 0.0  ;;  %v1761_v46 = vmul.f32 %v3961_v33, %v4698_v30  ;;  %3455 = vmatmul.msk.f32.gmra.mxu3 %vm354_vm1, %v346_v45 }
 0x163   : > { %v2786_v11 = vadd.f32 %v4940_v6, %v2750_v61  ;;  %v1762_v42 = vmul.f32 %v3961_v33, %v4739_v54  ;;  %v2751_v12 = vadd.f32 %v2654_v56, %v2510_v18  ;;  %v4969_v0 = vmul.f32 %v3922_v47, %v4930_v31 }
 0x164   : > { %v1563_v38 = vsel %vm1535_vm5, %v6443_v39, %v6442_v3  ;;  %v1235_v29 = vmul.f32 %v3916_v44, %v1144_v36  ;;  %v1477_v61 = vmul.f32 %v3925_v49, %v1144_v36  ;;  %v2002_v2 = vmul.f32 %v3966_v40, %v4698_v30 }
 0x165   : > { %v2818_v15 = vmax.f32 %v2786_v11, 0.0  ;;  %v1658_v25 = vadd.f32 %v1563_v38, %v1416_v34  ;;  %v2003_v62 = vmul.f32 %v3966_v40, %v4739_v54  ;;  %v2787_v50 = vadd.f32 %v4940_v6, %v2751_v12 }
 0x166   : > { %v4982_v34 = vmul.f32 %v3961_v33, %v1144_v36  ;;  %v4985_v18 = vmul.f32 %v3966_v40, %v1144_v36  ;;  %v1867_v3 = vrot.slane %v1761_v46, 1  ;;  %v1868_v39 = vrot.slane %v1762_v42, 1 }
 0x167   : > { %v2850_v8 = vmin.f32 %v2818_v15, 6.0  ;;  %v1723_v53 = vadd.f32 %v1691_v1, %v1658_v25  ;;  %v2819_v38 = vmax.f32 %v2787_v50, 0.0  ;;  %v1357_v45 = vrot.slane %v1235_v29, 1 }
 0x168   : > { %v4988_v15 = vmul.f32 %v4006_v43, %v1144_v36  ;;  %v4991_v12 = vmul.f32 %v4011_v41, %v1144_v36  ;;  %v1599_v1 = vrot.slane %v1477_v61, 2  ;;  %v1869_v25 = vsel %vm1293_vm3, %v1867_v3, %v1868_v39 }
 0x169   : > { %3466 = vmatmul.msk.f32.gmra.mxu1 %vm2881_vm6, %v2850_v8  ;;  %v2108_v8 = vrot.slane %v2002_v2, 2  ;;  %v2109_v5 = vrot.slane %v2003_v62, 2  ;;  %v1964_v35 = vadd.f32 %v1869_v25, %v1723_v53  ;;  %v2238_v56 = vmul.f32 %v4040_v14, %v4845_v60  ;;  %v347_v2 = vld [vmem:[%s3778_s21 + $0x1a0] sm:$0xff] }
 0x16a   : > { %6444 = vst [vmem:[#allocation80_spill] sm:$0xff] %v4988_v15  ;;  %v2308_v46 = vmul.f32 %v4006_v43, %v4845_v60  ;;  %v2309_v42 = vmul.f32 %v4006_v43, %v4009_v24  ;;  %v2851_v29 = vmin.f32 %v2819_v38, 6.0  ;;  %v2549_v36 = vmul.f32 %v4011_v41, %v4845_v60  ;;  %3456 = vmatmul.msk.f32.gmra.mxu3 %vm354_vm1, %v347_v2 }
 0x16b   : > { %6445 = vst [vmem:[#allocation81_spill] sm:$0xff] %v4991_v12  ;;  %v2110_v50 = vsel %vm1535_vm5, %v2108_v8, %v2109_v5  ;;  %v2550_v61 = vmul.f32 %v4011_v41, %v4009_v24  ;;  %v656_v25 = vadd.f32 %v4624_v7, %v655_v58  ;;  %v1692_v8 = vmul.f32 %v3959_v32, %v4739_v54 }
 0x16c   : > { %v2205_v62 = vadd.f32 %v2110_v50, %v1964_v35  ;;  %v2414_v53 = vrot.slane %v2308_v46, 1  ;;  %v2415_v3 = vrot.slane %v2309_v42, 1  ;;  %v2655_v12 = vrot.slane %v2549_v36, 2 }
 0x16d   : > { %v2656_v38 = vrot.slane %v2550_v61, 2  ;;  %v739_v55 = vmax.f32 %v656_v25, 0.0  ;;  %v6446_v27 = vrot.slane %v4780_v26, 1  ;;  %v1724_v42 = vadd.f32 %v1692_v8, %v4684_v63  ;;  %v5030_v63 = vld [vmem:[%s6207_s6] ss:$0 sm:$0xff] }
 0x16e   : > { %v2270_v37 = vadd.f32 %v2238_v56, %v2205_v62  ;;  %v2416_v9 = vsel %vm1293_vm3, %v2414_v53, %v2415_v3  ;;  %v6447_v50 = vrot.slane %v4096_v20, 1  ;;  %v658_v56 = vpop.f32.mrf.mxu2  ;;  %v6448_v36 = vrot.slane %v4946_v4, 1 }
 0x16f   : > { %v1871_v35 = vsel %vm1293_vm3, %v1868_v39, %v6446_v27  ;;  %v2657_v27 = vsel %vm1535_vm5, %v2655_v12, %v2656_v38  ;;  %v6449_v39 = vld [vmem:[#allocation33_spill] sm:$0xff]  ;;  %v793_v2 = vmin.f32 %v739_v55, 6.0  ;;  %v1176_v20 = vmul.f32 %v3922_v47, %v4698_v30 }
 0x170   : > { %v2418_v54 = vsel %vm1293_vm3, %v2415_v3, %v6447_v50  ;;  %v1358_v61 = vsel %vm1293_vm3, %v6448_v36, %v1357_v45  ;;  %v2511_v26 = vadd.f32 %v2416_v9, %v2270_v37  ;;  %v1965_v62 = vadd.f32 %v1871_v35, %v1724_v42  ;;  %v2995_v35 = vpop.f32.mrf.mxu1 }
 0x171   : > { %3467 = vmatmul.msk.f32.gmra.mxu1 %vm2881_vm6, %v2851_v29  ;;  %v2658_v29 = vrot.slane %v6449_v39, 2  ;;  %v6450_v53 = vrot.slane %v4757_v28, 1  ;;  %v6451_v3 = vrot.slane %v4730_v22, 1  ;;  %v6452_v37 = vrot.slane %v4950_v59, 2 }
 0x172   : > { %v2752_v55 = vadd.f32 %v2657_v27, %v2511_v26  ;;  %v6453_v12 = vrot.slane %v4793_v23, 2  ;;  %v2239_v28 = vmul.f32 %v4040_v14, %v4009_v24  ;;  %v659_v22 = vadd.f32 %v4624_v7, %v658_v56 }
 0x173   : > { %v1326_v9 = vsel %vm1293_vm3, %v6451_v3, %v6450_v53  ;;  %v1600_v45 = vsel %vm1535_vm5, %v6452_v37, %v1599_v1  ;;  %v2659_v8 = vsel %vm1535_vm5, %v2656_v38, %v2658_v29  ;;  %v1431_v50 = vadd.f32 %v1358_v61, %v4969_v0  ;;  %v348_v0 = vld [vmem:[%s3778_s21 + $0x1a8] sm:$0xff] }
 0x174   : > { %v2112_v25 = vsel %vm1535_vm5, %v2109_v5, %v6453_v12  ;;  %v1418_v42 = vadd.f32 %v1326_v9, %v1176_v20  ;;  %v2788_v1 = vadd.f32 %v4940_v6, %v2752_v55  ;;  %v6454_v36 = vrot.slane %v4767_v52, 2  ;;  %3457 = vmatmul.msk.f32.gmra.mxu3 %vm354_vm1, %v348_v0 }
 0x175   : > { %v2206_v30 = vadd.f32 %v2112_v25, %v1965_v62  ;;  %v6455_v23 = vrot.slane %v4736_v57, 2  ;;  %v1693_v38 = vmul.f32 %v3959_v32, %v4845_v60  ;;  %v5060_v26 = vsel %vm884_vm2, %v793_v2, 0.0 }
 0x176   : > { %6456 = vst [vmem:[#allocation33_spill] sm:$0xff] %v5060_v26  ;;  %v2996_v56 = vadd.f32 %v5030_v63, %v2995_v35  ;;  %v2820_v61 = vmax.f32 %v2788_v1, 0.0  ;;  %v1764_v52 = vmul.f32 %v3961_v33, %v4845_v60  ;;  %v1765_v57 = vmul.f32 %v3961_v33, %v4009_v24  ;;  %v6457_v35 = vld [vmem:[#allocation34_spill] sm:$0xff]  ;;  %v661_v1 = vpop.f32.mrf.mxu2 }
 0x177   : > { %v1568_v5 = vsel %vm1535_vm5, %v6455_v23, %v6454_v36  ;;  %v2271_v27 = vadd.f32 %v2239_v28, %v2206_v30  ;;  %v2005_v29 = vmul.f32 %v3966_v40, %v4845_v60  ;;  %v740_v2 = vmax.f32 %v659_v22, 0.0  ;;  %v6458_v28 = vld [vmem:[#allocation37_spill] sm:$0xff]  ;;  %v6459_v23 = vld [vmem:[#allocation8_spill] sm:$0xff] }
 0x178   : > { %v1660_v39 = vadd.f32 %v1568_v5, %v1418_v42  ;;  %v2006_v53 = vmul.f32 %v3966_v40, %v4009_v24  ;;  %v2852_v3 = vmin.f32 %v2820_v61, 6.0  ;;  %v1872_v9 = vrot.slane %v1764_v52, 1  ;;  %v6461_v5 = vld [vmem:[#allocation6_spill] sm:$0xff] }
 0x179   : > { %v2512_v62 = vadd.f32 %v2418_v54, %v2271_v27  ;;  %v1873_v37 = vrot.slane %v1765_v57, 1  ;;  %v2113_v55 = vrot.slane %v2005_v29, 2  ;;  %v2311_v30 = vmul.f32 %v4006_v43, %v6457_v35 }
 0x17a   : > { %v1725_v20 = vadd.f32 %v1693_v38, %v1660_v39  ;;  %v2114_v25 = vrot.slane %v2006_v53, 2  ;;  %v2312_v42 = vmul.f32 %v4006_v43, %v6458_v28  ;;  %3468 = vmatmul.msk.f32.gmra.mxu1 %vm2881_vm6, %v2852_v3  ;;  %v2552_v22 = vmul.f32 %v4011_v41, %v6457_v35  ;;  %v2998_v3 = vpop.f32.mrf.mxu1 }
 0x17b   : > { %v2753_v12 = vadd.f32 %v2659_v8, %v2512_v62  ;;  %v1874_v54 = vsel %vm1293_vm3, %v1872_v9, %v1873_v37  ;;  %v2553_v36 = vmul.f32 %v4011_v41, %v6458_v28  ;;  %v6460_v8 = vrot.slane %v6459_v23, 1 }
 0x17c   : > { %v6462_v38 = vrot.slane %v6461_v5, 1  ;;  %v1966_v0 = vadd.f32 %v1874_v54, %v1725_v20  ;;  %v2115_v61 = vsel %vm1535_vm5, %v2113_v55, %v2114_v25  ;;  %v2419_v52 = vrot.slane %v2311_v30, 1 }
 0x17d   : > { %v2789_v39 = vadd.f32 %v4940_v6, %v2753_v12  ;;  %v2420_v57 = vrot.slane %v2312_v42, 1  ;;  %v2660_v29 = vrot.slane %v2552_v22, 2  ;;  %v2661_v62 = vrot.slane %v2553_v36, 2  ;;  %v6466_v22 = vld [vmem:[#allocation31_spill] sm:$0xff] }
 0x17e   : > { %v3093_v27 = vsel %vm1293_vm3, %v6462_v38, %v6460_v8  ;;  %v2207_v46 = vadd.f32 %v2115_v61, %v1966_v0  ;;  %v2240_v58 = vmul.f32 %v4040_v14, %v6457_v35  ;;  %v662_v5 = vadd.f32 %v4624_v7, %v661_v1  ;;  %v6472_v61 = vld [vmem:[#allocation43_spill] sm:$0xff] }
 0x17f   : > { %v3203_v53 = vadd.f32 %v3093_v27, %v2996_v56  ;;  %v2821_v9 = vmax.f32 %v2789_v39, 0.0  ;;  %v5093_v11 = vadd.f32 %v1600_v45, %v1431_v50  ;;  %v5097_v20 = vmul.f32 %v3916_v44, %v5060_v26 }
 0x180   : > { %v2421_v55 = vsel %vm1293_vm3, %v2419_v52, %v2420_v57  ;;  %v2662_v12 = vsel %vm1535_vm5, %v2660_v29, %v2661_v62  ;;  %v5101_v56 = vmin.f32 %v740_v2, 6.0  ;;  %v2272_v30 = vadd.f32 %v2240_v58, %v2207_v46  ;;  %v6469_v46 = vld [vmem:[#allocation32_spill] sm:$0xff]  ;;  %v6474_v29 = vld [vmem:[#allocation9_spill] sm:$0xff] }
 0x181   : > { %6463 = vst [vmem:[#allocation34_spill] sm:$0xff] %v5093_v11  ;;  %3235 = vxpose.xlu0.b32.start [1/16] (narrow) %v3203_v53, 8  ;;  %v741_v42 = vmax.f32 %v662_v5, 0.0  ;;  %v2999_v54 = vadd.f32 %v5030_v63, %v2998_v3  ;;  %v5106_v1 = vmul.f32 %v3925_v49, %v5060_v26  ;;  %v2853_v45 = vmin.f32 %v2821_v9, 6.0  ;;  %v6494_v11 = vld [vmem:[#allocation73_spill] sm:$0xff] }
 0x182   : > { %6464 = vst [vmem:[#allocation37_spill] sm:$0xff] %v5097_v20  ;;  %v1694_v50 = vmul.f32 %v3959_v32, %v4009_v24  ;;  %v6467_v36 = vrot.slane %v6466_v22, 1  ;;  %v2513_v38 = vadd.f32 %v2421_v55, %v2272_v30  ;;  %v5115_v58 = vmul.f32 %v3916_v44, %v5101_v56  ;;  %v6477_v55 = vld [vmem:[#allocation44_spill] sm:$0xff] }
 0x183   : > { %6465 = vst [vmem:[#allocation8_spill] sm:$0xff] %v5106_v1  ;;  %v795_v27 = vmin.f32 %v741_v42, 6.0  ;;  %v6470_v2 = vrot.slane %v6469_v46, 2  ;;  %3469 = vmatmul.msk.f32.gmra.mxu1 %vm2881_vm6, %v2853_v45  ;;  %v5123_v0 = vmul.f32 %v3925_v49, %v5101_v56  ;;  %v6475_v53 = vrot.slane %v6474_v29, 1  ;;  %v664_v45 = vpop.f32.mrf.mxu2  ;;  %v6493_v20 = vld [vmem:[#allocation68_spill] sm:$0xff] }
 0x184   : > { %v1876_v8 = vsel %vm1293_vm3, %v1873_v37, %v6467_v36  ;;  %6468 = vst [vmem:[#allocation6_spill] sm:$0xff] %v5115_v58  ;;  %v1726_v24 = vadd.f32 %v1694_v50, %v4866_v17  ;;  %v6473_v37 = vrot.slane %v6472_v61, 1  ;;  %v6476_v3 = vrot.slane %v6459_v23, 1 }
 0x185   : > { %v2117_v39 = vsel %vm1535_vm5, %v2114_v25, %v6470_v2  ;;  %6471 = vst [vmem:[#allocation31_spill] sm:$0xff] %v5123_v0  ;;  %v2754_v5 = vadd.f32 %v2662_v12, %v2513_v38  ;;  %v1147_v25 = vsel %vm943_vm4, %v795_v27, 0.0  ;;  %v2663_v30 = vrot.slane %v6477_v55, 2 }
 0x186   : > { %v2423_v52 = vsel %vm1293_vm3, %v2420_v57, %v6473_v37  ;;  %v3095_v9 = vsel %vm1293_vm3, %v6476_v3, %v6475_v53  ;;  %v1238_v57 = vmul.f32 %v3916_v44, %v1147_v25  ;;  %v665_v22 = vadd.f32 %v4624_v7, %v664_v45  ;;  %v6478_v45 = vld [vmem:[#allocation28_spill] sm:$0xff] }
 0x187   : > { %v3204_v42 = vadd.f32 %v3095_v9, %v2999_v54  ;;  %v2790_v23 = vadd.f32 %v4940_v6, %v2754_v5  ;;  %v1191_v12 = vmul.f32 %v3922_v47, %v5101_v56  ;;  %v1480_v36 = vmul.f32 %v3925_v49, %v1147_v25 }
 0x188   : > { %v1967_v38 = vadd.f32 %v1876_v8, %v1726_v24  ;;  %v6297_v27 = vrot.slane %v5115_v58, 1  ;;  %v1362_v54 = vrot.slane %v1238_v57, 1  ;;  %v6296_v46 = vrot.slane %v5123_v0, 2 }
 0x189   : > { %v2241_v2 = vmul.f32 %v4040_v14, %v6458_v28  ;;  %3236 = vxpose.xlu0.b32.cont [2/16] (narrow) %v3204_v42, 8  ;;  %v2822_v61 = vmax.f32 %v2790_v23, 0.0  ;;  %v5150_v37 = vmul.f32 %v3961_v33, %v1147_v25  ;;  %v2664_v53 = vsel %vm1535_vm5, %v2661_v62, %v2663_v30 }
 0x18a   : > { %v2208_v29 = vadd.f32 %v2117_v39, %v1967_v38  ;;  %v5154_v3 = vmul.f32 %v3966_v40, %v1147_v25  ;;  %v5157_v8 = vmul.f32 %v4006_v43, %v1147_v25  ;;  %v742_v24 = vmax.f32 %v665_v22, 0.0 }
 0x18b   : > { %v1178_v9 = vmul.f32 %v3922_v47, %v4845_v60  ;;  %v2854_v5 = vmin.f32 %v2822_v61, 6.0  ;;  %v1604_v55 = vrot.slane %v1480_v36, 2  ;;  %v6479_v57 = vrot.slane %v6478_v45, 1  ;;  %v6481_v36 = vld [vmem:[#allocation29_spill] sm:$0xff] }
 0x18c   : > { %v2273_v42 = vadd.f32 %v2241_v2, %v2208_v29  ;;  %v6480_v23 = vrot.slane %v4851_v19, 1  ;;  %v1363_v62 = vsel %vm1293_vm3, %v6297_v27, %v1362_v54  ;;  %v5170_v30 = vmul.f32 %v4011_v41, %v1147_v25  ;;  %v6491_v27 = vld [vmem:[#allocation69_spill] sm:$0xff] }
 0x18d   : > { %v796_v22 = vmin.f32 %v742_v24, 6.0  ;;  %3470 = vmatmul.msk.f32.gmra.mxu1 %vm2881_vm6, %v2854_v5  ;;  %v6482_v2 = vrot.slane %v6481_v36, 2  ;;  %v6483_v61 = vrot.slane %v4875_v16, 2  ;;  %v1767_v29 = vmul.f32 %v3961_v33, %v6457_v35 }
 0x18e   : > { %v1331_v39 = vsel %vm1293_vm3, %v6480_v23, %v6479_v57  ;;  %v2514_v60 = vadd.f32 %v2423_v52, %v2273_v42  ;;  %v5182_v54 = vmul.f32 %v3961_v33, %v6458_v28  ;;  %v1695_v24 = vmul.f32 %v3959_v32, %v6457_v35 }
 0x18f   : > { %v1420_v38 = vadd.f32 %v1331_v39, %v1178_v9  ;;  %v1573_v19 = vsel %vm1535_vm5, %v6483_v61, %v6482_v2  ;;  %v2008_v52 = vmul.f32 %v3966_v40, %v6457_v35  ;;  %v5190_v9 = vmul.f32 %v3966_v40, %v6458_v28 }
 0x190   : > { %v1605_v16 = vsel %vm1535_vm5, %v6296_v46, %v1604_v55  ;;  %v2755_v5 = vadd.f32 %v2664_v53, %v2514_v60  ;;  %v5197_v42 = vsel %vm884_vm2, %v796_v22, 0.0  ;;  %v1877_v45 = vrot.slane %v1767_v29, 1  ;;  %v6487_v60 = vld [vmem:[#allocation45_spill] sm:$0xff]  ;;  %v6489_v46 = vld [vmem:[#allocation72_spill] sm:$0xff] }
 0x191   : > { %v1662_v25 = vadd.f32 %v1573_v19, %v1420_v38  ;;  %6484 = vst [vmem:[#allocation32_spill] sm:$0xff] %v5197_v42  ;;  %v6299_v23 = vrot.slane %v5182_v54, 1  ;;  %v2118_v39 = vrot.slane %v2008_v52, 2  ;;  %v6298_v38 = vrot.slane %v5190_v9, 2 }
 0x192   : > { %v1433_v36 = vadd.f32 %v1363_v62, %v1191_v12  ;;  %v2791_v2 = vadd.f32 %v4940_v6, %v2755_v5  ;;  %v5204_v61 = vmul.f32 %v3916_v44, %v5197_v42  ;;  %v5208_v53 = vmul.f32 %v3925_v49, %v5197_v42  ;;  %v6488_v62 = vld [vmem:[#allocation48_spill] sm:$0xff]  ;;  %v670_v5 = vpop.f32.mrf.mxu3  ;;  %v6496_v42 = vld [vmem:[#allocation70_spill] sm:$0xff] }
 0x193   : > { %v1727_v57 = vadd.f32 %v1695_v24, %v1662_v25  ;;  %v1879_v55 = vsel %vm1293_vm3, %v1877_v45, %v6299_v23  ;;  %v2120_v22 = vsel %vm1535_vm5, %v2118_v39, %v6298_v38  ;;  %v2314_v12 = vmul.f32 %v4006_v43, %v6487_v60 }
 0x194   : > { %6485 = vst [vmem:[#allocation43_spill] sm:$0xff] %v5204_v61  ;;  %v5220_v19 = vmul.f32 %v4006_v43, %v6488_v62  ;;  %v2823_v29 = vmax.f32 %v2791_v2, 0.0  ;;  %v2555_v24 = vmul.f32 %v4011_v41, %v6487_v60  ;;  %v5226_v52 = vmul.f32 %v4011_v41, %v6488_v62  ;;  %v6504_v61 = vld [vmem:[#allocation40_spill] sm:$0xff] }
 0x195   : > { %6486 = vst [vmem:[#allocation9_spill] sm:$0xff] %v5208_v53  ;;  %v1968_v25 = vadd.f32 %v1879_v55, %v1727_v57  ;;  %v2242_v45 = vmul.f32 %v4040_v14, %v6487_v60  ;;  %v2424_v39 = vrot.slane %v2314_v12, 1  ;;  %v671_v50 = vadd.f32 %v4624_v7, %v670_v5 }
 0x196   : > { %v6490_v17 = vrot.slane %v6489_v46, 1  ;;  %v6492_v38 = vrot.slane %v6491_v27, 1  ;;  %v2855_v2 = vmin.f32 %v2823_v29, 6.0  ;;  %v6308_v23 = vrot.slane %v5220_v19, 1 }
 0x197   : > { %v2209_v55 = vadd.f32 %v2120_v22, %v1968_v25  ;;  %v2665_v15 = vrot.slane %v2555_v24, 2  ;;  %v6307_v1 = vrot.slane %v5226_v52, 2  ;;  %v744_v0 = vmax.f32 %v671_v50, 0.0 }
 0x198   : > { %v1351_v57 = vsel %vm1293_vm3, %v6492_v38, %v6490_v17  ;;  %v6495_v12 = vrot.slane %v6494_v11, 2  ;;  %v6497_v5 = vrot.slane %v6496_v42, 2  ;;  %3471 = vmatmul.msk.f32.gmra.mxu1 %vm2881_vm6, %v2855_v2  ;;  %v2426_v17 = vsel %vm1293_vm3, %v2424_v39, %v6308_v23 }
 0x199   : > { %v1428_v58 = vadd.f32 %v1351_v57, %v6493_v20  ;;  %v2274_v27 = vadd.f32 %v2242_v45, %v2209_v55  ;;  %v1703_v38 = vmul.f32 %v3959_v32, %v4880_v10  ;;  %v5252_v50 = vmul.f32 %v3961_v33, %v4930_v31 }
 0x19a   : > { %v1593_v46 = vsel %vm1535_vm5, %v6497_v5, %v6495_v12  ;;  %v798_v20 = vmin.f32 %v744_v0, 6.0  ;;  %v1897_v42 = vrot.slane %v4925_v21, 1  ;;  %v2020_v22 = vmul.f32 %v3966_v40, %v4880_v10 }
 0x19b   : > { %v1670_v11 = vadd.f32 %v1593_v46, %v1428_v58  ;;  %v2515_v24 = vadd.f32 %v2426_v17, %v2274_v27  ;;  %v1898_v45 = vrot.slane %v5252_v50, 1  ;;  %v2667_v57 = vsel %vm1535_vm5, %v2665_v15, %v6307_v1 }
 0x19c   : > { %v5266_v21 = vmul.f32 %v3966_v40, %v4930_v31  ;;  %v5268_v58 = vadd.f32 %v1605_v16, %v1433_v36  ;;  %v2326_v12 = vmul.f32 %v4006_v43, %v5060_v26  ;;  %v1150_v46 = vsel %vm943_vm4, %v798_v20, 0.0 }
 0x19d   : > { %v1735_v0 = vadd.f32 %v1703_v38, %v1670_v11  ;;  %v2756_v55 = vadd.f32 %v2667_v57, %v2515_v24  ;;  %v1899_v15 = vsel %vm1293_vm3, %v1897_v42, %v1898_v45  ;;  %v2138_v27 = vrot.slane %v2020_v22, 2  ;;  %v3001_v22 = vpop.f32.mrf.mxu1 }
 0x19e   : > { %6498 = vst [vmem:[#allocation44_spill] sm:$0xff] %v5268_v58  ;;  %v5279_v38 = vmul.f32 %v3916_v44, %v1150_v46  ;;  %v5282_v16 = vmul.f32 %v3925_v49, %v1150_v46  ;;  %v2250_v36 = vmul.f32 %v4040_v14, %v5060_v26  ;;  %v5287_v50 = vmul.f32 %v3961_v33, %v1150_v46 }
 0x19f   : > { %v2792_v17 = vadd.f32 %v4940_v6, %v2756_v55  ;;  %v5290_v11 = vmul.f32 %v3966_v40, %v1150_v46  ;;  %v1976_v20 = vadd.f32 %v1899_v15, %v1735_v0  ;;  %v2139_v42 = vrot.slane %v5266_v21, 2  ;;  %v667_v21 = vpop.f32.mrf.mxu2 }
 0x1a0   : > { %6499 = vst [vmem:[#allocation28_spill] sm:$0xff] %v5279_v38  ;;  %v2327_v57 = vmul.f32 %v4006_v43, %v5101_v56  ;;  %v2444_v55 = vrot.slane %v2326_v12, 1  ;;  %v2567_v5 = vmul.f32 %v4011_v41, %v5060_v26  ;;  %v5298_v2 = vmul.f32 %v4006_v43, %v1150_v46 }
 0x1a1   : > { %6500 = vst [vmem:[#allocation29_spill] sm:$0xff] %v5282_v16  ;;  %v2824_v24 = vmax.f32 %v2792_v17, 0.0  ;;  %v5301_v25 = vmul.f32 %v4011_v41, %v1150_v46  ;;  %v2140_v29 = vsel %vm1535_vm5, %v2138_v27, %v2139_v42  ;;  %v2568_v0 = vmul.f32 %v4011_v41, %v5101_v56 }
 0x1a2   : > { %6501 = vst [vmem:[#allocation45_spill] sm:$0xff] %v5287_v50  ;;  %v2217_v17 = vadd.f32 %v2140_v29, %v1976_v20  ;;  %v2445_v39 = vrot.slane %v2327_v57, 1  ;;  %v2685_v1 = vrot.slane %v2567_v5, 2  ;;  %v3002_v23 = vadd.f32 %v5030_v63, %v3001_v22  ;;  %v6507_v5 = vld [vmem:[#allocation42_spill] sm:$0xff] }
 0x1a3   : > { %6502 = vst [vmem:[#allocation48_spill] sm:$0xff] %v5290_v11  ;;  %v2856_v15 = vmin.f32 %v2824_v24, 6.0  ;;  %v2686_v12 = vrot.slane %v2568_v0, 2  ;;  %v1696_v53 = vmul.f32 %v3959_v32, %v6458_v28  ;;  %v6505_v58 = vrot.slane %v6504_v61, 1  ;;  %v6510_v57 = vld [vmem:[#allocation30_spill] sm:$0xff] }
 0x1a4   : > { %6503 = vst [vmem:[#allocation72_spill] sm:$0xff] %v5301_v25  ;;  %v6506_v46 = vrot.slane %v5182_v54, 1  ;;  %v2282_v25 = vadd.f32 %v2250_v36, %v2217_v17  ;;  %v2446_v24 = vsel %vm1293_vm3, %v2444_v55, %v2445_v39  ;;  %v5317_v29 = vadd.f32 %v4624_v7, %v667_v21  ;;  %v673_v36 = vpop.f32.mrf.mxu3  ;;  %v6511_v7 = vld [vmem:[#allocation54_spill] sm:$0xff]  ;;  %v6512_v17 = vld [vmem:[#allocation11_spill] sm:$0xff] }
 0x1a5   : > { %3472 = vmatmul.msk.f32.gmra.mxu1 %vm2881_vm6, %v2856_v15  ;;  %v6508_v20 = vrot.slane %v6507_v5, 2  ;;  %v6509_v22 = vrot.slane %v5190_v9, 2  ;;  %v1728_v0 = vadd.f32 %v1696_v53, %v6510_v57  ;;  %v2668_v21 = vrot.slane %v6511_v7, 2  ;;  %v6514_v5 = vld [vmem:[#allocation10_spill] sm:$0xff] }
 0x1a6   : > { %v1881_v27 = vsel %vm1293_vm3, %v6506_v46, %v6505_v58  ;;  %v2687_v58 = vsel %vm1535_vm5, %v2685_v1, %v2686_v12  ;;  %v2523_v15 = vadd.f32 %v2446_v24, %v2282_v25  ;;  %v6513_v46 = vrot.slane %v6512_v17, 1  ;;  %v6516_v25 = vld [vmem:[#allocation53_spill] sm:$0xff]  ;;  %v6564_v50 = vld [vmem:[#allocation14_spill] sm:$0xff] }
 0x1a7   : > { %v2122_v28 = vsel %vm1535_vm5, %v6509_v22, %v6508_v20  ;;  %v6515_v9 = vrot.slane %v6514_v5, 1  ;;  %v1969_v22 = vadd.f32 %v1881_v27, %v1728_v0  ;;  %v2243_v54 = vmul.f32 %v4040_v14, %v6488_v62 }
 0x1a8   : > { %v1704_v1 = vmul.f32 %v3959_v32, %v4930_v31  ;;  %v2764_v53 = vadd.f32 %v2687_v58, %v2523_v15  ;;  %v743_v57 = vmax.f32 %v5317_v29, 0.0  ;;  %v6517_v24 = vrot.slane %v6516_v25, 1  ;;  %v5354_v58 = vld [vmem:[%s6203_s2] ss:$0 sm:$0xff] }
 0x1a9   : > { %v3098_v20 = vsel %vm1293_vm3, %v6515_v9, %v6513_v46  ;;  %v6518_v7 = vrot.slane %v5220_v19, 1  ;;  %v6519_v5 = vrot.slane %v4982_v34, 1  ;;  %v2210_v0 = vadd.f32 %v2122_v28, %v1969_v22  ;;  %v3004_v9 = vpop.f32.mrf.mxu1  ;;  %v6522_v22 = vld [vmem:[#allocation38_spill] sm:$0xff] }
 0x1aa   : > { %v3205_v61 = vadd.f32 %v3098_v20, %v3002_v23  ;;  %v6520_v46 = vrot.slane %v5226_v52, 2  ;;  %v5357_v15 = vadd.f32 %v5354_v58, %v673_v36  ;;  %v1736_v19 = vadd.f32 %v1704_v1, %v4870_v13  ;;  %v6524_v13 = vld [vmem:[#allocation35_spill] sm:$0xff] }
 0x1ab   : > { %v2428_v55 = vsel %vm1293_vm3, %v6518_v7, %v6517_v24  ;;  %v1901_v27 = vsel %vm1293_vm3, %v1898_v45, %v6519_v5  ;;  %v2800_v34 = vadd.f32 %v4940_v6, %v2764_v53  ;;  %v6521_v45 = vrot.slane %v4985_v18, 2  ;;  %v6527_v5 = vld [vmem:[#allocation39_spill] sm:$0xff] }
 0x1ac   : > { %v2669_v23 = vsel %vm1535_vm5, %v6520_v46, %v2668_v21  ;;  %3237 = vxpose.xlu0.b32.cont [3/16] (narrow) %v3205_v61, 8  ;;  %v2251_v28 = vmul.f32 %v4040_v14, %v5101_v56  ;;  %v2688_v61 = vrot.slane %v5170_v30, 2  ;;  %v2275_v21 = vadd.f32 %v2243_v54, %v2210_v0  ;;  %v6529_v54 = vld [vmem:[#allocation36_spill] sm:$0xff] }
 0x1ad   : > { %v2142_v52 = vsel %vm1535_vm5, %v2139_v42, %v6521_v45  ;;  %v1977_v20 = vadd.f32 %v1901_v27, %v1736_v19  ;;  %v1180_v36 = vmul.f32 %v3922_v47, %v6457_v35  ;;  %v6523_v25 = vrot.slane %v6522_v22, 1 }
 0x1ae   : > { %v6525_v1 = vrot.slane %v6524_v13, 1  ;;  %v2832_v24 = vmax.f32 %v2800_v34, 0.0  ;;  %v6526_v18 = vrot.slane %v5157_v8, 1  ;;  %v3005_v7 = vadd.f32 %v5030_v63, %v3004_v9 }
 0x1af   : > { %v6528_v30 = vrot.slane %v6527_v5, 2  ;;  %v6530_v27 = vrot.slane %v6529_v54, 2  ;;  %v2516_v35 = vadd.f32 %v2428_v55, %v2275_v21  ;;  %v2218_v46 = vadd.f32 %v2142_v52, %v1977_v20  ;;  %v676_v52 = vpop.f32.mrf.mxu3  ;;  %v6531_v20 = vld [vmem:[#allocation55_spill] sm:$0xff] }
 0x1b0   : > { %v1336_v53 = vsel %vm1293_vm3, %v6525_v1, %v6523_v25  ;;  %v2448_v42 = vsel %vm1293_vm3, %v2445_v39, %v6526_v18  ;;  %v2689_v19 = vsel %vm1535_vm5, %v2686_v12, %v2688_v61  ;;  %v2864_v22 = vmin.f32 %v2832_v24, 6.0 }
 0x1b1   : > { %v1578_v0 = vsel %vm1535_vm5, %v6530_v27, %v6528_v30  ;;  %v1422_v45 = vadd.f32 %v1336_v53, %v1180_v36  ;;  %v1697_v34 = vmul.f32 %v3959_v32, %v6487_v60  ;;  %v1770_v8 = vmul.f32 %v3961_v33, %v6487_v60  ;;  %v6532_v30 = vld [vmem:[#allocation59_spill] sm:$0xff] }
 0x1b2   : > { %v1771_v39 = vmul.f32 %v3961_v33, %v6488_v62  ;;  %v2757_v9 = vadd.f32 %v2669_v23, %v2516_v35  ;;  %v2283_v25 = vadd.f32 %v2251_v28, %v2218_v46  ;;  %v2011_v55 = vmul.f32 %v3966_v40, %v6487_v60  ;;  %3480 = vmatmul.msk.f32.vlgmr.msrb.gmra.mxu3 %vm2881_vm6, %v2864_v22 }
 0x1b3   : > { %v1664_v13 = vadd.f32 %v1578_v0, %v1422_v45  ;;  %v1882_v12 = vrot.slane %v1770_v8, 1  ;;  %v2012_v21 = vmul.f32 %v3966_v40, %v6488_v62  ;;  %v2244_v36 = vmul.f32 %v4040_v14, %v6531_v20 }
 0x1b4   : > { %v1883_v61 = vrot.slane %v1771_v39, 1  ;;  %v2793_v1 = vadd.f32 %v4940_v6, %v2757_v9  ;;  %v2524_v53 = vadd.f32 %v2448_v42, %v2283_v25  ;;  %v2123_v28 = vrot.slane %v2011_v55, 2 }
 0x1b5   : > { %v1729_v23 = vadd.f32 %v1697_v34, %v1664_v13  ;;  %v2124_v18 = vrot.slane %v2012_v21, 2  ;;  %v2317_v5 = vmul.f32 %v4006_v43, %v6531_v20  ;;  %v2318_v54 = vmul.f32 %v4006_v43, %v6532_v30 }
 0x1b6   : > { %v1884_v24 = vsel %vm1293_vm3, %v1882_v12, %v1883_v61  ;;  %v2825_v27 = vmax.f32 %v2793_v1, 0.0  ;;  %v2765_v0 = vadd.f32 %v2689_v19, %v2524_v53  ;;  %v2558_v46 = vmul.f32 %v4011_v41, %v6531_v20  ;;  %v6533_v19 = vld [vmem:[#allocation12_spill] sm:$0xff] }
 0x1b7   : > { %v1970_v35 = vadd.f32 %v1884_v24, %v1729_v23  ;;  %v2125_v45 = vsel %vm1535_vm5, %v2123_v28, %v2124_v18  ;;  %v2429_v42 = vrot.slane %v2317_v5, 1  ;;  %v2430_v22 = vrot.slane %v2318_v54, 1 }
 0x1b8   : > { %v2559_v34 = vmul.f32 %v4011_v41, %v6532_v30  ;;  %v2857_v8 = vmin.f32 %v2825_v27, 6.0  ;;  %v2801_v39 = vadd.f32 %v4940_v6, %v2765_v0  ;;  %v2670_v25 = vrot.slane %v2558_v46, 2 }
 0x1b9   : > { %v2211_v9 = vadd.f32 %v2125_v45, %v1970_v35  ;;  %v2431_v13 = vsel %vm1293_vm3, %v2429_v42, %v2430_v22  ;;  %v6534_v12 = vrot.slane %v6533_v19, 1  ;;  %v6535_v21 = vrot.slane %v6512_v17, 1  ;;  %v6536_v35 = vld [vmem:[#allocation51_spill] sm:$0xff]  ;;  %v6543_v19 = vld [vmem:[#allocation66_spill] sm:$0xff] }
 0x1ba   : > { %v2671_v55 = vrot.slane %v2559_v34, 2  ;;  %v677_v53 = vadd.f32 %v5354_v58, %v676_v52  ;;  %3473 = vmatmul.msk.f32.gmra.mxu1 %vm2881_vm6, %v2857_v8  ;;  %v2833_v23 = vmax.f32 %v2801_v39, 0.0  ;;  %v1698_v5 = vmul.f32 %v3959_v32, %v6488_v62  ;;  %v6538_v52 = vld [vmem:[#allocation41_spill] sm:$0xff]  ;;  %v6539_v8 = vld [vmem:[#allocation52_spill] sm:$0xff]  ;;  %v679_v39 = vpop.f32.mrf.mxu3 }
 0x1bb   : > { %v3100_v1 = vsel %vm1293_vm3, %v6535_v21, %v6534_v12  ;;  %v2276_v28 = vadd.f32 %v2244_v36, %v2211_v9  ;;  %v745_v54 = vmax.f32 %v5357_v15, 0.0  ;;  %v6537_v46 = vrot.slane %v6536_v35, 1  ;;  %v6541_v15 = vld [vmem:[#allocation65_spill] sm:$0xff] }
 0x1bc   : > { %v3206_v24 = vadd.f32 %v3100_v1, %v3005_v7  ;;  %v2672_v27 = vsel %vm1535_vm5, %v2670_v25, %v2671_v55  ;;  %v746_v0 = vmax.f32 %v677_v53, 0.0  ;;  %v2865_v45 = vmin.f32 %v2833_v23, 6.0  ;;  %v6545_v53 = vld [vmem:[#allocation78_spill] sm:$0xff] }
 0x1bd   : > { %v1886_v17 = vsel %vm1293_vm3, %v1883_v61, %v6537_v46  ;;  %v2517_v42 = vadd.f32 %v2431_v13, %v2276_v28  ;;  %v1730_v34 = vadd.f32 %v1698_v5, %v6538_v52  ;;  %v6540_v36 = vrot.slane %v6539_v8, 2  ;;  %v6549_v8 = vld [vmem:[#allocation79_spill] sm:$0xff] }
 0x1be   : > { %3238 = vxpose.xlu0.b32.cont [4/16] (narrow) %v3206_v24, 8  ;;  %v2245_v62 = vmul.f32 %v4040_v14, %v6532_v30  ;;  %v6542_v9 = vrot.slane %v6541_v15, 1  ;;  %v2673_v12 = vrot.slane %v6543_v19, 2  ;;  %v680_v61 = vadd.f32 %v5354_v58, %v679_v39  ;;  %3481 = vmatmul.msk.f32.gmra.mxu3 %vm2881_vm6, %v2865_v45 }
 0x1bf   : > { %v2127_v7 = vsel %vm1535_vm5, %v2124_v18, %v6540_v36  ;;  %v2758_v13 = vadd.f32 %v2672_v27, %v2517_v42  ;;  %v1971_v21 = vadd.f32 %v1886_v17, %v1730_v34  ;;  %v1188_v1 = vmul.f32 %v3922_v47, %v4880_v10 }
 0x1c0   : > { %v2433_v25 = vsel %vm1293_vm3, %v2430_v22, %v6542_v9  ;;  %v6544_v18 = vrot.slane %v4946_v4, 1  ;;  %v6546_v23 = vrot.slane %v6545_v53, 1  ;;  %v799_v22 = vmin.f32 %v745_v54, 6.0 }
 0x1c1   : > { %v2674_v5 = vsel %vm1535_vm5, %v2671_v55, %v2673_v12  ;;  %v747_v35 = vmax.f32 %v680_v61, 0.0  ;;  %v2794_v46 = vadd.f32 %v4940_v6, %v2758_v13  ;;  %v5446_v45 = vmin.f32 %v746_v0, 6.0 }
 0x1c2   : > { %v1356_v28 = vsel %vm1293_vm3, %v6546_v23, %v6544_v18  ;;  %v2212_v27 = vadd.f32 %v2127_v7, %v1971_v21  ;;  %v5451_v4 = vmin.f32 %v743_v57, 6.0  ;;  %v6548_v34 = vrot.slane %v4950_v59, 2 }
 0x1c3   : > { %6547 = vst [vmem:[#allocation69_spill] sm:$0xff] %v5446_v45  ;;  %v1430_v17 = vadd.f32 %v1356_v28, %v1188_v1  ;;  %v801_v52 = vmin.f32 %v747_v35, 6.0  ;;  %v6550_v54 = vrot.slane %v6549_v8, 2  ;;  %v2826_v36 = vmax.f32 %v2794_v46, 0.0 }
 0x1c4   : > { %v2277_v39 = vadd.f32 %v2245_v62, %v2212_v27  ;;  %v5460_v0 = vmul.f32 %v3916_v44, %v5446_v45  ;;  %v5464_v7 = vmul.f32 %v3925_v49, %v5446_v45  ;;  %v5468_v29 = vsel %vm884_vm2, %v799_v22, 0.0 }
 0x1c5   : > { %v1598_v55 = vsel %vm1535_vm5, %v6550_v54, %v6548_v34  ;;  %v1705_v59 = vmul.f32 %v3959_v32, %v5060_v26  ;;  %v1782_v15 = vmul.f32 %v3961_v33, %v5060_v26  ;;  %v2858_v62 = vmin.f32 %v2826_v36, 6.0 }
 0x1c6   : > { %v1672_v57 = vadd.f32 %v1598_v55, %v1430_v17  ;;  %v2518_v9 = vadd.f32 %v2433_v25, %v2277_v39  ;;  %v1153_v19 = vsel %vm943_vm4, %v801_v52, 0.0  ;;  %v5478_v12 = vmul.f32 %v3961_v33, %v5101_v56  ;;  %v6552_v55 = vld [vmem:[#allocation32_spill] sm:$0xff]  ;;  %v3007_v39 = vpop.f32.mrf.mxu1 }
 0x1c7   : > { %v5482_v61 = vmul.f32 %v3916_v44, %v5468_v29  ;;  %v5486_v13 = vmul.f32 %v3922_v47, %v5446_v45  ;;  %v5489_v21 = vmul.f32 %v3916_v44, %v1153_v19  ;;  %v2023_v25 = vmul.f32 %v3966_v40, %v5060_v26  ;;  %3474 = vmatmul.msk.f32.gmra.mxu1 %vm2881_vm6, %v2858_v62  ;;  %v6566_v45 = vld [vmem:[#allocation13_spill] sm:$0xff] }
 0x1c8   : > { %v2759_v1 = vadd.f32 %v2674_v5, %v2518_v9  ;;  %v5496_v53 = vmul.f32 %v3925_v49, %v1153_v19  ;;  %v5500_v28 = vmul.f32 %v3961_v33, %v1153_v19  ;;  %v5503_v22 = vmul.f32 %v3966_v40, %v1153_v19 }
 0x1c9   : > { %v1737_v35 = vadd.f32 %v1705_v59, %v1672_v57  ;;  %v1902_v46 = vrot.slane %v1782_v15, 1  ;;  %v5507_v17 = vmul.f32 %v4006_v43, %v1153_v19  ;;  %v5510_v5 = vmul.f32 %v4011_v41, %v1153_v19 }
 0x1ca   : > { %v2795_v27 = vadd.f32 %v4940_v6, %v2759_v1  ;;  %v6311_v52 = vrot.slane %v5478_v12, 1  ;;  %v5516_v8 = vmul.f32 %v3966_v40, %v5101_v56  ;;  %v2143_v54 = vrot.slane %v2023_v25, 2 }
 0x1cb   : > { %6551 = vst [vmem:[#allocation68_spill] sm:$0xff] %v5510_v5  ;;  %v2252_v36 = vmul.f32 %v4040_v14, %v6552_v55  ;;  %v2329_v15 = vmul.f32 %v4006_v43, %v6552_v55  ;;  %v5527_v62 = vmul.f32 %v4006_v43, %v5451_v4  ;;  %v2570_v25 = vmul.f32 %v4011_v41, %v6552_v55  ;;  %v6563_v5 = vld [vmem:[#allocation71_spill] sm:$0xff] }
 0x1cc   : > { %v2827_v57 = vmax.f32 %v2795_v27, 0.0  ;;  %v1904_v59 = vsel %vm1293_vm3, %v1902_v46, %v6311_v52  ;;  %v6314_v19 = vrot.slane %v5516_v8, 2  ;;  %v5534_v1 = vmul.f32 %v4011_v41, %v5451_v4 }
 0x1cd   : > { %v1978_v9 = vadd.f32 %v1904_v59, %v1737_v35  ;;  %v2449_v24 = vrot.slane %v2329_v15, 1  ;;  %v6316_v46 = vrot.slane %v5527_v62, 1  ;;  %v3008_v42 = vadd.f32 %v5030_v63, %v3007_v39  ;;  %v6553_v15 = vld [vmem:[#allocation49_spill] sm:$0xff]  ;;  %v6555_v39 = vld [vmem:[#allocation46_spill] sm:$0xff] }
 0x1ce   : > { %v2859_v27 = vmin.f32 %v2827_v57, 6.0  ;;  %v2145_v52 = vsel %vm1535_vm5, %v2143_v54, %v6314_v19  ;;  %v2690_v35 = vrot.slane %v2570_v25, 2  ;;  %v1182_v23 = vmul.f32 %v3922_v47, %v6487_v60  ;;  %v6557_v54 = vld [vmem:[#allocation50_spill] sm:$0xff]  ;;  %v6559_v19 = vld [vmem:[#allocation47_spill] sm:$0xff] }
 0x1cf   : > { %v2219_v18 = vadd.f32 %v2145_v52, %v1978_v9  ;;  %v2451_v57 = vsel %vm1293_vm3, %v2449_v24, %v6316_v46  ;;  %v6554_v34 = vrot.slane %v6553_v15, 1  ;;  %v6556_v16 = vrot.slane %v6555_v39, 1 }
 0x1d0   : > { %3475 = vmatmul.msk.f32.gmra.mxu1 %vm2881_vm6, %v2859_v27  ;;  %v6558_v25 = vrot.slane %v6557_v54, 2  ;;  %v6560_v59 = vrot.slane %v6559_v19, 2  ;;  %v6561_v60 = vrot.slane %v5534_v1, 2  ;;  %v1699_v24 = vmul.f32 %v3959_v32, %v6531_v20 }
 0x1d1   : > { %v1341_v38 = vsel %vm1293_vm3, %v6556_v16, %v6554_v34  ;;  %v1773_v27 = vmul.f32 %v3961_v33, %v6531_v20  ;;  %v2284_v15 = vadd.f32 %v2252_v36, %v2219_v18  ;;  %v5567_v16 = vmul.f32 %v3961_v33, %v6532_v30 }
 0x1d2   : > { %v1583_v44 = vsel %vm1535_vm5, %v6560_v59, %v6558_v25  ;;  %v2692_v52 = vsel %vm1535_vm5, %v2690_v35, %v6561_v60  ;;  %v1424_v9 = vadd.f32 %v1341_v38, %v1182_v23  ;;  %v2014_v34 = vmul.f32 %v3966_v40, %v6531_v20  ;;  %v6562_v23 = vld [vmem:[#allocation67_spill] sm:$0xff]  ;;  %v682_v60 = vpop.f32.mrf.mxu3 }
 0x1d3   : > { %v5573_v19 = vmul.f32 %v3966_v40, %v6532_v30  ;;  %v1887_v38 = vrot.slane %v1773_v27, 1  ;;  %v2246_v59 = vmul.f32 %v4040_v14, %v6562_v23  ;;  %v2320_v39 = vmul.f32 %v4006_v43, %v6562_v23 }
 0x1d4   : > { %v1666_v35 = vadd.f32 %v1583_v44, %v1424_v9  ;;  %v2525_v18 = vadd.f32 %v2451_v57, %v2284_v15  ;;  %v6322_v36 = vrot.slane %v5567_v16, 1  ;;  %v2128_v54 = vrot.slane %v2014_v34, 2 }
 0x1d5   : > { %v6324_v25 = vrot.slane %v5573_v19, 2  ;;  %v5583_v11 = vmul.f32 %v4006_v43, %v6563_v5  ;;  %v2434_v44 = vrot.slane %v2320_v39, 1  ;;  %v2561_v9 = vmul.f32 %v4011_v41, %v6562_v23 }
 0x1d6   : > { %v1731_v46 = vadd.f32 %v1699_v24, %v1666_v35  ;;  %v2766_v27 = vadd.f32 %v2692_v52, %v2525_v18  ;;  %v1889_v57 = vsel %vm1293_vm3, %v1887_v38, %v6322_v36  ;;  %v5595_v24 = vmul.f32 %v4011_v41, %v6563_v5 }
 0x1d7   : > { %v2130_v15 = vsel %vm1535_vm5, %v2128_v54, %v6324_v25  ;;  %v2435_v35 = vrot.slane %v5583_v11, 1  ;;  %v2675_v39 = vrot.slane %v2561_v9, 2  ;;  %v6565_v48 = vrot.slane %v6564_v50, 1  ;;  %v6599_v11 = vld [vmem:[#allocation61_spill] sm:$0xff] }
 0x1d8   : > { %v1972_v34 = vadd.f32 %v1889_v57, %v1731_v46  ;;  %v6567_v52 = vrot.slane %v6566_v45, 1  ;;  %v2802_v38 = vadd.f32 %v4940_v6, %v2766_v27  ;;  %v2676_v36 = vrot.slane %v5595_v24, 2 }
 0x1d9   : > { %v683_v54 = vadd.f32 %v5354_v58, %v682_v60  ;;  %v1614_v25 = vrot.slane %v5496_v53, 2  ;;  %v1194_v46 = vmul.f32 %v3922_v47, %v5468_v29  ;;  %v1369_v9 = vrot.slane %v5482_v61, 1 }
 0x1da   : > { %v3103_v18 = vsel %vm1293_vm3, %v6567_v52, %v6565_v48  ;;  %v2213_v26 = vadd.f32 %v2130_v15, %v1972_v34  ;;  %v2834_v57 = vmax.f32 %v2802_v38, 0.0  ;;  %v2436_v48 = vsel %vm1293_vm3, %v2434_v44, %v2435_v35 }
 0x1db   : > { %v3207_v55 = vadd.f32 %v3103_v18, %v3008_v42  ;;  %v748_v6 = vmax.f32 %v683_v54, 0.0  ;;  %v1484_v45 = vmul.f32 %v3925_v49, %v5468_v29  ;;  %v6568_v42 = vrot.slane %v5489_v21, 1 }
 0x1dc   : > { %v6569_v53 = vrot.slane %v5460_v0, 1  ;;  %v2278_v27 = vadd.f32 %v2246_v59, %v2213_v26  ;;  %v1706_v34 = vmul.f32 %v3959_v32, %v5101_v56  ;;  %v2866_v44 = vmin.f32 %v2834_v57, 6.0 }
 0x1dd   : > { %3239 = vxpose.xlu0.b32.cont [5/16] (narrow) %v3207_v55, 8  ;;  %v2677_v55 = vsel %vm1535_vm5, %v2675_v39, %v2676_v36  ;;  %v802_v52 = vmin.f32 %v748_v6, 6.0  ;;  %v1611_v18 = vrot.slane %v1484_v45, 2  ;;  %v2457_v59 = vrot.slane %v5507_v17, 1 }
 0x1de   : > { %v1373_v60 = vsel %vm1293_vm3, %v6569_v53, %v6568_v42  ;;  %v6570_v15 = vmov %v6569_v53  ;;  %v2519_v38 = vadd.f32 %v2436_v48, %v2278_v27  ;;  %v6571_v42 = vld [vmem:[#allocation34_spill] sm:$0xff]  ;;  %3482 = vmatmul.msk.f32.gmra.mxu3 %vm2881_vm6, %v2866_v44  ;;  %v6572_v56 = vrot.slane %v5464_v7, 2  ;;  %v685_v48 = vpop.f32.mrf.mxu3  ;;  %v6580_v44 = vld [vmem:[#allocation72_spill] sm:$0xff] }
 0x1df   : > { %v1371_v61 = vsel %vm1293_vm3, %v1369_v9, %v6570_v15  ;;  %v1738_v26 = vadd.f32 %v1706_v34, %v6571_v42  ;;  %v6573_v39 = vrot.slane %v5150_v37, 1  ;;  %v6574_v57 = vrot.slane %v5478_v12, 1 }
 0x1e0   : > { %v1436_v54 = vadd.f32 %v1371_v61, %v1194_v46  ;;  %v1613_v9 = vsel %vm1535_vm5, %v1611_v18, %v6572_v56  ;;  %v5642_v46 = vadd.f32 %v1373_v60, %v5486_v13  ;;  %v6575_v45 = vmov %v6572_v56  ;;  %v3010_v61 = vpop.f32.mrf.mxu1 }
 0x1e1   : > { %v1906_v6 = vsel %vm1293_vm3, %v6574_v57, %v6573_v39  ;;  %v5647_v53 = vsel %vm1535_vm5, %v6575_v45, %v1614_v25  ;;  %v2760_v27 = vadd.f32 %v2677_v55, %v2519_v38  ;;  %v5651_v15 = vsel %vm884_vm2, %v802_v52, 0.0  ;;  %v5669_v55 = vld [vmem:[%s6205_s4] ss:$0 sm:$0xff] }
 0x1e2   : > { %v6576_v37 = vrot.slane %v5154_v3, 2  ;;  %v6577_v12 = vrot.slane %v5516_v8, 2  ;;  %v2253_v13 = vmul.f32 %v4040_v14, %v5451_v4  ;;  %v6578_v7 = vrot.slane %v5298_v2, 1 }
 0x1e3   : > { %v6579_v25 = vrot.slane %v5527_v62, 1  ;;  %v2693_v51 = vrot.slane %v6580_v44, 2  ;;  %v2796_v3 = vadd.f32 %v5669_v55, %v2760_v27  ;;  %v5672_v8 = vadd.f32 %v1613_v9, %v1436_v54 }
 0x1e4   : > { %v2147_v34 = vsel %vm1535_vm5, %v6577_v12, %v6576_v37  ;;  %v5676_v52 = vmul.f32 %v3959_v32, %v5651_v15  ;;  %v1979_v2 = vadd.f32 %v1906_v6, %v1738_v26  ;;  %v5680_v62 = vmul.f32 %v3961_v33, %v5651_v15  ;;  %v6581_v26 = vld [vmem:[#allocation62_spill] sm:$0xff]  ;;  %v6585_v37 = vld [vmem:[#allocation64_spill] sm:$0xff] }
 0x1e5   : > { %v2453_v60 = vsel %vm1293_vm3, %v6579_v25, %v6578_v7  ;;  %v5684_v18 = vmul.f32 %v3966_v40, %v5651_v15  ;;  %v5688_v38 = vmul.f32 %v4040_v14, %v5651_v15  ;;  %v3011_v54 = vadd.f32 %v5030_v63, %v3010_v61 }
 0x1e6   : > { %v2828_v42 = vmax.f32 %v2796_v3, 0.0  ;;  %v2220_v56 = vadd.f32 %v2147_v34, %v1979_v2  ;;  %v1700_v9 = vmul.f32 %v3959_v32, %v6532_v30  ;;  %v6582_v39 = vrot.slane %v6581_v26, 1  ;;  %v6588_v30 = vld [vmem:[#allocation77_spill] sm:$0xff]  ;;  %v6590_v2 = vld [vmem:[#allocation15_spill] sm:$0xff] }
 0x1e7   : > { %v6583_v57 = vrot.slane %v5567_v16, 1  ;;  %v6584_v45 = vrot.slane %v5534_v1, 2  ;;  %v6586_v12 = vrot.slane %v6585_v37, 2  ;;  %v6587_v7 = vrot.slane %v5573_v19, 2  ;;  %v6589_v16 = vld [vmem:[#allocation56_spill] sm:$0xff] }
 0x1e8   : > { %v2247_v61 = vmul.f32 %v4040_v14, %v6563_v5  ;;  %v2678_v34 = vrot.slane %v6588_v30, 2  ;;  %v2860_v25 = vmin.f32 %v2828_v42, 6.0  ;;  %v2285_v44 = vadd.f32 %v2253_v13, %v2220_v56 }
 0x1e9   : > { %v1891_v6 = vsel %vm1293_vm3, %v6583_v57, %v6582_v39  ;;  %v2694_v27 = vsel %vm1535_vm5, %v6584_v45, %v2693_v51  ;;  %v2132_v63 = vsel %vm1535_vm5, %v6587_v7, %v6586_v12  ;;  %v1732_v3 = vadd.f32 %v1700_v9, %v6589_v16  ;;  %v6593_v39 = vld [vmem:[#allocation76_spill] sm:$0xff]  ;;  %v6597_v12 = vld [vmem:[#allocation57_spill] sm:$0xff] }
 0x1ea   : > { %v6591_v26 = vrot.slane %v6590_v2, 1  ;;  %v6592_v1 = vrot.slane %v6564_v50, 1  ;;  %v6594_v57 = vrot.slane %v6593_v39, 1  ;;  %v5721_v37 = vadd.f32 %v5354_v58, %v685_v48  ;;  %3476 = vmatmul.msk.f32.gmra.mxu1 %vm2881_vm6, %v2860_v25  ;;  %v6595_v50 = vld [vmem:[#allocation60_spill] sm:$0xff] }
 0x1eb   : > { %v1184_v13 = vmul.f32 %v3922_v47, %v6531_v20  ;;  %v2526_v42 = vadd.f32 %v2453_v60, %v2285_v44  ;;  %v1973_v56 = vadd.f32 %v1891_v6, %v1732_v3  ;;  %v6596_v9 = vrot.slane %v6595_v50, 1  ;;  %v5743_v44 = vpop.f32.mrf.mxu3 }
 0x1ec   : > { %v3105_v51 = vsel %vm1293_vm3, %v6592_v1, %v6591_v26  ;;  %v2438_v19 = vsel %vm1293_vm3, %v2435_v35, %v6594_v57  ;;  %v6598_v7 = vrot.slane %v6597_v12, 1  ;;  %v6600_v16 = vrot.slane %v6599_v11, 2  ;;  %v6601_v35 = vld [vmem:[#allocation58_spill] sm:$0xff] }
 0x1ed   : > { %v3208_v45 = vadd.f32 %v3105_v51, %v3011_v54  ;;  %v6602_v54 = vrot.slane %v6601_v35, 2  ;;  %v2679_v20 = vsel %vm1535_vm5, %v2676_v36, %v2678_v34  ;;  %v1701_v60 = vmul.f32 %v3959_v32, %v6562_v23 }
 0x1ee   : > { %v1346_v30 = vsel %vm1293_vm3, %v6598_v7, %v6596_v9  ;;  %v1776_v6 = vmul.f32 %v3961_v33, %v6562_v23  ;;  %v2767_v3 = vadd.f32 %v2694_v27, %v2526_v42  ;;  %v2214_v2 = vadd.f32 %v2132_v63, %v1973_v56 }
 0x1ef   : > { %v1588_v48 = vsel %vm1535_vm5, %v6602_v54, %v6600_v16  ;;  %3240 = vxpose.xlu0.b32.cont [6/16] (narrow) %v3208_v45, 8  ;;  %v1426_v25 = vadd.f32 %v1346_v30, %v1184_v13  ;;  %v5747_v26 = vmul.f32 %v3961_v33, %v6563_v5  ;;  %v2017_v24 = vmul.f32 %v3966_v40, %v6562_v23 }
 0x1f0   : > { %v749_v36 = vmax.f32 %v5721_v37, 0.0  ;;  %v1892_v1 = vrot.slane %v1776_v6, 1  ;;  %v5754_v51 = vmul.f32 %v3966_v40, %v6563_v5  ;;  %v2803_v39 = vadd.f32 %v5669_v55, %v2767_v3  ;;  %v6604_v3 = vld [vmem:[#allocation6_spill] sm:$0xff] }
 0x1f1   : > { %v1668_v34 = vadd.f32 %v1588_v48, %v1426_v25  ;;  %v2279_v57 = vadd.f32 %v2247_v61, %v2214_v2  ;;  %v1893_v27 = vrot.slane %v5747_v26, 1  ;;  %v2133_v63 = vrot.slane %v2017_v24, 2  ;;  %v6606_v24 = vld [vmem:[#allocation37_spill] sm:$0xff] }
 0x1f2   : > { %v2134_v13 = vrot.slane %v5754_v51, 2  ;;  %v2248_v23 = vmul.f32 %v4040_v14, %v4880_v10  ;;  %v2323_v42 = vmul.f32 %v4006_v43, %v4880_v10  ;;  %v2835_v56 = vmax.f32 %v2803_v39, 0.0 }
 0x1f3   : > { %v1733_v45 = vadd.f32 %v1701_v60, %v1668_v34  ;;  %v2520_v50 = vadd.f32 %v2438_v19, %v2279_v57  ;;  %v1894_v9 = vsel %vm1293_vm3, %v1892_v1, %v1893_v27  ;;  %v5768_v61 = vmul.f32 %v4006_v43, %v4930_v31  ;;  %v6603_v60 = vld [vmem:[#allocation33_spill] sm:$0xff] }
 0x1f4   : > { %v2135_v7 = vsel %vm1535_vm5, %v2133_v63, %v2134_v13  ;;  %v2439_v30 = vrot.slane %v2323_v42, 1  ;;  %v2564_v11 = vmul.f32 %v4011_v41, %v4880_v10  ;;  %v2867_v16 = vmin.f32 %v2835_v56, 6.0  ;;  %v691_v10 = vpop.f32.mrf.mxu3  ;;  %v6608_v63 = vld [vmem:[#allocation31_spill] sm:$0xff]  ;;  %v6610_v42 = vld [vmem:[#allocation8_spill] sm:$0xff] }
 0x1f5   : > { %v1974_v12 = vadd.f32 %v1894_v9, %v1733_v45  ;;  %v2761_v35 = vadd.f32 %v2679_v20, %v2520_v50  ;;  %v2440_v19 = vrot.slane %v5768_v61, 1  ;;  %v5778_v54 = vmul.f32 %v4011_v41, %v4930_v31 }
 0x1f6   : > { %v2680_v25 = vrot.slane %v2564_v11, 2  ;;  %v1190_v6 = vmul.f32 %v3922_v47, %v6603_v60  ;;  %v6605_v2 = vrot.slane %v6604_v3, 1  ;;  %v6607_v34 = vrot.slane %v6606_v24, 1  ;;  %3483 = vmatmul.msk.f32.gmra.mxu3 %vm2881_vm6, %v2867_v16 }
 0x1f7   : > { %v2215_v48 = vadd.f32 %v2135_v7, %v1974_v12  ;;  %v2797_v20 = vadd.f32 %v5669_v55, %v2761_v35  ;;  %v2441_v39 = vsel %vm1293_vm3, %v2439_v30, %v2440_v19  ;;  %v2681_v57 = vrot.slane %v5778_v54, 2  ;;  %v6612_v7 = vld [vmem:[#allocation32_spill] sm:$0xff] }
 0x1f8   : > { %v1361_v1 = vsel %vm1293_vm3, %v6607_v34, %v6605_v2  ;;  %v6609_v45 = vrot.slane %v6608_v63, 2  ;;  %v6611_v56 = vrot.slane %v6610_v42, 2  ;;  %v1707_v11 = vmul.f32 %v3959_v32, %v6612_v7  ;;  %v6613_v42 = vld [vmem:[#allocation69_spill] sm:$0xff] }
 0x1f9   : > { %v2280_v9 = vadd.f32 %v2248_v23, %v2215_v48  ;;  %v1432_v12 = vadd.f32 %v1361_v1, %v1190_v6  ;;  %v1785_v16 = vmul.f32 %v3961_v33, %v6612_v7  ;;  %v2829_v35 = vmax.f32 %v2797_v20, 0.0 }
 0x1fa   : > { %v1603_v50 = vsel %vm1535_vm5, %v6611_v56, %v6609_v45  ;;  %v2682_v30 = vsel %vm1535_vm5, %v2680_v25, %v2681_v57  ;;  %v5807_v60 = vmul.f32 %v3961_v33, %v5451_v4  ;;  %v2026_v3 = vmul.f32 %v3966_v40, %v6612_v7 }
 0x1fb   : > { %v2521_v23 = vadd.f32 %v2441_v39, %v2280_v9  ;;  %v1674_v48 = vadd.f32 %v1603_v50, %v1432_v12  ;;  %v1907_v6 = vrot.slane %v1785_v16, 1  ;;  %v5813_v2 = vmul.f32 %v3966_v40, %v5451_v4 }
 0x1fc   : > { %v2861_v24 = vmin.f32 %v2829_v35, 6.0  ;;  %v1908_v34 = vrot.slane %v5807_v60, 1  ;;  %v2148_v1 = vrot.slane %v2026_v3, 2  ;;  %v2254_v25 = vmul.f32 %v4040_v14, %v5468_v29 }
 0x1fd   : > { %v2762_v10 = vadd.f32 %v2682_v30, %v2521_v23  ;;  %v1739_v20 = vadd.f32 %v1707_v11, %v1674_v48  ;;  %v2149_v63 = vrot.slane %v5813_v2, 2  ;;  %v2332_v39 = vmul.f32 %v4006_v43, %v5468_v29  ;;  %v694_v30 = vpop.f32.mrf.mxu3 }
 0x1fe   : > { %3477 = vmatmul.msk.f32.gmra.mxu1 %vm2881_vm6, %v2861_v24  ;;  %v1909_v45 = vsel %vm1293_vm3, %v1907_v6, %v1908_v34  ;;  %v5827_v56 = vmul.f32 %v4006_v43, %v6613_v42  ;;  %v2573_v50 = vmul.f32 %v4011_v41, %v5468_v29  ;;  %v5833_v9 = vmul.f32 %v4011_v41, %v6613_v42  ;;  %v3013_v24 = vpop.f32.mrf.mxu1 }
 0x1ff   : > { %v2798_v12 = vadd.f32 %v5669_v55, %v2762_v10  ;;  %v1980_v11 = vadd.f32 %v1909_v45, %v1739_v20  ;;  %v2150_v16 = vsel %vm1535_vm5, %v2148_v1, %v2149_v63  ;;  %v2454_v35 = vrot.slane %v2332_v39, 1 }
 0x200   : > { %v2455_v3 = vrot.slane %v5827_v56, 1  ;;  %v2695_v23 = vrot.slane %v2573_v50, 2  ;;  %v6326_v48 = vrot.slane %v5833_v9, 2  ;;  %v689_v6 = vadd.f32 %v5354_v58, %v5743_v44  ;;  %v6622_v50 = vld [vmem:[#allocation16_spill] sm:$0xff] }
 0x201   : > { %v5845_v0 = vmul.f32 %v4006_v43, %v5651_v15  ;;  %v5849_v10 = vmul.f32 %v4011_v41, %v5651_v15  ;;  %v2830_v1 = vmax.f32 %v2798_v12, 0.0  ;;  %v2221_v20 = vadd.f32 %v2150_v16, %v1980_v11 }
 0x202   : > { %v5853_v39 = vadd.f32 %v5676_v52, %v5672_v8  ;;  %v2456_v58 = vsel %vm1293_vm3, %v2454_v35, %v2455_v3  ;;  %v750_v44 = vmax.f32 %v689_v6, 0.0  ;;  %v5862_v30 = vmin.f32 %v749_v36, 6.0  ;;  %v6614_v36 = vld [vmem:[#allocation74_spill] sm:$0xff] }
 0x203   : > { %v2286_v15 = vadd.f32 %v2254_v25, %v2221_v20  ;;  %v1679_v12 = vadd.f32 %v5647_v53, %v5642_v46  ;;  %v2862_v11 = vmin.f32 %v2830_v1, 6.0  ;;  %v2697_v8 = vsel %vm1535_vm5, %v2695_v23, %v6326_v48  ;;  %v5892_v1 = vld [vmem:[%s6207_s6] ss:$0 sm:$0xff] }
 0x204   : > { %v804_v52 = vmin.f32 %v750_v44, 6.0  ;;  %v1702_v16 = vmul.f32 %v3959_v32, %v6563_v5  ;;  %v1712_v6 = vmul.f32 %v3959_v32, %v5862_v30  ;;  %v5875_v37 = vmul.f32 %v3961_v33, %v5862_v30 }
 0x205   : > { %v2527_v35 = vadd.f32 %v2456_v58, %v2286_v15  ;;  %v6615_v25 = vrot.slane %v6614_v36, 1  ;;  %v5887_v5 = vmul.f32 %v3966_v40, %v5862_v30  ;;  %v3014_v20 = vadd.f32 %v5892_v1, %v3013_v24  ;;  %v6617_v58 = vld [vmem:[#allocation63_spill] sm:$0xff] }
 0x206   : > { %3478 = vmatmul.msk.f32.gmra.mxu1 %vm2881_vm6, %v2862_v11  ;;  %v1156_v23 = vsel %vm943_vm4, %v804_v52, 0.0  ;;  %v1734_v26 = vadd.f32 %v1702_v16, %v6617_v58  ;;  %v6618_v15 = vld [vmem:[#allocation75_spill] sm:$0xff]  ;;  %v2249_v36 = vmul.f32 %v4040_v14, %v4930_v31  ;;  %v6620_v16 = vld [vmem:[#allocation17_spill] sm:$0xff]  ;;  %v1918_v21 = vrot.slane %v5875_v37, 1  ;;  %v3016_v48 = vpop.f32.mrf.mxu1 }
 0x207   : > { %v1896_v46 = vsel %vm1293_vm3, %v1893_v27, %v6615_v25  ;;  %v2768_v44 = vadd.f32 %v2697_v8, %v2527_v35  ;;  %v6619_v11 = vrot.slane %v6618_v15, 2  ;;  %v5905_v25 = vmul.f32 %v3961_v33, %v1156_v23  ;;  %v697_v15 = vpop.f32.mrf.mxu3 }
 0x208   : > { %v5908_v53 = vmul.f32 %v3966_v40, %v1156_v23  ;;  %v1975_v24 = vadd.f32 %v1896_v46, %v1734_v26  ;;  %v6621_v58 = vrot.slane %v6620_v16, 1  ;;  %v6623_v8 = vrot.slane %v6622_v50, 1 }
 0x209   : > { %v2137_v52 = vsel %vm1535_vm5, %v2134_v13, %v6619_v11  ;;  %v2804_v51 = vadd.f32 %v5669_v55, %v2768_v44  ;;  %v5916_v13 = vadd.f32 %v1712_v6, %v1679_v12  ;;  %v5919_v31 = vmul.f32 %v4006_v43, %v1156_v23  ;;  %v6624_v11 = vld [vmem:[#allocation81_spill] sm:$0xff] }
 0x20a   : > { %v3108_v35 = vsel %vm1293_vm3, %v6623_v8, %v6621_v58  ;;  %v2683_v45 = vrot.slane %v6624_v11, 2  ;;  %v2159_v46 = vrot.slane %v5887_v5, 2  ;;  %v2216_v26 = vadd.f32 %v2137_v52, %v1975_v24  ;;  %v6625_v8 = vld [vmem:[#allocation80_spill] sm:$0xff] }
 0x20b   : > { %v3209_v27 = vadd.f32 %v3108_v35, %v3014_v20  ;;  %v2836_v50 = vmax.f32 %v2804_v51, 0.0  ;;  %v5925_v58 = vmul.f32 %v4011_v41, %v1156_v23  ;;  %v6626_v44 = vrot.slane %v6625_v8, 1  ;;  %v6627_v20 = vld [vmem:[#allocation45_spill] sm:$0xff]  ;;  %v6629_v51 = vld [vmem:[#allocation44_spill] sm:$0xff] }
 0x20c   : > { %v1708_v6 = vmul.f32 %v3959_v32, %v5451_v4  ;;  %v1920_v15 = vrot.slane %v5905_v25, 1  ;;  %v2281_v52 = vadd.f32 %v2249_v36, %v2216_v26  ;;  %v6628_v24 = vrot.slane %v6627_v20, 1  ;;  %v6633_v36 = vld [vmem:[#allocation24_spill] sm:$0xff] }
 0x20d   : > { %v2443_v12 = vsel %vm1293_vm3, %v2440_v19, %v6626_v44  ;;  %3241 = vxpose.xlu0.b32.cont [7/16] (narrow) %v3209_v27, 8  ;;  %v2868_v35 = vmin.f32 %v2836_v50, 6.0  ;;  %v2462_v61 = vrot.slane %v5919_v31, 1  ;;  %v2684_v19 = vsel %vm1535_vm5, %v2681_v57, %v2683_v45  ;;  %v6630_v44 = vld [vmem:[#allocation48_spill] sm:$0xff] }
 0x20e   : > { %v1911_v23 = vsel %vm1293_vm3, %v1908_v34, %v6628_v24  ;;  %v1740_v8 = vadd.f32 %v1708_v6, %v6629_v51  ;;  %v2522_v25 = vadd.f32 %v2443_v12, %v2281_v52  ;;  %v6631_v11 = vrot.slane %v6630_v44, 2  ;;  %v6632_v34 = vld [vmem:[#allocation68_spill] sm:$0xff]  ;;  %v6636_v51 = vld [vmem:[#allocation9_spill] sm:$0xff] }
 0x20f   : > { %v2255_v60 = vmul.f32 %v4040_v14, %v6613_v42  ;;  %v2458_v54 = vsel %vm1293_vm3, %v2455_v3, %v2457_v59  ;;  %3484 = vmatmul.msk.f32.gmra.mxu3 %vm2881_vm6, %v2868_v35  ;;  %v2698_v45 = vrot.slane %v6632_v34, 2  ;;  %v1240_v26 = vmul.f32 %v6633_v36, %v5451_v4  ;;  %v6634_v35 = vld [vmem:[#allocation43_spill] sm:$0xff] }
 0x210   : > { %v2152_v27 = vsel %vm1535_vm5, %v2149_v63, %v6631_v11  ;;  %v1981_v57 = vadd.f32 %v1911_v23, %v1740_v8  ;;  %v1482_v2 = vmul.f32 %v3925_v49, %v5451_v4  ;;  %v2763_v63 = vadd.f32 %v2684_v19, %v2522_v25 }
 0x211   : > { %v1192_v50 = vmul.f32 %v3922_v47, %v6612_v7  ;;  %v1788_v17 = vmul.f32 %v3961_v33, %v5468_v29  ;;  %v1789_v59 = vmul.f32 %v3961_v33, %v6613_v42  ;;  %v1365_v3 = vrot.slane %v1240_v26, 1  ;;  %v3019_v7 = vpop.f32.mrf.mxu1 }
 0x212   : > { %v2222_v56 = vadd.f32 %v2152_v27, %v1981_v57  ;;  %v1607_v12 = vrot.slane %v1482_v2, 2  ;;  %v2029_v6 = vmul.f32 %v3966_v40, %v5468_v29  ;;  %v2799_v11 = vadd.f32 %v5669_v55, %v2763_v63 }
 0x213   : > { %v1912_v52 = vrot.slane %v1788_v17, 1  ;;  %v1913_v49 = vrot.slane %v1789_v59, 1  ;;  %v2030_v20 = vmul.f32 %v3966_v40, %v6613_v42  ;;  %v3017_v23 = vadd.f32 %v5892_v1, %v3016_v48  ;;  %v6639_v59 = vld [vmem:[#allocation18_spill] sm:$0xff] }
 0x214   : > { %v2287_v24 = vadd.f32 %v2255_v60, %v2222_v56  ;;  %v6635_v19 = vrot.slane %v6634_v35, 1  ;;  %v6637_v8 = vrot.slane %v6636_v51, 2  ;;  %v2831_v44 = vmax.f32 %v2799_v11, 0.0 }
 0x215   : > { %v6638_v27 = vrot.slane %v5833_v9, 2  ;;  %v1709_v40 = vmul.f32 %v3959_v32, %v5468_v29  ;;  %v2153_v36 = vrot.slane %v2029_v6, 2  ;;  %v2154_v48 = vrot.slane %v2030_v20, 2 }
 0x216   : > { %v1366_v33 = vsel %vm1293_vm3, %v6635_v19, %v1365_v3  ;;  %v1608_v25 = vsel %vm1535_vm5, %v6637_v8, %v1607_v12  ;;  %v2528_v60 = vadd.f32 %v2458_v54, %v2287_v24  ;;  %v5989_v26 = vmul.f32 %v4006_v43, %v5862_v30  ;;  %v6642_v24 = vld [vmem:[#allocation28_spill] sm:$0xff] }
 0x217   : > { %v2699_v57 = vsel %vm1535_vm5, %v6638_v27, %v2698_v45  ;;  %v1434_v34 = vadd.f32 %v1366_v33, %v1192_v50  ;;  %v2863_v2 = vmin.f32 %v2831_v44, 6.0  ;;  %v1914_v17 = vsel %vm1293_vm3, %v1912_v52, %v1913_v49 }
 0x218   : > { %v6640_v56 = vrot.slane %v6639_v59, 1  ;;  %v6641_v9 = vrot.slane %v6620_v16, 1  ;;  %v2769_v50 = vadd.f32 %v2699_v57, %v2528_v60  ;;  %v2460_v29 = vrot.slane %v5989_v26, 1 }
 0x219   : > { %v1676_v63 = vadd.f32 %v1608_v25, %v1434_v34  ;;  %v2577_v54 = vmul.f32 %v4011_v41, %v5862_v30  ;;  %v2703_v11 = vrot.slane %v5925_v58, 2  ;;  %3479 = vmatmul.msk.f32.gmra.mxu1 %vm2881_vm6, %v2863_v2  ;;  %v1193_v52 = vmul.f32 %v3922_v47, %v5451_v4  ;;  %v6644_v58 = vld [vmem:[#allocation29_spill] sm:$0xff]  ;;  %v3022_v44 = vpop.f32.mrf.mxu1 }
 0x21a   : > { %v3110_v45 = vsel %vm1293_vm3, %v6641_v9, %v6640_v56  ;;  %v6643_v35 = vrot.slane %v6642_v24, 1  ;;  %v1921_v19 = vsel %vm1293_vm3, %v1918_v21, %v1920_v15  ;;  %v2805_v33 = vadd.f32 %v5669_v55, %v2769_v50 }
 0x21b   : > { %v3210_v6 = vadd.f32 %v3110_v45, %v3017_v23  ;;  %v1741_v20 = vadd.f32 %v1709_v40, %v1676_v63  ;;  %v2155_v23 = vsel %vm1535_vm5, %v2153_v36, %v2154_v48  ;;  %v6645_v51 = vrot.slane %v6644_v58, 2  ;;  %v6650_v63 = vld [vmem:[#allocation19_spill] sm:$0xff] }
 0x21c   : > { %v1368_v16 = vsel %vm1293_vm3, %v1365_v3, %v6643_v35  ;;  %v2700_v47 = vrot.slane %v5849_v10, 2  ;;  %v1710_v3 = vmul.f32 %v3959_v32, %v6613_v42  ;;  %v2837_v27 = vmax.f32 %v2805_v33, 0.0  ;;  %v6648_v10 = vld [vmem:[#allocation20_spill] sm:$0xff] }
 0x21d   : > { %3242 = vxpose.xlu0.b32.cont [8/16] (narrow) %v3210_v6, 8  ;;  %v1610_v8 = vsel %vm1535_vm5, %v1607_v12, %v6645_v51  ;;  %v1982_v25 = vadd.f32 %v1914_v17, %v1741_v20  ;;  %v1435_v4 = vadd.f32 %v1368_v16, %v1193_v52  ;;  %v6646_v15 = vrot.slane %v5845_v0, 1  ;;  %v6656_v16 = vld [vmem:[#allocation21_spill] sm:$0xff]  ;;  %v3566_v51 = vld [vmem:[%s3778_s21 + $0xc8] sm:$0xff] }
 0x21e   : > { %v2701_v34 = vrot.slane %v2577_v54, 2  ;;  %v6647_v40 = vrot.slane %v5500_v28, 1  ;;  %v3020_v26 = vadd.f32 %v5892_v1, %v3019_v7  ;;  %v6649_v2 = vrot.slane %v6648_v10, 1 }
 0x21f   : > { %v2461_v57 = vsel %vm1293_vm3, %v6646_v15, %v2460_v29  ;;  %v2223_v36 = vadd.f32 %v2155_v23, %v1982_v25  ;;  %v1677_v12 = vadd.f32 %v1610_v8, %v1435_v4  ;;  %v6651_v17 = vrot.slane %v6650_v63, 1  ;;  %v6661_v25 = vld [vmem:[#allocation22_spill] sm:$0xff]  ;;  %v6663_v15 = vld [vmem:[#allocation25_spill] sm:$0xff] }
 0x220   : > { %v1916_v60 = vsel %vm1293_vm3, %v1913_v49, %v6647_v40  ;;  %v2869_v42 = vmin.f32 %v2837_v27, 6.0  ;;  %v6652_v0 = vrot.slane %v5680_v62, 1  ;;  %v6653_v28 = vrot.slane %v5684_v18, 2 }
 0x221   : > { %v3113_v32 = vsel %vm1293_vm3, %v6651_v17, %v6649_v2  ;;  %v2258_v7 = vmul.f32 0.0, %v4040_v14  ;;  %v2288_v56 = vadd.f32 %v5688_v38, %v2223_v36  ;;  %v1742_v9 = vadd.f32 %v1710_v3, %v1677_v12  ;;  %v3025_v58 = vpop.f32.mrf.mxu1  ;;  %v6668_v12 = vld [vmem:[#allocation27_spill] sm:$0xff] }
 0x222   : > { %v1919_v59 = vsel %vm1293_vm3, %v6652_v0, %v1918_v21  ;;  %v2160_v49 = vsel %vm1535_vm5, %v6653_v28, %v2159_v46  ;;  %v3211_v45 = vadd.f32 %v3113_v32, %v3020_v26  ;;  %v6654_v37 = vrot.slane %v5908_v53, 2  ;;  %3485 = vmatmul.msk.f32.gmra.mxu3 %vm2881_vm6, %v2869_v42 }
 0x223   : > { %v1984_v50 = vadd.f32 %v1919_v59, %v5853_v39  ;;  %v2702_v62 = vsel %vm1535_vm5, %v2700_v47, %v2701_v34  ;;  %v6655_v18 = vrot.slane %v5503_v22, 2  ;;  %v2338_v38 = vmul.f32 0.0, %v4006_v43 }
 0x224   : > { %v2162_v21 = vsel %vm1535_vm5, %v2159_v46, %v6654_v37  ;;  %v2529_v6 = vadd.f32 %v2461_v57, %v2288_v56  ;;  %v1983_v39 = vadd.f32 %v1916_v60, %v1742_v9  ;;  %v2257_v53 = vmul.f32 %v4040_v14, %v5862_v30  ;;  %v3565_v14 = vld [vmem:[%s3778_s21 + $0xc0] sm:$0xff] }
 0x225   : > { %v2157_v54 = vsel %vm1535_vm5, %v2154_v48, %v6655_v18  ;;  %v2225_v5 = vadd.f32 %v2160_v49, %v1984_v50  ;;  %v1985_v46 = vadd.f32 %v1921_v19, %v5916_v13  ;;  %3243 = vxpose.xlu0.b32.cont [9/16] (narrow) %v3211_v45, 8  ;;  %v2464_v20 = vrot.slane %v2338_v38, 1  ;;  %v6659_v19 = vld [vmem:[#allocation23_spill] sm:$0xff] }
 0x226   : > { %v2579_v52 = vmul.f32 0.0, %v4011_v41  ;;  %v3023_v22 = vadd.f32 %v5892_v1, %v3022_v44  ;;  %v2770_v24 = vadd.f32 %v2702_v62, %v2529_v6  ;;  %v2224_v48 = vadd.f32 %v2157_v54, %v1983_v39  ;;  %v3567_v62 = vld [vmem:[%s3778_s21 + $0xd0] sm:$0xff] }
 0x227   : > { %v2290_v35 = vadd.f32 %v2258_v7, %v2225_v5  ;;  %v6657_v43 = vrot.slane %v6656_v16, 1  ;;  %v6658_v33 = vmov %v6649_v2  ;;  %v3126_v30 = vrot.slane %v3565_v14, 1  ;;  %v6670_v2 = vld [vmem:[#allocation7_spill] sm:$0xff] }
 0x228   : > { %v3127_v13 = vrot.slane %v3566_v51, 1  ;;  %v2463_v41 = vsel %vm1293_vm3, %v2460_v29, %v2462_v61  ;;  %v6660_v8 = vrot.slane %v6659_v19, 1  ;;  %v6662_v47 = vrot.slane %v6661_v25, 1  ;;  %v6666_v61 = vld [vmem:[#allocation5_spill] sm:$0xff] }
 0x229   : > { %v3115_v23 = vsel %vm1293_vm3, %v6658_v33, %v6657_v43  ;;  %v2806_v3 = vadd.f32 %v5669_v55, %v2770_v24  ;;  %v2289_v44 = vadd.f32 %v2257_v53, %v2224_v48  ;;  %v2704_v27 = vsel %vm1535_vm5, %v2701_v34, %v2703_v11  ;;  %v3028_v37 = vpop.f32.mrf.mxu1  ;;  %v3569_v48 = vld [vmem:[%s3778_s21 + $0xe0] sm:$0xff] }
 0x22a   : > { %v3118_v4 = vsel %vm1293_vm3, %v6662_v47, %v6660_v8  ;;  %v6664_v57 = vrot.slane %v6663_v15, 1  ;;  %v6665_v40 = vmov %v6660_v8  ;;  %v2226_v31 = vadd.f32 %v2162_v21, %v1985_v46  ;;  %v3571_v47 = vld [vmem:[%s3778_s21 + $0xf0] sm:$0xff] }
 0x22b   : > { %v3212_v36 = vadd.f32 %v3115_v23, %v3023_v22  ;;  %v6667_v29 = vrot.slane %v6666_v61, 1  ;;  %v6669_v26 = vrot.slane %v6668_v12, 1  ;;  %v6671_v63 = vrot.slane %v6670_v2, 1  ;;  %v3568_v22 = vld [vmem:[%s3778_s21 + $0xd8] sm:$0xff]  ;;  %v3570_v23 = vld [vmem:[%s3778_s21 + $0xe8] sm:$0xff]  ;;  %v3573_v12 = vld [vmem:[%s3778_s21 + $0x100] sm:$0xff] }
 0x22c   : > { %v3120_v60 = vsel %vm1293_vm3, %v6665_v40, %v6664_v57  ;;  %v2838_v34 = vmax.f32 %v2806_v3, 0.0  ;;  %v2530_v32 = vadd.f32 %v2463_v41, %v2289_v44  ;;  %v2531_v42 = vadd.f32 %v2464_v20, %v2290_v35  ;;  %v3572_v3 = vld [vmem:[%s3778_s21 + $0xf8] sm:$0xff] }
 0x22d   : > { %v3123_v10 = vsel %vm1293_vm3, %v6669_v26, %v6667_v29  ;;  %v6672_v17 = vmov %v6667_v29  ;;  %v2705_v0 = vrot.slane %v2579_v52, 2  ;;  %3244 = vxpose.xlu0.b32.cont [10/16] (narrow) %v3212_v36, 8  ;;  %v3026_v49 = vadd.f32 %v5892_v1, %v3025_v58 }
 0x22e   : > { %v3125_v11 = vsel %vm1293_vm3, %v6672_v17, %v6671_v63  ;;  %v2870_v59 = vmin.f32 %v2838_v34, 6.0  ;;  %v2771_v28 = vadd.f32 %v2704_v27, %v2530_v32  ;;  %v3128_v56 = vsel %vm1293_vm3, %v3126_v30, %v3127_v13  ;;  %v3575_v32 = vld [vmem:[%s3778_s21 + $0x110] sm:$0xff] }
 0x22f   : > { %v2772_v45 = vadd.f32 %v2705_v0, %v2531_v42  ;;  %v2291_v50 = vadd.f32 %v2258_v7, %v2226_v31  ;;  %v3129_v18 = vrot.slane %v3567_v62, 1  ;;  %v3213_v54 = vadd.f32 %v3118_v4, %v3026_v49  ;;  %v3577_v62 = vld [vmem:[%s3778_s21 + $0x120] sm:$0xff] }
 0x230   : > { %3486 = vmatmul.msk.f32.gmra.mxu3 %vm2881_vm6, %v2870_v59  ;;  %v2807_v9 = vadd.f32 %v5669_v55, %v2771_v28  ;;  %v3029_v53 = vadd.f32 %v5892_v1, %v3028_v37  ;;  %v3131_v24 = vrot.slane %v3568_v22, 1  ;;  %v3132_v35 = vrot.slane %v3569_v48, 1 }
 0x231   : > { %v2808_v6 = vadd.f32 %v5669_v55, %v2772_v45  ;;  %v2532_v39 = vadd.f32 %v2464_v20, %v2291_v50  ;;  %v3130_v5 = vsel %vm1293_vm3, %v3127_v13, %v3129_v18  ;;  %v3031_v52 = vpop.f32.mrf.mxu1  ;;  %v3134_v20 = vrot.slane %v3570_v23, 1 }
 0x232   : > { %v2839_v21 = vmax.f32 %v2807_v9, 0.0  ;;  %v3214_v16 = vadd.f32 %v3120_v60, %v3029_v53  ;;  %v3032_v58 = vadd.f32 %v5892_v1, %v3031_v52  ;;  %v3133_v14 = vsel %vm1293_vm3, %v3131_v24, %v3132_v35  ;;  %v3580_v24 = vld [vmem:[%s3778_s21 + $0x138] sm:$0xff] }
 0x233   : > { %v2840_v7 = vmax.f32 %v2808_v6, 0.0  ;;  %v2773_v46 = vadd.f32 %v2705_v0, %v2532_v39  ;;  %v3135_v13 = vsel %vm1293_vm3, %v3132_v35, %v3134_v20  ;;  %v3136_v4 = vrot.slane %v3571_v47, 1  ;;  %v3581_v35 = vld [vmem:[%s3778_s21 + $0x140] sm:$0xff] }
 0x234   : > { %v2871_v38 = vmin.f32 %v2839_v21, 6.0  ;;  %v3215_v41 = vadd.f32 %v3123_v10, %v3032_v58  ;;  %v3137_v44 = vrot.slane %v3572_v3, 1  ;;  %v3139_v26 = vrot.slane %v3573_v12, 1 }
 0x235   : > { %3245 = vxpose.xlu0.b32.cont [11/16] (narrow) %v3213_v54, 8  ;;  %v2872_v43 = vmin.f32 %v2840_v7, 6.0  ;;  %v2809_v33 = vadd.f32 %v5669_v55, %v2773_v46  ;;  %v3142_v42 = vrot.slane %v3575_v32, 1  ;;  %v3146_v18 = vrot.slane %v3577_v62, 1  ;;  %v3578_v54 = vld [vmem:[%s3778_s21 + $0x128] sm:$0xff]  ;;  %v3579_v7 = vld [vmem:[%s3778_s21 + $0x130] sm:$0xff]  ;;  %v3061_v52 = vpop.f32.mrf.mxu3 }
 0x236   : > { %v3138_v57 = vsel %vm1293_vm3, %v3136_v4, %v3137_v44  ;;  %v3140_v63 = vsel %vm1293_vm3, %v3137_v44, %v3139_v26  ;;  %v3149_v46 = vrot.slane %v3579_v7, 1  ;;  %v3151_v48 = vrot.slane %v3580_v24, 1  ;;  %v3585_v4 = vld [vmem:[%s3778_s21 + $0x158] sm:$0xff] }
 0x237   : > { %v2841_v30 = vmax.f32 %v2809_v33, 0.0  ;;  %v3157_v3 = vrot.slane %v3585_v4, 1  ;;  %v3588_v26 = vld [vmem:[%s3778_s21 + $0x178] sm:$0xff] }
 0x238   : > { %3487 = vmatmul.msk.f32.gmra.mxu3 %vm2881_vm6, %v2871_v38  ;;  %v3147_v38 = vrot.slane %v3578_v54, 1 }
 0x239   : > { %v3034_v51 = vpop.f32.mrf.mxu1  ;;  %v2873_v19 = vmin.f32 %v2841_v30, 6.0 }
 0x23a   : > { %v3035_v55 = vadd.f32 %v5892_v1, %v3034_v51  ;;  %v3148_v39 = vsel %vm1293_vm3, %v3146_v18, %v3147_v38  ;;  %v3150_v22 = vsel %vm1293_vm3, %v3147_v38, %v3149_v46  ;;  %v3062_v51 = vadd.f32 %v5892_v1, %v3061_v52 }
 0x23c   : > { %v3216_v25 = vadd.f32 %v3125_v11, %v3035_v55  ;;  %v3574_v11 = vld [vmem:[%s3778_s21 + $0x108] sm:$0xff]  ;;  %v3583_v55 = vld [vmem:[%s3778_s21 + $0x150] sm:$0xff] }
 0x23d   : > { %3246 = vxpose.xlu0.b32.cont [12/16] (narrow) %v3214_v16, 8  ;;  %v3141_v34 = vrot.slane %v3574_v11, 1  ;;  %v3152_v16 = vrot.slane %v3581_v35, 1 }
 0x23f   : > { %v3143_v0 = vsel %vm1293_vm3, %v3141_v34, %v3142_v42  ;;  %v3153_v20 = vsel %vm1293_vm3, %v3151_v48, %v3152_v16  ;;  %v3589_v34 = vld [vmem:[%s3778_s21 + $0x180] sm:$0xff] }
 0x240   : > { %3488 = vmatmul.msk.f32.gmra.mxu3 %vm2881_vm6, %v2872_v43  ;;  %v3166_v32 = vrot.slane %v3589_v34, 1 }
 0x241   : > { %v3037_v8 = vpop.f32.mrf.mxu1  ;;  %v3064_v43 = vpop.f32.mrf.mxu3 }
 0x242   : > { %v3038_v27 = vadd.f32 %v5892_v1, %v3037_v8  ;;  %v3156_v8 = vrot.slane %v3583_v55, 1  ;;  %v3065_v44 = vadd.f32 %v5892_v1, %v3064_v43 }
 0x244   : > { %v3217_v40 = vadd.f32 %v3128_v56, %v3038_v27  ;;  %v3576_v56 = vld [vmem:[%s3778_s21 + $0x118] sm:$0xff]  ;;  %v3586_v27 = vld [vmem:[%s3778_s21 + $0x168] sm:$0xff] }
 0x245   : > { %3247 = vxpose.xlu0.b32.cont [13/16] (narrow) %v3215_v41, 8  ;;  %v3144_v9 = vrot.slane %v3576_v56, 1 }
 0x247   : > { %v3145_v45 = vsel %vm1293_vm3, %v3142_v42, %v3144_v9  ;;  %v3590_v42 = vld [vmem:[%s3778_s21 + $0x188] sm:$0xff]  ;;  %v3591_v9 = vld [vmem:[%s3778_s21 + $0x190] sm:$0xff] }
 0x248   : > { %3489 = vmatmul.msk.f32.gmra.mxu3 %vm2881_vm6, %v2873_v19  ;;  %v3225_v19 = vadd.f32 %v3148_v39, %v3062_v51 }
 0x249   : > { %v3040_v15 = vpop.f32.mrf.mxu1 }
 0x24a   : > { %v3041_v60 = vadd.f32 %v5892_v1, %v3040_v15  ;;  %v3161_v15 = vrot.slane %v3586_v27, 1 }
 0x24c   : > { %v3218_v61 = vadd.f32 %v3130_v5, %v3041_v60  ;;  %v3158_v60 = vsel %vm1293_vm3, %v3156_v8, %v3157_v3 }
 0x24d   : > { %3248 = vxpose.xlu0.b32.cont [14/16] (narrow) %v3216_v25, 8  ;;  %v3584_v25 = vld [vmem:[%s3778_s21 + $0x160] sm:$0xff] }
 0x24e   : > { %v3159_v47 = vrot.slane %v3584_v25, 1 }
 0x251   : > { %v3043_v31 = vpop.f32.mrf.mxu1 }
 0x252   : > { %v3044_v36 = vadd.f32 %v5892_v1, %v3043_v31  ;;  %v3160_v31 = vsel %vm1293_vm3, %v3157_v3, %v3159_v47 }
 0x254   : > { %v3219_v29 = vadd.f32 %v3133_v14, %v3044_v36  ;;  %v3582_v14 = vld [vmem:[%s3778_s21 + $0x148] sm:$0xff] }
 0x255   : > { %3249 = vxpose.xlu0.b32.cont [15/16] (narrow) %v3217_v40, 8  ;;  %v3154_v30 = vrot.slane %v3582_v14, 1 }
 0x256   : > { %3267 = vxpose.xlu1.b32.start [1/16] (narrow) %v3219_v29, 8 }
 0x257   : > { %v3155_v41 = vsel %vm1293_vm3, %v3152_v16, %v3154_v30 }
 0x259   : > { %v3046_v10 = vpop.f32.mrf.mxu1 }
 0x25a   : > { %v3047_v2 = vadd.f32 %v5892_v1, %v3046_v10  ;;  %v3164_v10 = vrot.slane %v3588_v26, 1 }
 0x25c   : > { %v3220_v17 = vadd.f32 %v3135_v13, %v3047_v2 }
 0x25d   : > { %3250 = vxpose.xlu0.b32.end [16/16] (narrow) %v3218_v61, 8  ;;  %v3226_v61 = vadd.f32 %v3150_v22, %v3065_v44 }
 0x25e   : > { %3268 = vxpose.xlu1.b32.cont [2/16] (narrow) %v3220_v17, 8 }
 0x261   : > { %v3067_v13 = vpop.f32.mrf.mxu3 }
 0x262   : > { %v3068_v12 = vadd.f32 %v5892_v1, %v3067_v13 }
 0x267   : > { %v3049_v59 = vpop.f32.mrf.mxu1 }
 0x268   : > { %v3050_v28 = vadd.f32 %v5892_v1, %v3049_v59 }
 0x26a   : > { %v3221_v49 = vadd.f32 %v3138_v57, %v3050_v28  ;;  %v3587_v57 = vld [vmem:[%s3778_s21 + $0x170] sm:$0xff]  ;;  %s283_s21 = sand.u32 1, %s3654_s25  }
 0x26b   : > { %v3162_v40 = vrot.slane %v3587_v57, 1  ;;  %s3401_s10 = sshll.u32 %s283_s21, 3  ;;  %s3306_s22 = scalar_lea.sflag [#allocation3], %s283_s21 }
 0x26c   : > { %3269 = vxpose.xlu1.b32.cont [3/16] (narrow) %v3221_v49, 8  ;;  %s285_s18 = scalar_lea.vmem [#allocation2], %s3401_s10  ;;  %s3612_s10 = scalar_lea.hbm %s6208_s7, 16 }
 0x26d   : > { %v3163_v29 = vsel %vm1293_vm3, %v3161_v15, %v3162_v40  ;;  %v3165_v17 = vsel %vm1293_vm3, %v3162_v40, %v3164_v10  ;;  %s3321_s19 = sshll.u32 %s285_s18, 4  ;;  %p3614_p2 = scmp.lt.s32.totalorder %s3612_s10, %s3608_s27  ;;  %s3322_s19 = int_to_ptr.vmem [resolvable:$true] %s3321_s19 }
 0x26f   : > { %p3615_p3 = por %p3614_p2, %p3613_p1 }
 0x271   : > { %p3616_p5 = pnand %p3615_p3, %p3611_p0 }
 0x279   : > { %v3070_v36 = vpop.f32.mrf.mxu3 }
 0x27a   : > { %v3071_v11 = vadd.f32 %v5892_v1, %v3070_v36 }
 0x27b   : > { %v3052_v50 = vpop.f32.mrf.mxu1 }
 0x27c   : > { %v3053_v37 = vadd.f32 %v5892_v1, %v3052_v50  ;;  %v3228_v59 = vadd.f32 %v3155_v41, %v3071_v11 }
 0x27e   : > { %v3222_v21 = vadd.f32 %v3140_v63, %v3053_v37  ;;  %v3227_v63 = vadd.f32 %v3153_v20, %v3068_v12 }
 0x280   : > { %3270 = vxpose.xlu1.b32.cont [4/16] (narrow) %v3222_v21, 8 }
 0x283   : > { %v3055_v6 = vpop.f32.mrf.mxu1 }
 0x284   : > { %v3056_v53 = vadd.f32 %v5892_v1, %v3055_v6 }
 0x286   : > { %v3223_v5 = vadd.f32 %v3143_v0, %v3056_v53  ;;  %v3167_v0 = vrot.slane %v3590_v42, 1 }
 0x288   : > { %3271 = vxpose.xlu1.b32.cont [5/16] (narrow) %v3223_v5, 8  ;;  %v3168_v49 = vsel %vm1293_vm3, %v3166_v32, %v3167_v0 }
 0x289   : > { %v3251_v35 = vpop.trf.xlu0 }
 0x292   : > { %v3073_v2 = vpop.f32.mrf.mxu3 }
 0x293   : > { %v3074_v56 = vadd.f32 %v5892_v1, %v3073_v2 }
 0x295   : > { %v3229_v50 = vadd.f32 %v3158_v60, %v3074_v56 }
 0x296   : > { %v3058_v33 = vpop.f32.mrf.mxu1 }
 0x297   : > { %v3059_v23 = vadd.f32 %v5892_v1, %v3058_v33 }
 0x299   : > { %v3224_v58 = vadd.f32 %v3145_v45, %v3059_v23  ;;  %v3169_v45 = vrot.slane %v3591_v9, 1 }
 0x29b   : > { %3272 = vxpose.xlu1.b32.cont [6/16] (narrow) %v3224_v58, 8  ;;  %v3170_v37 = vsel %vm1293_vm3, %v3167_v0, %v3169_v45 }
 0x2a3   : > { %3273 = vxpose.xlu1.b32.cont [7/16] (narrow) %v3225_v19, 8 }
 0x2a5   : > { %v3076_v28 = vpop.f32.mrf.mxu3 }
 0x2a6   : > { %v3077_v62 = vadd.f32 %v5892_v1, %v3076_v28 }
 0x2a8   : > { %v3230_v18 = vadd.f32 %v3160_v31, %v3077_v62 }
 0x2ab   : > { %3274 = vxpose.xlu1.b32.cont [8/16] (narrow) %v3226_v61, 8 }
 0x2b3   : > { %3275 = vxpose.xlu1.b32.cont [9/16] (narrow) %v3227_v63, 8  ;;  %v3079_v21 = vpop.f32.mrf.mxu3 }
 0x2b4   : > { %v3080_v54 = vadd.f32 %v5892_v1, %v3079_v21 }
 0x2b6   : > { %v3231_v6 = vadd.f32 %v3163_v29, %v3080_v54 }
 0x2bb   : > { %3276 = vxpose.xlu1.b32.cont [10/16] (narrow) %v3228_v59, 8  ;;  %v3082_v38 = vpop.f32.mrf.mxu3 }
 0x2bc   : > { %v3083_v39 = vadd.f32 %v5892_v1, %v3082_v38 }
 0x2be   : > { %v3232_v5 = vadd.f32 %v3165_v17, %v3083_v39 }
 0x2c3   : > { %3277 = vxpose.xlu1.b32.cont [11/16] (narrow) %v3229_v50, 8  ;;  %v3085_v53 = vpop.f32.mrf.mxu3 }
 0x2c4   : > { %v3086_v7 = vadd.f32 %v5892_v1, %v3085_v53 }
 0x2c6   : > { %v3233_v46 = vadd.f32 %v3168_v49, %v3086_v7 }
 0x2cb   : > { %3278 = vxpose.xlu1.b32.cont [12/16] (narrow) %v3230_v18, 8  ;;  %v3088_v52 = vpop.f32.mrf.mxu3 }
 0x2cc   : > { %v3089_v22 = vadd.f32 %v5892_v1, %v3088_v52 }
 0x2ce   : > { %v3234_v24 = vadd.f32 %v3170_v37, %v3089_v22 }
 0x2d3   : > { %3279 = vxpose.xlu1.b32.cont [13/16] (narrow) %v3231_v6, 8 }
 0x2db   : > { %3280 = vxpose.xlu1.b32.cont [14/16] (narrow) %v3232_v5, 8 }
 0x2e3   : > { %3281 = vxpose.xlu1.b32.cont [15/16] (narrow) %v3233_v46, 8 }
 0x2eb   : > { %3282 = vxpose.xlu1.b32.end [16/16] (narrow) %v3234_v24, 8 }
 0x317   : > { %v3283_v48 = vpop.trf.xlu1 }
 0x318   : > { %v3301_v16 = vrot.slane %v3283_v48, 4 }
 0x31a   : > { %v3302_v1 = vsel %vm517_vm0, %v3251_v35, %v3301_v16 }
 0x31b   : > { %3304 = vst [vmem:[%s285_s18] sm:$0xff] %v3302_v1 }
 0x31c   : > { %3619 = shalt.err (!%p3616_p5)
}
 0x31d   : > { %3502 = dma.vmem_to_hbm [thread:$0]  (%p3752_p4), %s3322_s19, 128, %s3324_s20, %s3306_s22  }
 0x31e PF: > { %p3508_p6 = scmp.ge.s32.totalorder %s3670_s29, 2  ;;  %s3335_s21 = sand.u32 1, %s3650_s24  }
 0x31f   : > { %s3336_s16 = scalar_lea.sflag [#allocation3], %s3335_s21 }
 0x320   : > { %p3505_p7 = pnand %p3508_p6, %p3759_p8 }
 0x322   : > { %p3506_p9 = pneg %p3505_p7 }
 0x324   : > { %3645 = dma.done.wait (%p3506_p9), %s3336_s16, 128  }
 0x325   : > { %3647 = vsyncadd (%p3506_p9), %s3336_s16, 4294967168  ;;  %s20_s29 = sadd.s32 1, %s3670_s29   ;;  %s6673_s24 = smov %s3654_s25 }
 0x326   : > { %p17_p10 = scmp.ge.s32.totalorder %s20_s29, 4   ;;  %s6674_s25 = smov %s3658_s26 }
 0x327   : > { %s6675_s26 = smov %s3765_s14  ;;  %s6676_s27 = smov %s3666_s28 }
 0x328   : > { %s6677_s28 = smov %s6679_s9  ;;  %19 = sbr.rel (!%p17_p10) target bundleno = 4 (0x4), region = 84 }
 0x32d   :  { %3342 = vsyncpa [#allocation3], 1 }
 0x32e   :  { %3344 = vsyncpa [#allocation3 + $0x1], 1 }

</bundles_post_ra>
